<compile_context>
chip_gen: v6e
topology: v6e:2x2x1
jax: 0.10.0
libtpu: 0.0.40
codegen_flags: <defaults>
</compile_context>

<pallas_src>
import functools
import math

import jax
import jax.numpy as jnp
from jax.experimental import pallas as pl
from jax.experimental.pallas import tpu as pltpu

INV_SQRT_2 = 1.0 / math.sqrt(2.0)
INV_SQRT_3 = 1.0 / math.sqrt(3.0)
SWISH_SCALE = 1.0 / 0.6            # GemNet ScaledSiLU
DEFAULT_TILE = 1024                # row tile (multiple of 8); ~0.5 MiB per 32-wide buffer
VMEM_LIMIT_BYTES = 48 * 1024 * 1024


# ------------------------- in-kernel helpers -------------------------


def _mxdot(a, b):
    """MXU dot with bf16 operands and f32 accumulation."""
    return jnp.dot(a.astype(jnp.bfloat16), b.astype(jnp.bfloat16),
                   preferred_element_type=jnp.float32)


def _act_k(x, act):
    """ScaledSiLU with the sigmoid expressed via tanh (EUP slot, no VPU divide)."""
    if act == "swish":
        return x * (0.5 * (jnp.tanh(0.5 * x) + 1.0)) * SWISH_SCALE
    return x


def _act_ref(x, act):
    if act == "swish":
        return x * (1.0 / (1.0 + jnp.exp(-x))) * SWISH_SCALE
    return x


# ------------------------- pallas_call plumbing -------------------------


def _rspec(shape, tr):
    """Row-tiled BlockSpec: tile axis 0 with tr rows, full extent elsewhere."""
    n = len(shape) - 1
    block = (tr,) + tuple(shape[1:])
    return pl.BlockSpec(block, lambda i, n=n: (i,) + (0,) * n)


def _fspec(shape):
    """Full-array (weight) BlockSpec, identical block for every grid step."""
    nd = len(shape)
    return pl.BlockSpec(tuple(shape), lambda i, nd=nd: (0,) * nd)


def _fused_call(kernel, row_arrays, full_arrays, out_shapes, tile=DEFAULT_TILE):
    """Launch `kernel` on a 1-D row grid.

    row_arrays: arrays tiled over axis 0 (all share the same number of rows).
    full_arrays: weights, loaded whole and kept resident across grid steps.
    out_shapes: list of (shape, dtype); outputs are row-tiled like the inputs.
    """
    rows = row_arrays[0].shape[0]
    tr = min(tile, rows)
    grid = (pl.cdiv(rows, tr),)
    in_specs = ([_rspec(a.shape, tr) for a in row_arrays]
                + [_fspec(a.shape) for a in full_arrays])
    out_specs = [_rspec(s, tr) for s, _ in out_shapes]
    out_shape = [jax.ShapeDtypeStruct(s, d) for s, d in out_shapes]
    single = len(out_shapes) == 1
    return pl.pallas_call(
        kernel,
        out_shape=out_shape[0] if single else out_shape,
        grid=grid,
        in_specs=in_specs,
        out_specs=out_specs[0] if single else out_specs,
        compiler_params=pltpu.CompilerParams(
            dimension_semantics=("parallel",),
            vmem_limit_bytes=VMEM_LIMIT_BYTES),
    )(*row_arrays, *full_arrays)


# ------------------------- fused kernels -------------------------


def _msg_down_kernel(act):
    """act(m @ Wd) * (rbf @ Wr) -> act(. @ Wdown)   (dense + hadamard(rbf) + down_proj)."""
    def kernel(m_ref, rbf_ref, wd_ref, wr_ref, wdn_ref, o_ref):
        x = _act_k(_mxdot(m_ref[...], wd_ref[...]), act)
        x = x * _mxdot(rbf_ref[...], wr_ref[...])
        x = _act_k(_mxdot(x, wdn_ref[...]), act)
        o_ref[...] = x.astype(o_ref.dtype)
    return kernel


def _mul_basis_kernel(x_ref, b_ref, w_ref, o_ref):
    """x * (b @ W)   (hadamard with projected basis; ScalingFactor scale = 1)."""
    y = _mxdot(b_ref[...], w_ref[...])
    o_ref[...] = (x_ref[...].astype(jnp.float32) * y).astype(o_ref.dtype)


def _bilinear_up_kernel(act, S, Kmax, C, I, edge):
    """EfficientInteractionBilinear + bilinear weight + merged up-projections, fully fused.

    Lane-dense layouts (all 2-D):
      rbf_flat[e, s*I + i]  = rbf_W1[e, i, s]
      sph_flat[e, k*S + s]  = sph[e, s, k]
      m2_flat [e, k*C + c]  = m2[e, k, c]
    0/1 expansion matrices (resident weights) implement repeat/tile along lanes via the
    (otherwise idle) MXU so the actual contractions are full-width VPU MACs.
    """
    def kernel(rbf_ref, sph_ref, m2_ref, rep_s_ref, tile_c_sc_ref, rep_i_ref,
               tile_c_ic_ref, wflat_ref, wup_ref, oca_ref, oac_ref):
        rbf = rbf_ref[...].astype(jnp.float32)     # (tr, S*I)
        sph = sph_ref[...].astype(jnp.float32)     # (tr, Kmax*S)
        m2 = m2_ref[...].astype(jnp.float32)       # (tr, Kmax*C)
        rep_s = rep_s_ref[...]                     # (S, S*C)
        tile_c_sc = tile_c_sc_ref[...]             # (C, S*C)
        rep_i = rep_i_ref[...]                     # (I, I*C)
        tile_c_ic = tile_c_ic_ref[...]             # (C, I*C)

        # sk[e, s*C + c] = sum_k sph[e, s, k] * m2[e, k, c]   (Kmax-unrolled MAC)
        sk = None
        for k in range(Kmax):
            sph_k = sph[:, k * S:(k + 1) * S]      # (tr, S)
            m2_k = m2[:, k * C:(k + 1) * C]        # (tr, C)
            contrib = (jnp.dot(sph_k, rep_s, preferred_element_type=jnp.float32)
                       * jnp.dot(m2_k, tile_c_sc, preferred_element_type=jnp.float32))
            sk = contrib if sk is None else sk + contrib

        # tmp[e, i*C + c] = sum_s rbf[e, i, s] * sk[e, s, c]   (S-unrolled MAC)
        tmp = None
        for s in range(S):
            rbf_s = rbf[:, s * I:(s + 1) * I]      # (tr, I)
            sk_s = sk[:, s * C:(s + 1) * C]        # (tr, C)
            contrib = (jnp.dot(rbf_s, rep_i, preferred_element_type=jnp.float32)
                       * jnp.dot(sk_s, tile_c_ic, preferred_element_type=jnp.float32))
            tmp = contrib if tmp is None else tmp + contrib

        # bilinear weight contraction + merged up-projections (ca | ac)
        xb = _mxdot(tmp, wflat_ref[...])           # (tr, bil)
        y = _act_k(_mxdot(xb, wup_ref[...]), act)  # (tr, 2*edge)
        oca_ref[...] = y[:, :edge].astype(oca_ref.dtype)
        oac_ref[...] = y[:, edge:].astype(oac_ref.dtype)
    return kernel


def _block_core_kernel(act, n_before, n_after):
    """dense_ca + combine(x3,x4) + before_skip + skip + after_skip + atom-rbf hadamard."""
    def kernel(*refs):
        m_ref, x3ca_ref, x3ac_ref, x4ca_ref, x4ac_ref, rbfh_ref = refs[:6]
        w_ca, w_rbfh = refs[6], refs[7]
        wp = 8
        before = [(refs[wp + 2 * i], refs[wp + 2 * i + 1]) for i in range(n_before)]
        wp += 2 * n_before
        after = [(refs[wp + 2 * i], refs[wp + 2 * i + 1]) for i in range(n_after)]
        wp += 2 * n_after
        m_out_ref, x_atom_ref = refs[wp], refs[wp + 1]

        m = m_ref[...].astype(jnp.float32)
        skip = _act_k(_mxdot(m, w_ca[...]), act)
        x3 = (x3ca_ref[...] + x3ac_ref[...]).astype(jnp.float32) * INV_SQRT_2
        x4 = (x4ca_ref[...] + x4ac_ref[...]).astype(jnp.float32) * INV_SQRT_2
        x = (skip + x3 + x4) * INV_SQRT_3
        for w1, w2 in before:
            t = _act_k(_mxdot(x, w1[...]), act)
            t = _act_k(_mxdot(t, w2[...]), act)
            x = (x + t) * INV_SQRT_2
        mnew = (m + x) * INV_SQRT_2
        for w1, w2 in after:
            t = _act_k(_mxdot(mnew, w1[...]), act)
            t = _act_k(_mxdot(t, w2[...]), act)
            mnew = (mnew + t) * INV_SQRT_2
        m_out_ref[...] = mnew.astype(m_out_ref.dtype)
        xa = mnew * _mxdot(rbfh_ref[...], w_rbfh[...])
        x_atom_ref[...] = xa.astype(x_atom_ref.dtype)
    return kernel


def _atom_head_kernel(act, n_res):
    """dense1 + atom residual stack + (h + h2)/sqrt(2)."""
    def kernel(*refs):
        xsum_ref, h_ref, w1 = refs[0], refs[1], refs[2]
        res = [(refs[3 + 2 * i], refs[4 + 2 * i]) for i in range(n_res)]
        o_ref = refs[3 + 2 * n_res]
        t = _act_k(_mxdot(xsum_ref[...].astype(jnp.float32), w1[...]), act)
        for a, b in res:
            u = _act_k(_mxdot(t, a[...]), act)
            u = _act_k(_mxdot(u, b[...]), act)
            t = (t + u) * INV_SQRT_2
        o_ref[...] = ((h_ref[...].astype(jnp.float32) + t) * INV_SQRT_2).astype(o_ref.dtype)
    return kernel


def _edge_out_kernel(act, n_res):
    """edge embedding (concat as 2 summed dots) + residual_m stack + final m-skip."""
    def kernel(*refs):
        hca_ref, m_ref = refs[0], refs[1]
        w_h, w_m = refs[2], refs[3]
        res = [(refs[4 + 2 * i], refs[5 + 2 * i]) for i in range(n_res)]
        o_ref = refs[4 + 2 * n_res]
        m = m_ref[...].astype(jnp.float32)
        m2 = _act_k(_mxdot(hca_ref[...].astype(jnp.float32), w_h[...])
                    + _mxdot(m, w_m[...]), act)
        for a, b in res:
            u = _act_k(_mxdot(m2, a[...]), act)
            u = _act_k(_mxdot(u, b[...]), act)
            m2 = (m2 + u) * INV_SQRT_2
        o_ref[...] = ((m + m2) * INV_SQRT_2).astype(o_ref.dtype)
    return kernel


# ------------------------- fused-op wrappers -------------------------


def msg_down(m, rbf, w_dense, w_rbf, w_down, act, tile=DEFAULT_TILE):
    E = m.shape[0]
    return _fused_call(_msg_down_kernel(act), [m, rbf], [w_dense, w_rbf, w_down],
                       [((E, w_down.shape[1]), m.dtype)], tile)


def mul_basis(x, b, w, tile=DEFAULT_TILE):
    N, D = x.shape
    return _fused_call(_mul_basis_kernel, [x, b], [w], [((N, D), x.dtype)], tile)


def bilinear_up(basis, mfeat, id_reduce, Kidx, w_flat, w_up_cat, act, tile=DEFAULT_TILE):
    """EfficientInteractionBilinear (scale_sum = 1) fused with the merged up-projection."""
    rbf_W1, sph = basis                      # (E, I, S), (E, S, Kmax)
    E, I, S = rbf_W1.shape
    Kmax = sph.shape[2]
    C = mfeat.shape[1]
    edge = w_up_cat.shape[1] // 2

    # ragged scatter into dense zero-padded (E, Kmax*C)  (XLA glue, data-dependent)
    m2_flat = (jnp.zeros((E, Kmax, C), mfeat.dtype)
               .at[id_reduce, Kidx].set(mfeat).reshape(E, Kmax * C))
    # lane-dense 2-D relayouts of the basis (single XLA pass each)
    rbf_flat = jnp.transpose(rbf_W1, (0, 2, 1)).reshape(E, S * I)   # lane = s*I + i
    sph_flat = jnp.transpose(sph, (0, 2, 1)).reshape(E, Kmax * S)   # lane = k*S + s

    # constant 0/1 lane-expansion matrices (tiny resident weights)
    f32 = jnp.float32
    rep_s = (jnp.arange(S)[:, None] == (jnp.arange(S * C)[None, :] // C)).astype(f32)
    tile_c_sc = (jnp.arange(C)[:, None] == (jnp.arange(S * C)[None, :] % C)).astype(f32)
    rep_i = (jnp.arange(I)[:, None] == (jnp.arange(I * C)[None, :] // C)).astype(f32)
    tile_c_ic = (jnp.arange(C)[:, None] == (jnp.arange(I * C)[None, :] % C)).astype(f32)

    kernel = _bilinear_up_kernel(act, S=S, Kmax=Kmax, C=C, I=I, edge=edge)
    y_ca, y_ac = _fused_call(kernel, [rbf_flat, sph_flat, m2_flat],
                             [rep_s, tile_c_sc, rep_i, tile_c_ic, w_flat, w_up_cat],
                             [((E, edge), mfeat.dtype), ((E, edge), mfeat.dtype)], tile)
    return y_ca, y_ac


def block_core(m, x3_ca, x3_ac, x4_ca, x4_ac, rbf_h, params, act, tile=DEFAULT_TILE):
    E, edge = m.shape
    before, after = params["before_skip"], params["after_skip"]
    full = [params["dense_ca"], params["atom_update"]["dense_rbf"]]
    for w1, w2 in before:
        full += [w1, w2]
    for w1, w2 in after:
        full += [w1, w2]
    return _fused_call(_block_core_kernel(act, len(before), len(after)),
                       [m, x3_ca, x3_ac, x4_ca, x4_ac, rbf_h], full,
                       [((E, edge), m.dtype), ((E, edge), m.dtype)], tile)


def atom_head(sum_x, h, p_atom, act, tile=DEFAULT_TILE):
    nAtoms, atom_dim = h.shape
    full = [p_atom["dense1"]]
    for w1, w2 in p_atom["res"]:
        full += [w1, w2]
    return _fused_call(_atom_head_kernel(act, len(p_atom["res"])),
                       [sum_x, h], full, [((nAtoms, atom_dim), h.dtype)], tile)


def edge_out(h_ca, m, p_concat, res_m, act, tile=DEFAULT_TILE):
    E, edge = m.shape
    two_atom = h_ca.shape[1]
    w = p_concat["dense"]                    # (2*atom + edge, edge)
    w_h, w_m = w[:two_atom], w[two_atom:]
    full = [w_h, w_m]
    for w1, w2 in res_m:
        full += [w1, w2]
    return _fused_call(_edge_out_kernel(act, len(res_m)),
                       [h_ca, m], full, [((E, edge), m.dtype)], tile)


# ------------------------- InteractionBlock forward (Pallas path) -------------------------


def interaction_block_pallas(params, h, m, rbf4, cbf4, sbf4, Kidx4, rbf3, cbf3, Kidx3,
                             id_swap, id3_expand_ba, id3_reduce_ca, id4_reduce_ca,
                             id4_expand_intm_db, id4_expand_abd, rbf_h, id_c, id_a,
                             act="swish", tile=DEFAULT_TILE):
    nAtoms = h.shape[0]
    pq, pt = params["quad"], params["trip"]

    # ---- quadruplet message path ----
    x_db = msg_down(m, rbf4, pq["dense_db"], pq["mlp_rbf"], pq["down_projection"], act, tile)
    x_db = x_db[id4_expand_intm_db]                      # gather (XLA glue)
    x_db = mul_basis(x_db, cbf4, pq["mlp_cbf"], tile)
    x_db = x_db[id4_expand_abd]                          # gather (XLA glue)
    x4_ca, x4_ac = bilinear_up(sbf4, x_db, id4_reduce_ca, Kidx4, pq["mlp_sbf_flat"],
                               pq["up_projection_cat"], act, tile)
    x4_ac = x4_ac[id_swap]                               # gather (XLA glue)

    # ---- triplet message path ----
    x_ba = msg_down(m, rbf3, pt["dense_ba"], pt["mlp_rbf"], pt["down_projection"], act, tile)
    x_ba = x_ba[id3_expand_ba]                           # gather (XLA glue)
    x3_ca, x3_ac = bilinear_up(cbf3, x_ba, id3_reduce_ca, Kidx3, pt["mlp_cbf_flat"],
                               pt["up_projection_cat"], act, tile)
    x3_ac = x3_ac[id_swap]                               # gather (XLA glue)

    # ---- dense_ca + combine + residual stacks + edge skip + atom-rbf hadamard ----
    m_new, x_atom = block_core(m, x3_ca, x3_ac, x4_ca, x4_ac, rbf_h, params, act, tile)

    # ---- atom scatter-add + atom head + h skip ----
    sum_x = jnp.zeros((nAtoms, m_new.shape[1]), m_new.dtype).at[id_a].add(x_atom)
    h_new = atom_head(sum_x, h, params["atom_update"], act, tile)

    # ---- edge embedding + residual_m + final m skip ----
    h_ca = jnp.concatenate([h_new[id_c], h_new[id_a]], axis=1)   # gathers (XLA glue)
    m_out = edge_out(h_ca, m_new, params["concat"], params["residual_m"], act, tile)
    return h_new, m_out


# ------------------------- pure-JAX reference (op-by-op, fp32 dots) -------------------------


def _ref_dense(x, w, act=None):
    return _act_ref(jnp.dot(x, w, precision="highest"), act)


def _ref_residual(x, w1, w2, act):
    return (x + _ref_dense(_ref_dense(x, w1, act), w2, act)) * INV_SQRT_2


def _ref_bilinear(basis, mfeat, id_reduce, Kidx, w_flat):
    rbf_W1, sph = basis
    E, I, S = rbf_W1.shape
    Kmax, C = sph.shape[2], mfeat.shape[1]
    m2 = jnp.zeros((E, Kmax, C), mfeat.dtype).at[id_reduce, Kidx].set(mfeat)
    sum_k = jnp.einsum("esk,ekc->esc", sph, m2, precision="highest")
    tmp = jnp.einsum("eis,esc->eic", rbf_W1, sum_k, precision="highest")
    return jnp.dot(tmp.reshape(E, I * C), w_flat, precision="highest")


def interaction_block_ref(params, h, m, rbf4, cbf4, sbf4, Kidx4, rbf3, cbf3, Kidx3,
                          id_swap, id3_expand_ba, id3_reduce_ca, id4_reduce_ca,
                          id4_expand_intm_db, id4_expand_abd, rbf_h, id_c, id_a,
                          act="swish"):
    pq, pt = params["quad"], params["trip"]

    x = _ref_dense(m, pq["dense_db"], act)
    x = x * _ref_dense(rbf4, pq["mlp_rbf"])
    x = _ref_dense(x, pq["down_projection"], act)[id4_expand_intm_db]
    x = (x * _ref_dense(cbf4, pq["mlp_cbf"]))[id4_expand_abd]
    x = _ref_bilinear(sbf4, x, id4_reduce_ca, Kidx4, pq["mlp_sbf_flat"])
    x4 = (_ref_dense(x, pq["up_projection_ca"], act)
          + _ref_dense(x, pq["up_projection_ac"], act)[id_swap]) * INV_SQRT_2

    x = _ref_dense(m, pt["dense_ba"], act)
    x = x * _ref_dense(rbf3, pt["mlp_rbf"])
    x = _ref_dense(x, pt["down_projection"], act)[id3_expand_ba]
    x = _ref_bilinear(cbf3, x, id3_reduce_ca, Kidx3, pt["mlp_cbf_flat"])
    x3 = (_ref_dense(x, pt["up_projection_ca"], act)
          + _ref_dense(x, pt["up_projection_ac"], act)[id_swap]) * INV_SQRT_2

    x = (_ref_dense(m, params["dense_ca"], act) + x3 + x4) * INV_SQRT_3
    for w1, w2 in params["before_skip"]:
        x = _ref_residual(x, w1, w2, act)
    m1 = (m + x) * INV_SQRT_2
    for w1, w2 in params["after_skip"]:
        m1 = _ref_residual(m1, w1, w2, act)

    pa = params["atom_update"]
    xa = m1 * _ref_dense(rbf_h, pa["dense_rbf"])
    s = jnp.zeros((h.shape[0], m1.shape[1]), m1.dtype).at[id_a].add(xa)
    t = _ref_dense(s, pa["dense1"], act)
    for w1, w2 in pa["res"]:
        t = _ref_residual(t, w1, w2, act)
    h_new = (h + t) * INV_SQRT_2

    m2 = _act_ref(jnp.dot(jnp.concatenate([h_new[id_c], h_new[id_a], m1], axis=-1),
                          params["concat"]["dense"], precision="highest"), act)
    for w1, w2 in params["residual_m"]:
        m2 = _ref_residual(m2, w1, w2, act)
    m_out = (m1 + m2) * INV_SQRT_2
    return h_new, m_out


# ------------------------- deterministic parameter init -------------------------


def _init_dense(key, n_in, n_out):
    return jax.random.normal(key, (n_in, n_out), jnp.float32) / math.sqrt(float(n_in))


def _init_bilinear_flat(key, emb, interm, out):
    # bilinear weight W (C=emb, I=interm, O=out) pre-flattened to (I*C, O), matching the
    # flat (tr, I*C) accumulator laid out lane-index = i*C + c.
    w = jax.random.normal(key, (emb, interm, out), jnp.float32) / math.sqrt(float(emb * interm))
    return jnp.transpose(w, (1, 0, 2)).reshape(interm * emb, out)


def init_params(key, c):
    keys = iter(jax.random.split(key, 64))
    nxt = lambda: next(keys)
    p = {"dense_ca": _init_dense(nxt(), c["edge"], c["edge"])}

    q_up_ca = _init_dense(nxt(), c["bil_quad"], c["edge"])
    q_up_ac = _init_dense(nxt(), c["bil_quad"], c["edge"])
    p["quad"] = {
        "dense_db": _init_dense(nxt(), c["edge"], c["edge"]),
        "mlp_rbf": _init_dense(nxt(), c["rbf"], c["edge"]),
        "mlp_cbf": _init_dense(nxt(), c["cbf"], c["quad"]),
        "mlp_sbf_flat": _init_bilinear_flat(nxt(), c["quad"], c["sbf"], c["bil_quad"]),
        "down_projection": _init_dense(nxt(), c["edge"], c["quad"]),
        "up_projection_ca": q_up_ca,
        "up_projection_ac": q_up_ac,
        "up_projection_cat": jnp.concatenate([q_up_ca, q_up_ac], axis=1),
    }
    t_up_ca = _init_dense(nxt(), c["bil_trip"], c["edge"])
    t_up_ac = _init_dense(nxt(), c["bil_trip"], c["edge"])
    p["trip"] = {
        "dense_ba": _init_dense(nxt(), c["edge"], c["edge"]),
        "mlp_rbf": _init_dense(nxt(), c["rbf"], c["edge"]),
        "mlp_cbf_flat": _init_bilinear_flat(nxt(), c["trip"], c["cbf"], c["bil_trip"]),
        "down_projection": _init_dense(nxt(), c["edge"], c["trip"]),
        "up_projection_ca": t_up_ca,
        "up_projection_ac": t_up_ac,
        "up_projection_cat": jnp.concatenate([t_up_ca, t_up_ac], axis=1),
    }
    p["before_skip"] = [(_init_dense(nxt(), c["edge"], c["edge"]),
                         _init_dense(nxt(), c["edge"], c["edge"]))
                        for _ in range(c["num_before_skip"])]
    p["after_skip"] = [(_init_dense(nxt(), c["edge"], c["edge"]),
                        _init_dense(nxt(), c["edge"], c["edge"]))
                       for _ in range(c["num_after_skip"])]
    p["atom_update"] = {
        "dense_rbf": _init_dense(nxt(), c["rbf"], c["edge"]),
        "dense1": _init_dense(nxt(), c["edge"], c["atom"]),
        "res": [(_init_dense(nxt(), c["atom"], c["atom"]),
                 _init_dense(nxt(), c["atom"], c["atom"]))
                for _ in range(c["num_atom"])],
    }
    p["concat"] = {"dense": _init_dense(nxt(), 2 * c["atom"] + c["edge"], c["edge"])}
    p["residual_m"] = [(_init_dense(nxt(), c["edge"], c["edge"]),
                        _init_dense(nxt(), c["edge"], c["edge"]))
                       for _ in range(c["num_concat"])]
    return p


# ------------------------- main -------------------------

if __name__ == "__main__":
    cfg = dict(atom=16, edge=32, trip=8, quad=8, rbf=16, cbf=16, sbf=16,
               bil_trip=16, bil_quad=16,
               num_before_skip=1, num_after_skip=1, num_concat=1, num_atom=1)
    nAtoms, nEdges = 8, 16
    nTrip, nQuad, nIntm = 32, 32, 24
    Kmax3, Kmax4 = 2, 2
    S3, S4 = 8, 16

    key = jax.random.PRNGKey(0)
    k_param, k_in = jax.random.split(key)
    params = init_params(k_param, cfg)

    kin = iter(jax.random.split(k_in, 32))
    nk = lambda: next(kin)

    h = jax.random.normal(nk(), (nAtoms, cfg["atom"]), jnp.float32)
    m = jax.random.normal(nk(), (nEdges, cfg["edge"]), jnp.float32)
    rbf4 = jax.random.normal(nk(), (nEdges, cfg["rbf"]), jnp.float32)
    cbf4 = jax.random.normal(nk(), (nIntm, cfg["cbf"]), jnp.float32)
    sbf4 = (jax.random.normal(nk(), (nEdges, cfg["sbf"], S4), jnp.float32),
            jax.random.normal(nk(), (nEdges, S4, Kmax4), jnp.float32))
    rbf3 = jax.random.normal(nk(), (nEdges, cfg["rbf"]), jnp.float32)
    cbf3 = (jax.random.normal(nk(), (nEdges, cfg["cbf"], S3), jnp.float32),
            jax.random.normal(nk(), (nEdges, S3, Kmax3), jnp.float32))
    rbf_h = jax.random.normal(nk(), (nEdges, cfg["rbf"]), jnp.float32)

    # index arrays (consistent ragged structure; (edge, Kidx) pairs are unique)
    id_swap = jnp.flip(jnp.arange(nEdges))
    id3_expand_ba = jax.random.randint(nk(), (nTrip,), 0, nEdges)
    id3_reduce_ca = jnp.arange(nTrip, dtype=jnp.int32) // Kmax3
    Kidx3 = jnp.arange(nTrip, dtype=jnp.int32) % Kmax3
    id4_reduce_ca = jnp.arange(nQuad, dtype=jnp.int32) // Kmax4
    Kidx4 = jnp.arange(nQuad, dtype=jnp.int32) % Kmax4
    id4_expand_intm_db = jax.random.randint(nk(), (nIntm,), 0, nEdges)
    id4_expand_abd = jax.random.randint(nk(), (nQuad,), 0, nIntm)
    id_c = jax.random.randint(nk(), (nEdges,), 0, nAtoms)
    id_a = jax.random.randint(nk(), (nEdges,), 0, nAtoms)

    args = (params, h, m, rbf4, cbf4, sbf4, Kidx4, rbf3, cbf3, Kidx3,
            id_swap, id3_expand_ba, id3_reduce_ca, id4_reduce_ca,
            id4_expand_intm_db, id4_expand_abd, rbf_h, id_c, id_a)

    fwd_pallas = jax.jit(functools.partial(interaction_block_pallas, act="swish"))
    h_out, m_out = fwd_pallas(*args)
    jax.block_until_ready((h_out, m_out))

    fwd_ref = jax.jit(functools.partial(interaction_block_ref, act="swish"))
    h_ref, m_ref = fwd_ref(*args)
    jax.block_until_ready((h_ref, m_ref))

    assert h_out.shape == (nAtoms, cfg["atom"]) and m_out.shape == (nEdges, cfg["edge"])
    assert bool(jnp.all(jnp.isfinite(h_out))) and bool(jnp.all(jnp.isfinite(m_out)))
    # Tolerance sized for bf16 matmul operands (f32 accumulate) across ~15 chained layers
    # vs. the strict-f32 reference.
    assert bool(jnp.allclose(h_out, h_ref, atol=6e-2, rtol=6e-2))
    assert bool(jnp.allclose(m_out, m_ref, atol=6e-2, rtol=6e-2))

    print("KERNEL_OK")
</pallas_src>

<mosaic_0001>
module attributes {stable_mosaic.version = 11 : i64} {
  func.func @kernel(%arg0: i32, %arg1: memref<16x32xf32, #tpu.memory_space<vmem>>, %arg2: memref<16x16xf32, #tpu.memory_space<vmem>>, %arg3: memref<32x32xf32, #tpu.memory_space<vmem>>, %arg4: memref<16x32xf32, #tpu.memory_space<vmem>>, %arg5: memref<32x8xf32, #tpu.memory_space<vmem>>, %arg6: memref<16x8xf32, #tpu.memory_space<vmem>>) attributes {dimension_semantics = [#tpu.dimension_semantics<parallel>], iteration_bounds = array<i64: 1>, scalar_prefetch = 0 : i64, scratch_operands = 0 : i64, tpu.core_type = #tpu.core_type<tc>, window_params = [{transform_indices = @transform_0, window_bounds = array<i64: 16, 32>}, {transform_indices = @transform_1, window_bounds = array<i64: 16, 16>}, {pipeline_mode = #tpu.pipeline_mode<synchronous>, transform_indices = @transform_2, window_bounds = array<i64: 32, 32>}, {pipeline_mode = #tpu.pipeline_mode<synchronous>, transform_indices = @transform_3, window_bounds = array<i64: 16, 32>}, {pipeline_mode = #tpu.pipeline_mode<synchronous>, transform_indices = @transform_4, window_bounds = array<i64: 32, 8>}, {transform_indices = @transform_5, window_bounds = array<i64: 16, 8>}]} {
    %c0 = arith.constant 0 : index
    %c0_0 = arith.constant 0 : index
    %0 = vector.load %arg1[%c0, %c0_0] : memref<16x32xf32, #tpu.memory_space<vmem>>, vector<16x32xf32>
    %c0_1 = arith.constant 0 : index
    %c0_2 = arith.constant 0 : index
    %1 = vector.load %arg3[%c0_1, %c0_2] : memref<32x32xf32, #tpu.memory_space<vmem>>, vector<32x32xf32>
    %2 = arith.truncf %0 : vector<16x32xf32> to vector<16x32xbf16>
    %3 = arith.truncf %1 : vector<32x32xf32> to vector<32x32xbf16>
    %cst = arith.constant dense<0.000000e+00> : vector<16x32xf32>
    %4 = tpu.matmul %2, %3, %cst {dimension_numbers = #tpu.dot_dimension_numbers<[1], [0], [0], [1], [0, 0, 1, 1], [], []>} : vector<16x32xbf16>, vector<32x32xbf16>, vector<16x32xf32> -> vector<16x32xf32>
    %cst_3 = arith.constant 5.000000e-01 : f32
    %5 = vector.broadcast %cst_3 : f32 to vector<16x32xf32>
    %6 = arith.mulf %5, %4 : vector<16x32xf32>
    %7 = math.tanh %6 : vector<16x32xf32>
    %cst_4 = arith.constant 1.000000e+00 : f32
    %8 = vector.broadcast %cst_4 : f32 to vector<16x32xf32>
    %9 = arith.addf %7, %8 : vector<16x32xf32>
    %cst_5 = arith.constant 5.000000e-01 : f32
    %10 = vector.broadcast %cst_5 : f32 to vector<16x32xf32>
    %11 = arith.mulf %10, %9 : vector<16x32xf32>
    %12 = arith.mulf %4, %11 : vector<16x32xf32>
    %cst_6 = arith.constant 1.66666663 : f32
    %13 = vector.broadcast %cst_6 : f32 to vector<16x32xf32>
    %14 = arith.mulf %12, %13 : vector<16x32xf32>
    %c0_7 = arith.constant 0 : index
    %c0_8 = arith.constant 0 : index
    %15 = vector.load %arg2[%c0_7, %c0_8] : memref<16x16xf32, #tpu.memory_space<vmem>>, vector<16x16xf32>
    %c0_9 = arith.constant 0 : index
    %c0_10 = arith.constant 0 : index
    %16 = vector.load %arg4[%c0_9, %c0_10] : memref<16x32xf32, #tpu.memory_space<vmem>>, vector<16x32xf32>
    %17 = arith.truncf %15 : vector<16x16xf32> to vector<16x16xbf16>
    %18 = arith.truncf %16 : vector<16x32xf32> to vector<16x32xbf16>
    %cst_11 = arith.constant dense<0.000000e+00> : vector<16x32xf32>
    %19 = tpu.matmul %17, %18, %cst_11 {dimension_numbers = #tpu.dot_dimension_numbers<[1], [0], [0], [1], [0, 0, 1, 1], [], []>} : vector<16x16xbf16>, vector<16x32xbf16>, vector<16x32xf32> -> vector<16x32xf32>
    %20 = arith.mulf %14, %19 : vector<16x32xf32>
    %c0_12 = arith.constant 0 : index
    %c0_13 = arith.constant 0 : index
    %21 = vector.load %arg5[%c0_12, %c0_13] : memref<32x8xf32, #tpu.memory_space<vmem>>, vector<32x8xf32>
    %22 = arith.truncf %20 : vector<16x32xf32> to vector<16x32xbf16>
    %23 = arith.truncf %21 : vector<32x8xf32> to vector<32x8xbf16>
    %cst_14 = arith.constant dense<0.000000e+00> : vector<16x8xf32>
    %24 = tpu.matmul %22, %23, %cst_14 {dimension_numbers = #tpu.dot_dimension_numbers<[1], [0], [0], [1], [0, 0, 1, 1], [], []>} : vector<16x32xbf16>, vector<32x8xbf16>, vector<16x8xf32> -> vector<16x8xf32>
    %cst_15 = arith.constant 5.000000e-01 : f32
    %25 = vector.broadcast %cst_15 : f32 to vector<16x8xf32>
    %26 = arith.mulf %25, %24 : vector<16x8xf32>
    %27 = math.tanh %26 : vector<16x8xf32>
    %cst_16 = arith.constant 1.000000e+00 : f32
    %28 = vector.broadcast %cst_16 : f32 to vector<16x8xf32>
    %29 = arith.addf %27, %28 : vector<16x8xf32>
    %cst_17 = arith.constant 5.000000e-01 : f32
    %30 = vector.broadcast %cst_17 : f32 to vector<16x8xf32>
    %31 = arith.mulf %30, %29 : vector<16x8xf32>
    %32 = arith.mulf %24, %31 : vector<16x8xf32>
    %cst_18 = arith.constant 1.66666663 : f32
    %33 = vector.broadcast %cst_18 : f32 to vector<16x8xf32>
    %34 = arith.mulf %32, %33 : vector<16x8xf32>
    %c0_19 = arith.constant 0 : index
    %c0_20 = arith.constant 0 : index
    %35 = vector.load %arg6[%c0_19, %c0_20] : memref<16x8xf32, #tpu.memory_space<vmem>>, vector<16x8xf32>
    tpu.vector_store %arg6[%c0_19, %c0_20], %34 {strides = array<i32>} : memref<16x8xf32, #tpu.memory_space<vmem>>, vector<16x8xf32>,
    return
  }
  func.func @transform_0(%arg0: i32) -> (i32, i32) {
    %c0_i32 = arith.constant 0 : i32
    %c0_i32_0 = arith.constant 0 : i32
    return %arg0, %c0_i32 : i32, i32
  }
  func.func @transform_1(%arg0: i32) -> (i32, i32) {
    %c0_i32 = arith.constant 0 : i32
    %c0_i32_0 = arith.constant 0 : i32
    return %arg0, %c0_i32 : i32, i32
  }
  func.func @transform_2(%arg0: i32) -> (i32, i32) {
    %c0_i32 = arith.constant 0 : i32
    %c0_i32_0 = arith.constant 0 : i32
    %c0_i32_1 = arith.constant 0 : i32
    return %c0_i32, %c0_i32_0 : i32, i32
  }
  func.func @transform_3(%arg0: i32) -> (i32, i32) {
    %c0_i32 = arith.constant 0 : i32
    %c0_i32_0 = arith.constant 0 : i32
    %c0_i32_1 = arith.constant 0 : i32
    return %c0_i32, %c0_i32_0 : i32, i32
  }
  func.func @transform_4(%arg0: i32) -> (i32, i32) {
    %c0_i32 = arith.constant 0 : i32
    %c0_i32_0 = arith.constant 0 : i32
    %c0_i32_1 = arith.constant 0 : i32
    return %c0_i32, %c0_i32_0 : i32, i32
  }
  func.func @transform_5(%arg0: i32) -> (i32, i32) {
    %c0_i32 = arith.constant 0 : i32
    %c0_i32_0 = arith.constant 0 : i32
    return %arg0, %c0_i32 : i32, i32
  }
}

module attributes {stable_mosaic.version = 11 : i64} {
  func.func @kernel(%arg0: i32, %arg1: memref<16x128xf32, #tpu.memory_space<vmem>>, %arg2: memref<16x16xf32, #tpu.memory_space<vmem>>, %arg3: memref<16x16xf32, #tpu.memory_space<vmem>>, %arg4: memref<8x64xf32, #tpu.memory_space<vmem>>, %arg5: memref<8x64xf32, #tpu.memory_space<vmem>>, %arg6: memref<16x128xf32, #tpu.memory_space<vmem>>, %arg7: memref<8x128xf32, #tpu.memory_space<vmem>>, %arg8: memref<128x16xf32, #tpu.memory_space<vmem>>, %arg9: memref<16x64xf32, #tpu.memory_space<vmem>>, %arg10: memref<16x32xf32, #tpu.memory_space<vmem>>, %arg11: memref<16x32xf32, #tpu.memory_space<vmem>>) attributes {dimension_semantics = [#tpu.dimension_semantics<parallel>], iteration_bounds = array<i64: 1>, scalar_prefetch = 0 : i64, scratch_operands = 0 : i64, tpu.core_type = #tpu.core_type<tc>, window_params = [{transform_indices = @transform_0, window_bounds = array<i64: 16, 128>}, {transform_indices = @transform_1, window_bounds = array<i64: 16, 16>}, {transform_indices = @transform_2, window_bounds = array<i64: 16, 16>}, {pipeline_mode = #tpu.pipeline_mode<synchronous>, transform_indices = @transform_3, window_bounds = array<i64: 8, 64>}, {pipeline_mode = #tpu.pipeline_mode<synchronous>, transform_indices = @transform_4, window_bounds = array<i64: 8, 64>}, {pipeline_mode = #tpu.pipeline_mode<synchronous>, transform_indices = @transform_5, window_bounds = array<i64: 16, 128>}, {pipeline_mode = #tpu.pipeline_mode<synchronous>, transform_indices = @transform_6, window_bounds = array<i64: 8, 128>}, {pipeline_mode = #tpu.pipeline_mode<synchronous>, transform_indices = @transform_7, window_bounds = array<i64: 128, 16>}, {pipeline_mode = #tpu.pipeline_mode<synchronous>, transform_indices = @transform_8, window_bounds = array<i64: 16, 64>}, {transform_indices = @transform_9, window_bounds = array<i64: 16, 32>}, {transform_indices = @transform_10, window_bounds = array<i64: 16, 32>}]} {
    %c0 = arith.constant 0 : index
    %c0_0 = arith.constant 0 : index
    %0 = vector.load %arg1[%c0, %c0_0] : memref<16x128xf32, #tpu.memory_space<vmem>>, vector<16x128xf32>
    %c0_1 = arith.constant 0 : index
    %c0_2 = arith.constant 0 : index
    %1 = vector.load %arg2[%c0_1, %c0_2] : memref<16x16xf32, #tpu.memory_space<vmem>>, vector<16x16xf32>
    %c0_3 = arith.constant 0 : index
    %c0_4 = arith.constant 0 : index
    %2 = vector.load %arg3[%c0_3, %c0_4] : memref<16x16xf32, #tpu.memory_space<vmem>>, vector<16x16xf32>
    %c0_5 = arith.constant 0 : index
    %c0_6 = arith.constant 0 : index
    %3 = vector.load %arg4[%c0_5, %c0_6] : memref<8x64xf32, #tpu.memory_space<vmem>>, vector<8x64xf32>
    %c0_7 = arith.constant 0 : index
    %c0_8 = arith.constant 0 : index
    %4 = vector.load %arg5[%c0_7, %c0_8] : memref<8x64xf32, #tpu.memory_space<vmem>>, vector<8x64xf32>
    %c0_9 = arith.constant 0 : index
    %c0_10 = arith.constant 0 : index
    %5 = vector.load %arg6[%c0_9, %c0_10] : memref<16x128xf32, #tpu.memory_space<vmem>>, vector<16x128xf32>
    %c0_11 = arith.constant 0 : index
    %c0_12 = arith.constant 0 : index
    %6 = vector.load %arg7[%c0_11, %c0_12] : memref<8x128xf32, #tpu.memory_space<vmem>>, vector<8x128xf32>
    %7 = vector.extract_strided_slice %1 {offsets = [0, 0], sizes = [16, 8], strides = [1, 1]} : vector<16x16xf32> to vector<16x8xf32>
    %8 = vector.extract_strided_slice %2 {offsets = [0, 0], sizes = [16, 8], strides = [1, 1]} : vector<16x16xf32> to vector<16x8xf32>
    %cst = arith.constant dense<0.000000e+00> : vector<16x64xf32>
    %9 = tpu.matmul %7, %3, %cst {dimension_numbers = #tpu.dot_dimension_numbers<[1], [0], [0], [1], [0, 0, 1, 1], [], []>} : vector<16x8xf32>, vector<8x64xf32>, vector<16x64xf32> -> vector<16x64xf32>
    %cst_13 = arith.constant dense<0.000000e+00> : vector<16x64xf32>
    %10 = tpu.matmul %8, %4, %cst_13 {dimension_numbers = #tpu.dot_dimension_numbers<[1], [0], [0], [1], [0, 0, 1, 1], [], []>} : vector<16x8xf32>, vector<8x64xf32>, vector<16x64xf32> -> vector<16x64xf32>
    %11 = arith.mulf %9, %10 : vector<16x64xf32>
    %12 = vector.extract_strided_slice %1 {offsets = [0, 8], sizes = [16, 8], strides = [1, 1]} : vector<16x16xf32> to vector<16x8xf32>
    %13 = vector.extract_strided_slice %2 {offsets = [0, 8], sizes = [16, 8], strides = [1, 1]} : vector<16x16xf32> to vector<16x8xf32>
    %cst_14 = arith.constant dense<0.000000e+00> : vector<16x64xf32>
    %14 = tpu.matmul %12, %3, %cst_14 {dimension_numbers = #tpu.dot_dimension_numbers<[1], [0], [0], [1], [0, 0, 1, 1], [], []>} : vector<16x8xf32>, vector<8x64xf32>, vector<16x64xf32> -> vector<16x64xf32>
    %cst_15 = arith.constant dense<0.000000e+00> : vector<16x64xf32>
    %15 = tpu.matmul %13, %4, %cst_15 {dimension_numbers = #tpu.dot_dimension_numbers<[1], [0], [0], [1], [0, 0, 1, 1], [], []>} : vector<16x8xf32>, vector<8x64xf32>, vector<16x64xf32> -> vector<16x64xf32>
    %16 = arith.mulf %14, %15 : vector<16x64xf32>
    %17 = arith.addf %11, %16 : vector<16x64xf32>
    %18 = vector.extract_strided_slice %0 {offsets = [0, 0], sizes = [16, 16], strides = [1, 1]} : vector<16x128xf32> to vector<16x16xf32>
    %19 = vector.extract_strided_slice %17 {offsets = [0, 0], sizes = [16, 8], strides = [1, 1]} : vector<16x64xf32> to vector<16x8xf32>
    %cst_16 = arith.constant dense<0.000000e+00> : vector<16x128xf32>
    %20 = tpu.matmul %18, %5, %cst_16 {dimension_numbers = #tpu.dot_dimension_numbers<[1], [0], [0], [1], [0, 0, 1, 1], [], []>} : vector<16x16xf32>, vector<16x128xf32>, vector<16x128xf32> -> vector<16x128xf32>
    %cst_17 = arith.constant dense<0.000000e+00> : vector<16x128xf32>
    %21 = tpu.matmul %19, %6, %cst_17 {dimension_numbers = #tpu.dot_dimension_numbers<[1], [0], [0], [1], [0, 0, 1, 1], [], []>} : vector<16x8xf32>, vector<8x128xf32>, vector<16x128xf32> -> vector<16x128xf32>
    %22 = arith.mulf %20, %21 : vector<16x128xf32>
    %23 = vector.extract_strided_slice %0 {offsets = [0, 16], sizes = [16, 16], strides = [1, 1]} : vector<16x128xf32> to vector<16x16xf32>
    %24 = vector.extract_strided_slice %17 {offsets = [0, 8], sizes = [16, 8], strides = [1, 1]} : vector<16x64xf32> to vector<16x8xf32>
    %cst_18 = arith.constant dense<0.000000e+00> : vector<16x128xf32>
    %25 = tpu.matmul %23, %5, %cst_18 {dimension_numbers = #tpu.dot_dimension_numbers<[1], [0], [0], [1], [0, 0, 1, 1], [], []>} : vector<16x16xf32>, vector<16x128xf32>, vector<16x128xf32> -> vector<16x128xf32>
    %cst_19 = arith.constant dense<0.000000e+00> : vector<16x128xf32>
    %26 = tpu.matmul %24, %6, %cst_19 {dimension_numbers = #tpu.dot_dimension_numbers<[1], [0], [0], [1], [0, 0, 1, 1], [], []>} : vector<16x8xf32>, vector<8x128xf32>, vector<16x128xf32> -> vector<16x128xf32>
    %27 = arith.mulf %25, %26 : vector<16x128xf32>
    %28 = arith.addf %22, %27 : vector<16x128xf32>
    %29 = vector.extract_strided_slice %0 {offsets = [0, 32], sizes = [16, 16], strides = [1, 1]} : vector<16x128xf32> to vector<16x16xf32>
    %30 = vector.extract_strided_slice %17 {offsets = [0, 16], sizes = [16, 8], strides = [1, 1]} : vector<16x64xf32> to vector<16x8xf32>
    %cst_20 = arith.constant dense<0.000000e+00> : vector<16x128xf32>
    %31 = tpu.matmul %29, %5, %cst_20 {dimension_numbers = #tpu.dot_dimension_numbers<[1], [0], [0], [1], [0, 0, 1, 1], [], []>} : vector<16x16xf32>, vector<16x128xf32>, vector<16x128xf32> -> vector<16x128xf32>
    %cst_21 = arith.constant dense<0.000000e+00> : vector<16x128xf32>
    %32 = tpu.matmul %30, %6, %cst_21 {dimension_numbers = #tpu.dot_dimension_numbers<[1], [0], [0], [1], [0, 0, 1, 1], [], []>} : vector<16x8xf32>, vector<8x128xf32>, vector<16x128xf32> -> vector<16x128xf32>
    %33 = arith.mulf %31, %32 : vector<16x128xf32>
    %34 = arith.addf %28, %33 : vector<16x128xf32>
    %35 = vector.extract_strided_slice %0 {offsets = [0, 48], sizes = [16, 16], strides = [1, 1]} : vector<16x128xf32> to vector<16x16xf32>
    %36 = vector.extract_strided_slice %17 {offsets = [0, 24], sizes = [16, 8], strides = [1, 1]} : vector<16x64xf32> to vector<16x8xf32>
    %cst_22 = arith.constant dense<0.000000e+00> : vector<16x128xf32>
    %37 = tpu.matmul %35, %5, %cst_22 {dimension_numbers = #tpu.dot_dimension_numbers<[1], [0], [0], [1], [0, 0, 1, 1], [], []>} : vector<16x16xf32>, vector<16x128xf32>, vector<16x128xf32> -> vector<16x128xf32>
    %cst_23 = arith.constant dense<0.000000e+00> : vector<16x128xf32>
    %38 = tpu.matmul %36, %6, %cst_23 {dimension_numbers = #tpu.dot_dimension_numbers<[1], [0], [0], [1], [0, 0, 1, 1], [], []>} : vector<16x8xf32>, vector<8x128xf32>, vector<16x128xf32> -> vector<16x128xf32>
    %39 = arith.mulf %37, %38 : vector<16x128xf32>
    %40 = arith.addf %34, %39 : vector<16x128xf32>
    %41 = vector.extract_strided_slice %0 {offsets = [0, 64], sizes = [16, 16], strides = [1, 1]} : vector<16x128xf32> to vector<16x16xf32>
    %42 = vector.extract_strided_slice %17 {offsets = [0, 32], sizes = [16, 8], strides = [1, 1]} : vector<16x64xf32> to vector<16x8xf32>
    %cst_24 = arith.constant dense<0.000000e+00> : vector<16x128xf32>
    %43 = tpu.matmul %41, %5, %cst_24 {dimension_numbers = #tpu.dot_dimension_numbers<[1], [0], [0], [1], [0, 0, 1, 1], [], []>} : vector<16x16xf32>, vector<16x128xf32>, vector<16x128xf32> -> vector<16x128xf32>
    %cst_25 = arith.constant dense<0.000000e+00> : vector<16x128xf32>
    %44 = tpu.matmul %42, %6, %cst_25 {dimension_numbers = #tpu.dot_dimension_numbers<[1], [0], [0], [1], [0, 0, 1, 1], [], []>} : vector<16x8xf32>, vector<8x128xf32>, vector<16x128xf32> -> vector<16x128xf32>
    %45 = arith.mulf %43, %44 : vector<16x128xf32>
    %46 = arith.addf %40, %45 : vector<16x128xf32>
    %47 = vector.extract_strided_slice %0 {offsets = [0, 80], sizes = [16, 16], strides = [1, 1]} : vector<16x128xf32> to vector<16x16xf32>
    %48 = vector.extract_strided_slice %17 {offsets = [0, 40], sizes = [16, 8], strides = [1, 1]} : vector<16x64xf32> to vector<16x8xf32>
    %cst_26 = arith.constant dense<0.000000e+00> : vector<16x128xf32>
    %49 = tpu.matmul %47, %5, %cst_26 {dimension_numbers = #tpu.dot_dimension_numbers<[1], [0], [0], [1], [0, 0, 1, 1], [], []>} : vector<16x16xf32>, vector<16x128xf32>, vector<16x128xf32> -> vector<16x128xf32>
    %cst_27 = arith.constant dense<0.000000e+00> : vector<16x128xf32>
    %50 = tpu.matmul %48, %6, %cst_27 {dimension_numbers = #tpu.dot_dimension_numbers<[1], [0], [0], [1], [0, 0, 1, 1], [], []>} : vector<16x8xf32>, vector<8x128xf32>, vector<16x128xf32> -> vector<16x128xf32>
    %51 = arith.mulf %49, %50 : vector<16x128xf32>
    %52 = arith.addf %46, %51 : vector<16x128xf32>
    %53 = vector.extract_strided_slice %0 {offsets = [0, 96], sizes = [16, 16], strides = [1, 1]} : vector<16x128xf32> to vector<16x16xf32>
    %54 = vector.extract_strided_slice %17 {offsets = [0, 48], sizes = [16, 8], strides = [1, 1]} : vector<16x64xf32> to vector<16x8xf32>
    %cst_28 = arith.constant dense<0.000000e+00> : vector<16x128xf32>
    %55 = tpu.matmul %53, %5, %cst_28 {dimension_numbers = #tpu.dot_dimension_numbers<[1], [0], [0], [1], [0, 0, 1, 1], [], []>} : vector<16x16xf32>, vector<16x128xf32>, vector<16x128xf32> -> vector<16x128xf32>
    %cst_29 = arith.constant dense<0.000000e+00> : vector<16x128xf32>
    %56 = tpu.matmul %54, %6, %cst_29 {dimension_numbers = #tpu.dot_dimension_numbers<[1], [0], [0], [1], [0, 0, 1, 1], [], []>} : vector<16x8xf32>, vector<8x128xf32>, vector<16x128xf32> -> vector<16x128xf32>
    %57 = arith.mulf %55, %56 : vector<16x128xf32>
    %58 = arith.addf %52, %57 : vector<16x128xf32>
    %59 = vector.extract_strided_slice %0 {offsets = [0, 112], sizes = [16, 16], strides = [1, 1]} : vector<16x128xf32> to vector<16x16xf32>
    %60 = vector.extract_strided_slice %17 {offsets = [0, 56], sizes = [16, 8], strides = [1, 1]} : vector<16x64xf32> to vector<16x8xf32>
    %cst_30 = arith.constant dense<0.000000e+00> : vector<16x128xf32>
    %61 = tpu.matmul %59, %5, %cst_30 {dimension_numbers = #tpu.dot_dimension_numbers<[1], [0], [0], [1], [0, 0, 1, 1], [], []>} : vector<16x16xf32>, vector<16x128xf32>, vector<16x128xf32> -> vector<16x128xf32>
    %cst_31 = arith.constant dense<0.000000e+00> : vector<16x128xf32>
    %62 = tpu.matmul %60, %6, %cst_31 {dimension_numbers = #tpu.dot_dimension_numbers<[1], [0], [0], [1], [0, 0, 1, 1], [], []>} : vector<16x8xf32>, vector<8x128xf32>, vector<16x128xf32> -> vector<16x128xf32>
    %63 = arith.mulf %61, %62 : vector<16x128xf32>
    %64 = arith.addf %58, %63 : vector<16x128xf32>
    %c0_32 = arith.constant 0 : index
    %c0_33 = arith.constant 0 : index
    %65 = vector.load %arg8[%c0_32, %c0_33] : memref<128x16xf32, #tpu.memory_space<vmem>>, vector<128x16xf32>
    %66 = arith.truncf %64 : vector<16x128xf32> to vector<16x128xbf16>
    %67 = arith.truncf %65 : vector<128x16xf32> to vector<128x16xbf16>
    %cst_34 = arith.constant dense<0.000000e+00> : vector<16x16xf32>
    %68 = tpu.matmul %66, %67, %cst_34 {dimension_numbers = #tpu.dot_dimension_numbers<[1], [0], [0], [1], [0, 0, 1, 1], [], []>} : vector<16x128xbf16>, vector<128x16xbf16>, vector<16x16xf32> -> vector<16x16xf32>
    %c0_35 = arith.constant 0 : index
    %c0_36 = arith.constant 0 : index
    %69 = vector.load %arg9[%c0_35, %c0_36] : memref<16x64xf32, #tpu.memory_space<vmem>>, vector<16x64xf32>
    %70 = arith.truncf %68 : vector<16x16xf32> to vector<16x16xbf16>
    %71 = arith.truncf %69 : vector<16x64xf32> to vector<16x64xbf16>
    %cst_37 = arith.constant dense<0.000000e+00> : vector<16x64xf32>
    %72 = tpu.matmul %70, %71, %cst_37 {dimension_numbers = #tpu.dot_dimension_numbers<[1], [0], [0], [1], [0, 0, 1, 1], [], []>} : vector<16x16xbf16>, vector<16x64xbf16>, vector<16x64xf32> -> vector<16x64xf32>
    %cst_38 = arith.constant 5.000000e-01 : f32
    %73 = vector.broadcast %cst_38 : f32 to vector<16x64xf32>
    %74 = arith.mulf %73, %72 : vector<16x64xf32>
    %75 = math.tanh %74 : vector<16x64xf32>
    %cst_39 = arith.constant 1.000000e+00 : f32
    %76 = vector.broadcast %cst_39 : f32 to vector<16x64xf32>
    %77 = arith.addf %75, %76 : vector<16x64xf32>
    %cst_40 = arith.constant 5.000000e-01 : f32
    %78 = vector.broadcast %cst_40 : f32 to vector<16x64xf32>
    %79 = arith.mulf %78, %77 : vector<16x64xf32>
    %80 = arith.mulf %72, %79 : vector<16x64xf32>
    %cst_41 = arith.constant 1.66666663 : f32
    %81 = vector.broadcast %cst_41 : f32 to vector<16x64xf32>
    %82 = arith.mulf %80, %81 : vector<16x64xf32>
    %83 = vector.extract_strided_slice %82 {offsets = [0, 0], sizes = [16, 32], strides = [1, 1]} : vector<16x64xf32> to vector<16x32xf32>
    %c0_42 = arith.constant 0 : index
    %c0_43 = arith.constant 0 : index
    %84 = vector.load %arg10[%c0_42, %c0_43] : memref<16x32xf32, #tpu.memory_space<vmem>>, vector<16x32xf32>
    tpu.vector_store %arg10[%c0_42, %c0_43], %83 {strides = array<i32>} : memref<16x32xf32, #tpu.memory_space<vmem>>, vector<16x32xf32>,
    %85 = vector.extract_strided_slice %82 {offsets = [0, 32], sizes = [16, 32], strides = [1, 1]} : vector<16x64xf32> to vector<16x32xf32>
    %c0_44 = arith.constant 0 : index
    %c0_45 = arith.constant 0 : index
    %86 = vector.load %arg11[%c0_44, %c0_45] : memref<16x32xf32, #tpu.memory_space<vmem>>, vector<16x32xf32>
    tpu.vector_store %arg11[%c0_44, %c0_45], %85 {strides = array<i32>} : memref<16x32xf32, #tpu.memory_space<vmem>>, vector<16x32xf32>,
    return
  }
  func.func @transform_0(%arg0: i32) -> (i32, i32) {
    %c0_i32 = arith.constant 0 : i32
    %c0_i32_0 = arith.constant 0 : i32
    return %arg0, %c0_i32 : i32, i32
  }
  func.func @transform_1(%arg0: i32) -> (i32, i32) {
    %c0_i32 = arith.constant 0 : i32
    %c0_i32_0 = arith.constant 0 : i32
    return %arg0, %c0_i32 : i32, i32
  }
  func.func @transform_2(%arg0: i32) -> (i32, i32) {
    %c0_i32 = arith.constant 0 : i32
    %c0_i32_0 = arith.constant 0 : i32
    return %arg0, %c0_i32 : i32, i32
  }
  func.func @transform_3(%arg0: i32) -> (i32, i32) {
    %c0_i32 = arith.constant 0 : i32
    %c0_i32_0 = arith.constant 0 : i32
    %c0_i32_1 = arith.constant 0 : i32
    return %c0_i32, %c0_i32_0 : i32, i32
  }
  func.func @transform_4(%arg0: i32) -> (i32, i32) {
    %c0_i32 = arith.constant 0 : i32
    %c0_i32_0 = arith.constant 0 : i32
    %c0_i32_1 = arith.constant 0 : i32
    return %c0_i32, %c0_i32_0 : i32, i32
  }
  func.func @transform_5(%arg0: i32) -> (i32, i32) {
    %c0_i32 = arith.constant 0 : i32
    %c0_i32_0 = arith.constant 0 : i32
    %c0_i32_1 = arith.constant 0 : i32
    return %c0_i32, %c0_i32_0 : i32, i32
  }
  func.func @transform_6(%arg0: i32) -> (i32, i32) {
    %c0_i32 = arith.constant 0 : i32
    %c0_i32_0 = arith.constant 0 : i32
    %c0_i32_1 = arith.constant 0 : i32
    return %c0_i32, %c0_i32_0 : i32, i32
  }
  func.func @transform_7(%arg0: i32) -> (i32, i32) {
    %c0_i32 = arith.constant 0 : i32
    %c0_i32_0 = arith.constant 0 : i32
    %c0_i32_1 = arith.constant 0 : i32
    return %c0_i32, %c0_i32_0 : i32, i32
  }
  func.func @transform_8(%arg0: i32) -> (i32, i32) {
    %c0_i32 = arith.constant 0 : i32
    %c0_i32_0 = arith.constant 0 : i32
    %c0_i32_1 = arith.constant 0 : i32
    return %c0_i32, %c0_i32_0 : i32, i32
  }
  func.func @transform_9(%arg0: i32) -> (i32, i32) {
    %c0_i32 = arith.constant 0 : i32
    %c0_i32_0 = arith.constant 0 : i32
    return %arg0, %c0_i32 : i32, i32
  }
  func.func @transform_10(%arg0: i32) -> (i32, i32) {
    %c0_i32 = arith.constant 0 : i32
    %c0_i32_0 = arith.constant 0 : i32
    return %arg0, %c0_i32 : i32, i32
  }
}

module attributes {stable_mosaic.version = 11 : i64} {
  func.func @_mul_basis_kernel(%arg0: i32, %arg1: memref<24x8xf32, #tpu.memory_space<vmem>>, %arg2: memref<24x16xf32, #tpu.memory_space<vmem>>, %arg3: memref<16x8xf32, #tpu.memory_space<vmem>>, %arg4: memref<24x8xf32, #tpu.memory_space<vmem>>) attributes {dimension_semantics = [#tpu.dimension_semantics<parallel>], iteration_bounds = array<i64: 1>, scalar_prefetch = 0 : i64, scratch_operands = 0 : i64, tpu.core_type = #tpu.core_type<tc>, window_params = [{transform_indices = @transform_0, window_bounds = array<i64: 24, 8>}, {transform_indices = @transform_1, window_bounds = array<i64: 24, 16>}, {pipeline_mode = #tpu.pipeline_mode<synchronous>, transform_indices = @transform_2, window_bounds = array<i64: 16, 8>}, {transform_indices = @transform_3, window_bounds = array<i64: 24, 8>}]} {
    %c0 = arith.constant 0 : index
    %c0_0 = arith.constant 0 : index
    %0 = vector.load %arg2[%c0, %c0_0] : memref<24x16xf32, #tpu.memory_space<vmem>>, vector<24x16xf32>
    %c0_1 = arith.constant 0 : index
    %c0_2 = arith.constant 0 : index
    %1 = vector.load %arg3[%c0_1, %c0_2] : memref<16x8xf32, #tpu.memory_space<vmem>>, vector<16x8xf32>
    %2 = arith.truncf %0 : vector<24x16xf32> to vector<24x16xbf16>
    %3 = arith.truncf %1 : vector<16x8xf32> to vector<16x8xbf16>
    %cst = arith.constant dense<0.000000e+00> : vector<24x8xf32>
    %4 = tpu.matmul %2, %3, %cst {dimension_numbers = #tpu.dot_dimension_numbers<[1], [0], [0], [1], [0, 0, 1, 1], [], []>} : vector<24x16xbf16>, vector<16x8xbf16>, vector<24x8xf32> -> vector<24x8xf32>
    %c0_3 = arith.constant 0 : index
    %c0_4 = arith.constant 0 : index
    %5 = vector.load %arg1[%c0_3, %c0_4] : memref<24x8xf32, #tpu.memory_space<vmem>>, vector<24x8xf32>
    %6 = arith.mulf %5, %4 : vector<24x8xf32>
    %c0_5 = arith.constant 0 : index
    %c0_6 = arith.constant 0 : index
    %7 = vector.load %arg4[%c0_5, %c0_6] : memref<24x8xf32, #tpu.memory_space<vmem>>, vector<24x8xf32>
    tpu.vector_store %arg4[%c0_5, %c0_6], %6 {strides = array<i32>} : memref<24x8xf32, #tpu.memory_space<vmem>>, vector<24x8xf32>,
    return
  }
  func.func @transform_0(%arg0: i32) -> (i32, i32) {
    %c0_i32 = arith.constant 0 : i32
    %c0_i32_0 = arith.constant 0 : i32
    return %arg0, %c0_i32 : i32, i32
  }
  func.func @transform_1(%arg0: i32) -> (i32, i32) {
    %c0_i32 = arith.constant 0 : i32
    %c0_i32_0 = arith.constant 0 : i32
    return %arg0, %c0_i32 : i32, i32
  }
  func.func @transform_2(%arg0: i32) -> (i32, i32) {
    %c0_i32 = arith.constant 0 : i32
    %c0_i32_0 = arith.constant 0 : i32
    %c0_i32_1 = arith.constant 0 : i32
    return %c0_i32, %c0_i32_0 : i32, i32
  }
  func.func @transform_3(%arg0: i32) -> (i32, i32) {
    %c0_i32 = arith.constant 0 : i32
    %c0_i32_0 = arith.constant 0 : i32
    return %arg0, %c0_i32 : i32, i32
  }
}

module attributes {stable_mosaic.version = 11 : i64} {
  func.func @kernel(%arg0: i32, %arg1: memref<16x32xf32, #tpu.memory_space<vmem>>, %arg2: memref<16x32xf32, #tpu.memory_space<vmem>>, %arg3: memref<16x32xf32, #tpu.memory_space<vmem>>, %arg4: memref<16x32xf32, #tpu.memory_space<vmem>>, %arg5: memref<16x32xf32, #tpu.memory_space<vmem>>, %arg6: memref<16x16xf32, #tpu.memory_space<vmem>>, %arg7: memref<32x32xf32, #tpu.memory_space<vmem>>, %arg8: memref<16x32xf32, #tpu.memory_space<vmem>>, %arg9: memref<32x32xf32, #tpu.memory_space<vmem>>, %arg10: memref<32x32xf32, #tpu.memory_space<vmem>>, %arg11: memref<32x32xf32, #tpu.memory_space<vmem>>, %arg12: memref<32x32xf32, #tpu.memory_space<vmem>>, %arg13: memref<16x32xf32, #tpu.memory_space<vmem>>, %arg14: memref<16x32xf32, #tpu.memory_space<vmem>>) attributes {dimension_semantics = [#tpu.dimension_semantics<parallel>], iteration_bounds = array<i64: 1>, scalar_prefetch = 0 : i64, scratch_operands = 0 : i64, tpu.core_type = #tpu.core_type<tc>, window_params = [{transform_indices = @transform_0, window_bounds = array<i64: 16, 32>}, {transform_indices = @transform_1, window_bounds = array<i64: 16, 32>}, {transform_indices = @transform_2, window_bounds = array<i64: 16, 32>}, {transform_indices = @transform_3, window_bounds = array<i64: 16, 32>}, {transform_indices = @transform_4, window_bounds = array<i64: 16, 32>}, {transform_indices = @transform_5, window_bounds = array<i64: 16, 16>}, {pipeline_mode = #tpu.pipeline_mode<synchronous>, transform_indices = @transform_6, window_bounds = array<i64: 32, 32>}, {pipeline_mode = #tpu.pipeline_mode<synchronous>, transform_indices = @transform_7, window_bounds = array<i64: 16, 32>}, {pipeline_mode = #tpu.pipeline_mode<synchronous>, transform_indices = @transform_8, window_bounds = array<i64: 32, 32>}, {pipeline_mode = #tpu.pipeline_mode<synchronous>, transform_indices = @transform_9, window_bounds = array<i64: 32, 32>}, {pipeline_mode = #tpu.pipeline_mode<synchronous>, transform_indices = @transform_10, window_bounds = array<i64: 32, 32>}, {pipeline_mode = #tpu.pipeline_mode<synchronous>, transform_indices = @transform_11, window_bounds = array<i64: 32, 32>}, {transform_indices = @transform_12, window_bounds = array<i64: 16, 32>}, {transform_indices = @transform_13, window_bounds = array<i64: 16, 32>}]} {
    %c0 = arith.constant 0 : index
    %c0_0 = arith.constant 0 : index
    %0 = vector.load %arg1[%c0, %c0_0] : memref<16x32xf32, #tpu.memory_space<vmem>>, vector<16x32xf32>
    %c0_1 = arith.constant 0 : index
    %c0_2 = arith.constant 0 : index
    %1 = vector.load %arg7[%c0_1, %c0_2] : memref<32x32xf32, #tpu.memory_space<vmem>>, vector<32x32xf32>
    %2 = arith.truncf %0 : vector<16x32xf32> to vector<16x32xbf16>
    %3 = arith.truncf %1 : vector<32x32xf32> to vector<32x32xbf16>
    %cst = arith.constant dense<0.000000e+00> : vector<16x32xf32>
    %4 = tpu.matmul %2, %3, %cst {dimension_numbers = #tpu.dot_dimension_numbers<[1], [0], [0], [1], [0, 0, 1, 1], [], []>} : vector<16x32xbf16>, vector<32x32xbf16>, vector<16x32xf32> -> vector<16x32xf32>
    %cst_3 = arith.constant 5.000000e-01 : f32
    %5 = vector.broadcast %cst_3 : f32 to vector<16x32xf32>
    %6 = arith.mulf %5, %4 : vector<16x32xf32>
    %7 = math.tanh %6 : vector<16x32xf32>
    %cst_4 = arith.constant 1.000000e+00 : f32
    %8 = vector.broadcast %cst_4 : f32 to vector<16x32xf32>
    %9 = arith.addf %7, %8 : vector<16x32xf32>
    %cst_5 = arith.constant 5.000000e-01 : f32
    %10 = vector.broadcast %cst_5 : f32 to vector<16x32xf32>
    %11 = arith.mulf %10, %9 : vector<16x32xf32>
    %12 = arith.mulf %4, %11 : vector<16x32xf32>
    %cst_6 = arith.constant 1.66666663 : f32
    %13 = vector.broadcast %cst_6 : f32 to vector<16x32xf32>
    %14 = arith.mulf %12, %13 : vector<16x32xf32>
    %c0_7 = arith.constant 0 : index
    %c0_8 = arith.constant 0 : index
    %15 = vector.load %arg2[%c0_7, %c0_8] : memref<16x32xf32, #tpu.memory_space<vmem>>, vector<16x32xf32>
    %c0_9 = arith.constant 0 : index
    %c0_10 = arith.constant 0 : index
    %16 = vector.load %arg3[%c0_9, %c0_10] : memref<16x32xf32, #tpu.memory_space<vmem>>, vector<16x32xf32>
    %17 = arith.addf %15, %16 : vector<16x32xf32>
    %cst_11 = arith.constant 0.707106769 : f32
    %18 = vector.broadcast %cst_11 : f32 to vector<16x32xf32>
    %19 = arith.mulf %17, %18 : vector<16x32xf32>
    %c0_12 = arith.constant 0 : index
    %c0_13 = arith.constant 0 : index
    %20 = vector.load %arg4[%c0_12, %c0_13] : memref<16x32xf32, #tpu.memory_space<vmem>>, vector<16x32xf32>
    %c0_14 = arith.constant 0 : index
    %c0_15 = arith.constant 0 : index
    %21 = vector.load %arg5[%c0_14, %c0_15] : memref<16x32xf32, #tpu.memory_space<vmem>>, vector<16x32xf32>
    %22 = arith.addf %20, %21 : vector<16x32xf32>
    %cst_16 = arith.constant 0.707106769 : f32
    %23 = vector.broadcast %cst_16 : f32 to vector<16x32xf32>
    %24 = arith.mulf %22, %23 : vector<16x32xf32>
    %25 = arith.addf %14, %19 : vector<16x32xf32>
    %26 = arith.addf %25, %24 : vector<16x32xf32>
    %cst_17 = arith.constant 0.577350259 : f32
    %27 = vector.broadcast %cst_17 : f32 to vector<16x32xf32>
    %28 = arith.mulf %26, %27 : vector<16x32xf32>
    %c0_18 = arith.constant 0 : index
    %c0_19 = arith.constant 0 : index
    %29 = vector.load %arg9[%c0_18, %c0_19] : memref<32x32xf32, #tpu.memory_space<vmem>>, vector<32x32xf32>
    %30 = arith.truncf %28 : vector<16x32xf32> to vector<16x32xbf16>
    %31 = arith.truncf %29 : vector<32x32xf32> to vector<32x32xbf16>
    %cst_20 = arith.constant dense<0.000000e+00> : vector<16x32xf32>
    %32 = tpu.matmul %30, %31, %cst_20 {dimension_numbers = #tpu.dot_dimension_numbers<[1], [0], [0], [1], [0, 0, 1, 1], [], []>} : vector<16x32xbf16>, vector<32x32xbf16>, vector<16x32xf32> -> vector<16x32xf32>
    %cst_21 = arith.constant 5.000000e-01 : f32
    %33 = vector.broadcast %cst_21 : f32 to vector<16x32xf32>
    %34 = arith.mulf %33, %32 : vector<16x32xf32>
    %35 = math.tanh %34 : vector<16x32xf32>
    %cst_22 = arith.constant 1.000000e+00 : f32
    %36 = vector.broadcast %cst_22 : f32 to vector<16x32xf32>
    %37 = arith.addf %35, %36 : vector<16x32xf32>
    %cst_23 = arith.constant 5.000000e-01 : f32
    %38 = vector.broadcast %cst_23 : f32 to vector<16x32xf32>
    %39 = arith.mulf %38, %37 : vector<16x32xf32>
    %40 = arith.mulf %32, %39 : vector<16x32xf32>
    %cst_24 = arith.constant 1.66666663 : f32
    %41 = vector.broadcast %cst_24 : f32 to vector<16x32xf32>
    %42 = arith.mulf %40, %41 : vector<16x32xf32>
    %c0_25 = arith.constant 0 : index
    %c0_26 = arith.constant 0 : index
    %43 = vector.load %arg10[%c0_25, %c0_26] : memref<32x32xf32, #tpu.memory_space<vmem>>, vector<32x32xf32>
    %44 = arith.truncf %42 : vector<16x32xf32> to vector<16x32xbf16>
    %45 = arith.truncf %43 : vector<32x32xf32> to vector<32x32xbf16>
    %cst_27 = arith.constant dense<0.000000e+00> : vector<16x32xf32>
    %46 = tpu.matmul %44, %45, %cst_27 {dimension_numbers = #tpu.dot_dimension_numbers<[1], [0], [0], [1], [0, 0, 1, 1], [], []>} : vector<16x32xbf16>, vector<32x32xbf16>, vector<16x32xf32> -> vector<16x32xf32>
    %cst_28 = arith.constant 5.000000e-01 : f32
    %47 = vector.broadcast %cst_28 : f32 to vector<16x32xf32>
    %48 = arith.mulf %47, %46 : vector<16x32xf32>
    %49 = math.tanh %48 : vector<16x32xf32>
    %cst_29 = arith.constant 1.000000e+00 : f32
    %50 = vector.broadcast %cst_29 : f32 to vector<16x32xf32>
    %51 = arith.addf %49, %50 : vector<16x32xf32>
    %cst_30 = arith.constant 5.000000e-01 : f32
    %52 = vector.broadcast %cst_30 : f32 to vector<16x32xf32>
    %53 = arith.mulf %52, %51 : vector<16x32xf32>
    %54 = arith.mulf %46, %53 : vector<16x32xf32>
    %cst_31 = arith.constant 1.66666663 : f32
    %55 = vector.broadcast %cst_31 : f32 to vector<16x32xf32>
    %56 = arith.mulf %54, %55 : vector<16x32xf32>
    %57 = arith.addf %28, %56 : vector<16x32xf32>
    %cst_32 = arith.constant 0.707106769 : f32
    %58 = vector.broadcast %cst_32 : f32 to vector<16x32xf32>
    %59 = arith.mulf %57, %58 : vector<16x32xf32>
    %60 = arith.addf %0, %59 : vector<16x32xf32>
    %cst_33 = arith.constant 0.707106769 : f32
    %61 = vector.broadcast %cst_33 : f32 to vector<16x32xf32>
    %62 = arith.mulf %60, %61 : vector<16x32xf32>
    %c0_34 = arith.constant 0 : index
    %c0_35 = arith.constant 0 : index
    %63 = vector.load %arg11[%c0_34, %c0_35] : memref<32x32xf32, #tpu.memory_space<vmem>>, vector<32x32xf32>
    %64 = arith.truncf %62 : vector<16x32xf32> to vector<16x32xbf16>
    %65 = arith.truncf %63 : vector<32x32xf32> to vector<32x32xbf16>
    %cst_36 = arith.constant dense<0.000000e+00> : vector<16x32xf32>
    %66 = tpu.matmul %64, %65, %cst_36 {dimension_numbers = #tpu.dot_dimension_numbers<[1], [0], [0], [1], [0, 0, 1, 1], [], []>} : vector<16x32xbf16>, vector<32x32xbf16>, vector<16x32xf32> -> vector<16x32xf32>
    %cst_37 = arith.constant 5.000000e-01 : f32
    %67 = vector.broadcast %cst_37 : f32 to vector<16x32xf32>
    %68 = arith.mulf %67, %66 : vector<16x32xf32>
    %69 = math.tanh %68 : vector<16x32xf32>
    %cst_38 = arith.constant 1.000000e+00 : f32
    %70 = vector.broadcast %cst_38 : f32 to vector<16x32xf32>
    %71 = arith.addf %69, %70 : vector<16x32xf32>
    %cst_39 = arith.constant 5.000000e-01 : f32
    %72 = vector.broadcast %cst_39 : f32 to vector<16x32xf32>
    %73 = arith.mulf %72, %71 : vector<16x32xf32>
    %74 = arith.mulf %66, %73 : vector<16x32xf32>
    %cst_40 = arith.constant 1.66666663 : f32
    %75 = vector.broadcast %cst_40 : f32 to vector<16x32xf32>
    %76 = arith.mulf %74, %75 : vector<16x32xf32>
    %c0_41 = arith.constant 0 : index
    %c0_42 = arith.constant 0 : index
    %77 = vector.load %arg12[%c0_41, %c0_42] : memref<32x32xf32, #tpu.memory_space<vmem>>, vector<32x32xf32>
    %78 = arith.truncf %76 : vector<16x32xf32> to vector<16x32xbf16>
    %79 = arith.truncf %77 : vector<32x32xf32> to vector<32x32xbf16>
    %cst_43 = arith.constant dense<0.000000e+00> : vector<16x32xf32>
    %80 = tpu.matmul %78, %79, %cst_43 {dimension_numbers = #tpu.dot_dimension_numbers<[1], [0], [0], [1], [0, 0, 1, 1], [], []>} : vector<16x32xbf16>, vector<32x32xbf16>, vector<16x32xf32> -> vector<16x32xf32>
    %cst_44 = arith.constant 5.000000e-01 : f32
    %81 = vector.broadcast %cst_44 : f32 to vector<16x32xf32>
    %82 = arith.mulf %81, %80 : vector<16x32xf32>
    %83 = math.tanh %82 : vector<16x32xf32>
    %cst_45 = arith.constant 1.000000e+00 : f32
    %84 = vector.broadcast %cst_45 : f32 to vector<16x32xf32>
    %85 = arith.addf %83, %84 : vector<16x32xf32>
    %cst_46 = arith.constant 5.000000e-01 : f32
    %86 = vector.broadcast %cst_46 : f32 to vector<16x32xf32>
    %87 = arith.mulf %86, %85 : vector<16x32xf32>
    %88 = arith.mulf %80, %87 : vector<16x32xf32>
    %cst_47 = arith.constant 1.66666663 : f32
    %89 = vector.broadcast %cst_47 : f32 to vector<16x32xf32>
    %90 = arith.mulf %88, %89 : vector<16x32xf32>
    %91 = arith.addf %62, %90 : vector<16x32xf32>
    %cst_48 = arith.constant 0.707106769 : f32
    %92 = vector.broadcast %cst_48 : f32 to vector<16x32xf32>
    %93 = arith.mulf %91, %92 : vector<16x32xf32>
    %c0_49 = arith.constant 0 : index
    %c0_50 = arith.constant 0 : index
    %94 = vector.load %arg13[%c0_49, %c0_50] : memref<16x32xf32, #tpu.memory_space<vmem>>, vector<16x32xf32>
    tpu.vector_store %arg13[%c0_49, %c0_50], %93 {strides = array<i32>} : memref<16x32xf32, #tpu.memory_space<vmem>>, vector<16x32xf32>,
    %c0_51 = arith.constant 0 : index
    %c0_52 = arith.constant 0 : index
    %95 = vector.load %arg6[%c0_51, %c0_52] : memref<16x16xf32, #tpu.memory_space<vmem>>, vector<16x16xf32>
    %c0_53 = arith.constant 0 : index
    %c0_54 = arith.constant 0 : index
    %96 = vector.load %arg8[%c0_53, %c0_54] : memref<16x32xf32, #tpu.memory_space<vmem>>, vector<16x32xf32>
    %97 = arith.truncf %95 : vector<16x16xf32> to vector<16x16xbf16>
    %98 = arith.truncf %96 : vector<16x32xf32> to vector<16x32xbf16>
    %cst_55 = arith.constant dense<0.000000e+00> : vector<16x32xf32>
    %99 = tpu.matmul %97, %98, %cst_55 {dimension_numbers = #tpu.dot_dimension_numbers<[1], [0], [0], [1], [0, 0, 1, 1], [], []>} : vector<16x16xbf16>, vector<16x32xbf16>, vector<16x32xf32> -> vector<16x32xf32>
    %100 = arith.mulf %93, %99 : vector<16x32xf32>
    %c0_56 = arith.constant 0 : index
    %c0_57 = arith.constant 0 : index
    %101 = vector.load %arg14[%c0_56, %c0_57] : memref<16x32xf32, #tpu.memory_space<vmem>>, vector<16x32xf32>
    tpu.vector_store %arg14[%c0_56, %c0_57], %100 {strides = array<i32>} : memref<16x32xf32, #tpu.memory_space<vmem>>, vector<16x32xf32>,
    return
  }
  func.func @transform_0(%arg0: i32) -> (i32, i32) {
    %c0_i32 = arith.constant 0 : i32
    %c0_i32_0 = arith.constant 0 : i32
    return %arg0, %c0_i32 : i32, i32
  }
  func.func @transform_1(%arg0: i32) -> (i32, i32) {
    %c0_i32 = arith.constant 0 : i32
    %c0_i32_0 = arith.constant 0 : i32
    return %arg0, %c0_i32 : i32, i32
  }
  func.func @transform_2(%arg0: i32) -> (i32, i32) {
    %c0_i32 = arith.constant 0 : i32
    %c0_i32_0 = arith.constant 0 : i32
    return %arg0, %c0_i32 : i32, i32
  }
  func.func @transform_3(%arg0: i32) -> (i32, i32) {
    %c0_i32 = arith.constant 0 : i32
    %c0_i32_0 = arith.constant 0 : i32
    return %arg0, %c0_i32 : i32, i32
  }
  func.func @transform_4(%arg0: i32) -> (i32, i32) {
    %c0_i32 = arith.constant 0 : i32
    %c0_i32_0 = arith.constant 0 : i32
    return %arg0, %c0_i32 : i32, i32
  }
  func.func @transform_5(%arg0: i32) -> (i32, i32) {
    %c0_i32 = arith.constant 0 : i32
    %c0_i32_0 = arith.constant 0 : i32
    return %arg0, %c0_i32 : i32, i32
  }
  func.func @transform_6(%arg0: i32) -> (i32, i32) {
    %c0_i32 = arith.constant 0 : i32
    %c0_i32_0 = arith.constant 0 : i32
    %c0_i32_1 = arith.constant 0 : i32
    return %c0_i32, %c0_i32_0 : i32, i32
  }
  func.func @transform_7(%arg0: i32) -> (i32, i32) {
    %c0_i32 = arith.constant 0 : i32
    %c0_i32_0 = arith.constant 0 : i32
    %c0_i32_1 = arith.constant 0 : i32
    return %c0_i32, %c0_i32_0 : i32, i32
  }
  func.func @transform_8(%arg0: i32) -> (i32, i32) {
    %c0_i32 = arith.constant 0 : i32
    %c0_i32_0 = arith.constant 0 : i32
    %c0_i32_1 = arith.constant 0 : i32
    return %c0_i32, %c0_i32_0 : i32, i32
  }
  func.func @transform_9(%arg0: i32) -> (i32, i32) {
    %c0_i32 = arith.constant 0 : i32
    %c0_i32_0 = arith.constant 0 : i32
    %c0_i32_1 = arith.constant 0 : i32
    return %c0_i32, %c0_i32_0 : i32, i32
  }
  func.func @transform_10(%arg0: i32) -> (i32, i32) {
    %c0_i32 = arith.constant 0 : i32
    %c0_i32_0 = arith.constant 0 : i32
    %c0_i32_1 = arith.constant 0 : i32
    return %c0_i32, %c0_i32_0 : i32, i32
  }
  func.func @transform_11(%arg0: i32) -> (i32, i32) {
    %c0_i32 = arith.constant 0 : i32
    %c0_i32_0 = arith.constant 0 : i32
    %c0_i32_1 = arith.constant 0 : i32
    return %c0_i32, %c0_i32_0 : i32, i32
  }
  func.func @transform_12(%arg0: i32) -> (i32, i32) {
    %c0_i32 = arith.constant 0 : i32
    %c0_i32_0 = arith.constant 0 : i32
    return %arg0, %c0_i32 : i32, i32
  }
  func.func @transform_13(%arg0: i32) -> (i32, i32) {
    %c0_i32 = arith.constant 0 : i32
    %c0_i32_0 = arith.constant 0 : i32
    return %arg0, %c0_i32 : i32, i32
  }
}

module attributes {stable_mosaic.version = 11 : i64} {
  func.func @kernel(%arg0: i32, %arg1: memref<16x256xf32, #tpu.memory_space<vmem>>, %arg2: memref<16x32xf32, #tpu.memory_space<vmem>>, %arg3: memref<16x16xf32, #tpu.memory_space<vmem>>, %arg4: memref<16x128xf32, #tpu.memory_space<vmem>>, %arg5: memref<8x128xf32, #tpu.memory_space<vmem>>, %arg6: memref<16x128xf32, #tpu.memory_space<vmem>>, %arg7: memref<8x128xf32, #tpu.memory_space<vmem>>, %arg8: memref<128x16xf32, #tpu.memory_space<vmem>>, %arg9: memref<16x64xf32, #tpu.memory_space<vmem>>, %arg10: memref<16x32xf32, #tpu.memory_space<vmem>>, %arg11: memref<16x32xf32, #tpu.memory_space<vmem>>) attributes {dimension_semantics = [#tpu.dimension_semantics<parallel>], iteration_bounds = array<i64: 1>, scalar_prefetch = 0 : i64, scratch_operands = 0 : i64, tpu.core_type = #tpu.core_type<tc>, window_params = [{transform_indices = @transform_0, window_bounds = array<i64: 16, 256>}, {transform_indices = @transform_1, window_bounds = array<i64: 16, 32>}, {transform_indices = @transform_2, window_bounds = array<i64: 16, 16>}, {pipeline_mode = #tpu.pipeline_mode<synchronous>, transform_indices = @transform_3, window_bounds = array<i64: 16, 128>}, {pipeline_mode = #tpu.pipeline_mode<synchronous>, transform_indices = @transform_4, window_bounds = array<i64: 8, 128>}, {pipeline_mode = #tpu.pipeline_mode<synchronous>, transform_indices = @transform_5, window_bounds = array<i64: 16, 128>}, {pipeline_mode = #tpu.pipeline_mode<synchronous>, transform_indices = @transform_6, window_bounds = array<i64: 8, 128>}, {pipeline_mode = #tpu.pipeline_mode<synchronous>, transform_indices = @transform_7, window_bounds = array<i64: 128, 16>}, {pipeline_mode = #tpu.pipeline_mode<synchronous>, transform_indices = @transform_8, window_bounds = array<i64: 16, 64>}, {transform_indices = @transform_9, window_bounds = array<i64: 16, 32>}, {transform_indices = @transform_10, window_bounds = array<i64: 16, 32>}]} {
    %c0 = arith.constant 0 : index
    %c0_0 = arith.constant 0 : index
    %0 = vector.load %arg1[%c0, %c0_0] : memref<16x256xf32, #tpu.memory_space<vmem>>, vector<16x256xf32>
    %c0_1 = arith.constant 0 : index
    %c0_2 = arith.constant 0 : index
    %1 = vector.load %arg2[%c0_1, %c0_2] : memref<16x32xf32, #tpu.memory_space<vmem>>, vector<16x32xf32>
    %c0_3 = arith.constant 0 : index
    %c0_4 = arith.constant 0 : index
    %2 = vector.load %arg3[%c0_3, %c0_4] : memref<16x16xf32, #tpu.memory_space<vmem>>, vector<16x16xf32>
    %c0_5 = arith.constant 0 : index
    %c0_6 = arith.constant 0 : index
    %3 = vector.load %arg4[%c0_5, %c0_6] : memref<16x128xf32, #tpu.memory_space<vmem>>, vector<16x128xf32>
    %c0_7 = arith.constant 0 : index
    %c0_8 = arith.constant 0 : index
    %4 = vector.load %arg5[%c0_7, %c0_8] : memref<8x128xf32, #tpu.memory_space<vmem>>, vector<8x128xf32>
    %c0_9 = arith.constant 0 : index
    %c0_10 = arith.constant 0 : index
    %5 = vector.load %arg6[%c0_9, %c0_10] : memref<16x128xf32, #tpu.memory_space<vmem>>, vector<16x128xf32>
    %c0_11 = arith.constant 0 : index
    %c0_12 = arith.constant 0 : index
    %6 = vector.load %arg7[%c0_11, %c0_12] : memref<8x128xf32, #tpu.memory_space<vmem>>, vector<8x128xf32>
    %7 = vector.extract_strided_slice %1 {offsets = [0, 0], sizes = [16, 16], strides = [1, 1]} : vector<16x32xf32> to vector<16x16xf32>
    %8 = vector.extract_strided_slice %2 {offsets = [0, 0], sizes = [16, 8], strides = [1, 1]} : vector<16x16xf32> to vector<16x8xf32>
    %cst = arith.constant dense<0.000000e+00> : vector<16x128xf32>
    %9 = tpu.matmul %7, %3, %cst {dimension_numbers = #tpu.dot_dimension_numbers<[1], [0], [0], [1], [0, 0, 1, 1], [], []>} : vector<16x16xf32>, vector<16x128xf32>, vector<16x128xf32> -> vector<16x128xf32>
    %cst_13 = arith.constant dense<0.000000e+00> : vector<16x128xf32>
    %10 = tpu.matmul %8, %4, %cst_13 {dimension_numbers = #tpu.dot_dimension_numbers<[1], [0], [0], [1], [0, 0, 1, 1], [], []>} : vector<16x8xf32>, vector<8x128xf32>, vector<16x128xf32> -> vector<16x128xf32>
    %11 = arith.mulf %9, %10 : vector<16x128xf32>
    %12 = vector.extract_strided_slice %1 {offsets = [0, 16], sizes = [16, 16], strides = [1, 1]} : vector<16x32xf32> to vector<16x16xf32>
    %13 = vector.extract_strided_slice %2 {offsets = [0, 8], sizes = [16, 8], strides = [1, 1]} : vector<16x16xf32> to vector<16x8xf32>
    %cst_14 = arith.constant dense<0.000000e+00> : vector<16x128xf32>
    %14 = tpu.matmul %12, %3, %cst_14 {dimension_numbers = #tpu.dot_dimension_numbers<[1], [0], [0], [1], [0, 0, 1, 1], [], []>} : vector<16x16xf32>, vector<16x128xf32>, vector<16x128xf32> -> vector<16x128xf32>
    %cst_15 = arith.constant dense<0.000000e+00> : vector<16x128xf32>
    %15 = tpu.matmul %13, %4, %cst_15 {dimension_numbers = #tpu.dot_dimension_numbers<[1], [0], [0], [1], [0, 0, 1, 1], [], []>} : vector<16x8xf32>, vector<8x128xf32>, vector<16x128xf32> -> vector<16x128xf32>
    %16 = arith.mulf %14, %15 : vector<16x128xf32>
    %17 = arith.addf %11, %16 : vector<16x128xf32>
    %18 = vector.extract_strided_slice %0 {offsets = [0, 0], sizes = [16, 16], strides = [1, 1]} : vector<16x256xf32> to vector<16x16xf32>
    %19 = vector.extract_strided_slice %17 {offsets = [0, 0], sizes = [16, 8], strides = [1, 1]} : vector<16x128xf32> to vector<16x8xf32>
    %cst_16 = arith.constant dense<0.000000e+00> : vector<16x128xf32>
    %20 = tpu.matmul %18, %5, %cst_16 {dimension_numbers = #tpu.dot_dimension_numbers<[1], [0], [0], [1], [0, 0, 1, 1], [], []>} : vector<16x16xf32>, vector<16x128xf32>, vector<16x128xf32> -> vector<16x128xf32>
    %cst_17 = arith.constant dense<0.000000e+00> : vector<16x128xf32>
    %21 = tpu.matmul %19, %6, %cst_17 {dimension_numbers = #tpu.dot_dimension_numbers<[1], [0], [0], [1], [0, 0, 1, 1], [], []>} : vector<16x8xf32>, vector<8x128xf32>, vector<16x128xf32> -> vector<16x128xf32>
    %22 = arith.mulf %20, %21 : vector<16x128xf32>
    %23 = vector.extract_strided_slice %0 {offsets = [0, 16], sizes = [16, 16], strides = [1, 1]} : vector<16x256xf32> to vector<16x16xf32>
    %24 = vector.extract_strided_slice %17 {offsets = [0, 8], sizes = [16, 8], strides = [1, 1]} : vector<16x128xf32> to vector<16x8xf32>
    %cst_18 = arith.constant dense<0.000000e+00> : vector<16x128xf32>
    %25 = tpu.matmul %23, %5, %cst_18 {dimension_numbers = #tpu.dot_dimension_numbers<[1], [0], [0], [1], [0, 0, 1, 1], [], []>} : vector<16x16xf32>, vector<16x128xf32>, vector<16x128xf32> -> vector<16x128xf32>
    %cst_19 = arith.constant dense<0.000000e+00> : vector<16x128xf32>
    %26 = tpu.matmul %24, %6, %cst_19 {dimension_numbers = #tpu.dot_dimension_numbers<[1], [0], [0], [1], [0, 0, 1, 1], [], []>} : vector<16x8xf32>, vector<8x128xf32>, vector<16x128xf32> -> vector<16x128xf32>
    %27 = arith.mulf %25, %26 : vector<16x128xf32>
    %28 = arith.addf %22, %27 : vector<16x128xf32>
    %29 = vector.extract_strided_slice %0 {offsets = [0, 32], sizes = [16, 16], strides = [1, 1]} : vector<16x256xf32> to vector<16x16xf32>
    %30 = vector.extract_strided_slice %17 {offsets = [0, 16], sizes = [16, 8], strides = [1, 1]} : vector<16x128xf32> to vector<16x8xf32>
    %cst_20 = arith.constant dense<0.000000e+00> : vector<16x128xf32>
    %31 = tpu.matmul %29, %5, %cst_20 {dimension_numbers = #tpu.dot_dimension_numbers<[1], [0], [0], [1], [0, 0, 1, 1], [], []>} : vector<16x16xf32>, vector<16x128xf32>, vector<16x128xf32> -> vector<16x128xf32>
    %cst_21 = arith.constant dense<0.000000e+00> : vector<16x128xf32>
    %32 = tpu.matmul %30, %6, %cst_21 {dimension_numbers = #tpu.dot_dimension_numbers<[1], [0], [0], [1], [0, 0, 1, 1], [], []>} : vector<16x8xf32>, vector<8x128xf32>, vector<16x128xf32> -> vector<16x128xf32>
    %33 = arith.mulf %31, %32 : vector<16x128xf32>
    %34 = arith.addf %28, %33 : vector<16x128xf32>
    %35 = vector.extract_strided_slice %0 {offsets = [0, 48], sizes = [16, 16], strides = [1, 1]} : vector<16x256xf32> to vector<16x16xf32>
    %36 = vector.extract_strided_slice %17 {offsets = [0, 24], sizes = [16, 8], strides = [1, 1]} : vector<16x128xf32> to vector<16x8xf32>
    %cst_22 = arith.constant dense<0.000000e+00> : vector<16x128xf32>
    %37 = tpu.matmul %35, %5, %cst_22 {dimension_numbers = #tpu.dot_dimension_numbers<[1], [0], [0], [1], [0, 0, 1, 1], [], []>} : vector<16x16xf32>, vector<16x128xf32>, vector<16x128xf32> -> vector<16x128xf32>
    %cst_23 = arith.constant dense<0.000000e+00> : vector<16x128xf32>
    %38 = tpu.matmul %36, %6, %cst_23 {dimension_numbers = #tpu.dot_dimension_numbers<[1], [0], [0], [1], [0, 0, 1, 1], [], []>} : vector<16x8xf32>, vector<8x128xf32>, vector<16x128xf32> -> vector<16x128xf32>
    %39 = arith.mulf %37, %38 : vector<16x128xf32>
    %40 = arith.addf %34, %39 : vector<16x128xf32>
    %41 = vector.extract_strided_slice %0 {offsets = [0, 64], sizes = [16, 16], strides = [1, 1]} : vector<16x256xf32> to vector<16x16xf32>
    %42 = vector.extract_strided_slice %17 {offsets = [0, 32], sizes = [16, 8], strides = [1, 1]} : vector<16x128xf32> to vector<16x8xf32>
    %cst_24 = arith.constant dense<0.000000e+00> : vector<16x128xf32>
    %43 = tpu.matmul %41, %5, %cst_24 {dimension_numbers = #tpu.dot_dimension_numbers<[1], [0], [0], [1], [0, 0, 1, 1], [], []>} : vector<16x16xf32>, vector<16x128xf32>, vector<16x128xf32> -> vector<16x128xf32>
    %cst_25 = arith.constant dense<0.000000e+00> : vector<16x128xf32>
    %44 = tpu.matmul %42, %6, %cst_25 {dimension_numbers = #tpu.dot_dimension_numbers<[1], [0], [0], [1], [0, 0, 1, 1], [], []>} : vector<16x8xf32>, vector<8x128xf32>, vector<16x128xf32> -> vector<16x128xf32>
    %45 = arith.mulf %43, %44 : vector<16x128xf32>
    %46 = arith.addf %40, %45 : vector<16x128xf32>
    %47 = vector.extract_strided_slice %0 {offsets = [0, 80], sizes = [16, 16], strides = [1, 1]} : vector<16x256xf32> to vector<16x16xf32>
    %48 = vector.extract_strided_slice %17 {offsets = [0, 40], sizes = [16, 8], strides = [1, 1]} : vector<16x128xf32> to vector<16x8xf32>
    %cst_26 = arith.constant dense<0.000000e+00> : vector<16x128xf32>
    %49 = tpu.matmul %47, %5, %cst_26 {dimension_numbers = #tpu.dot_dimension_numbers<[1], [0], [0], [1], [0, 0, 1, 1], [], []>} : vector<16x16xf32>, vector<16x128xf32>, vector<16x128xf32> -> vector<16x128xf32>
    %cst_27 = arith.constant dense<0.000000e+00> : vector<16x128xf32>
    %50 = tpu.matmul %48, %6, %cst_27 {dimension_numbers = #tpu.dot_dimension_numbers<[1], [0], [0], [1], [0, 0, 1, 1], [], []>} : vector<16x8xf32>, vector<8x128xf32>, vector<16x128xf32> -> vector<16x128xf32>
    %51 = arith.mulf %49, %50 : vector<16x128xf32>
    %52 = arith.addf %46, %51 : vector<16x128xf32>
    %53 = vector.extract_strided_slice %0 {offsets = [0, 96], sizes = [16, 16], strides = [1, 1]} : vector<16x256xf32> to vector<16x16xf32>
    %54 = vector.extract_strided_slice %17 {offsets = [0, 48], sizes = [16, 8], strides = [1, 1]} : vector<16x128xf32> to vector<16x8xf32>
    %cst_28 = arith.constant dense<0.000000e+00> : vector<16x128xf32>
    %55 = tpu.matmul %53, %5, %cst_28 {dimension_numbers = #tpu.dot_dimension_numbers<[1], [0], [0], [1], [0, 0, 1, 1], [], []>} : vector<16x16xf32>, vector<16x128xf32>, vector<16x128xf32> -> vector<16x128xf32>
    %cst_29 = arith.constant dense<0.000000e+00> : vector<16x128xf32>
    %56 = tpu.matmul %54, %6, %cst_29 {dimension_numbers = #tpu.dot_dimension_numbers<[1], [0], [0], [1], [0, 0, 1, 1], [], []>} : vector<16x8xf32>, vector<8x128xf32>, vector<16x128xf32> -> vector<16x128xf32>
    %57 = arith.mulf %55, %56 : vector<16x128xf32>
    %58 = arith.addf %52, %57 : vector<16x128xf32>
    %59 = vector.extract_strided_slice %0 {offsets = [0, 112], sizes = [16, 16], strides = [1, 1]} : vector<16x256xf32> to vector<16x16xf32>
    %60 = vector.extract_strided_slice %17 {offsets = [0, 56], sizes = [16, 8], strides = [1, 1]} : vector<16x128xf32> to vector<16x8xf32>
    %cst_30 = arith.constant dense<0.000000e+00> : vector<16x128xf32>
    %61 = tpu.matmul %59, %5, %cst_30 {dimension_numbers = #tpu.dot_dimension_numbers<[1], [0], [0], [1], [0, 0, 1, 1], [], []>} : vector<16x16xf32>, vector<16x128xf32>, vector<16x128xf32> -> vector<16x128xf32>
    %cst_31 = arith.constant dense<0.000000e+00> : vector<16x128xf32>
    %62 = tpu.matmul %60, %6, %cst_31 {dimension_numbers = #tpu.dot_dimension_numbers<[1], [0], [0], [1], [0, 0, 1, 1], [], []>} : vector<16x8xf32>, vector<8x128xf32>, vector<16x128xf32> -> vector<16x128xf32>
    %63 = arith.mulf %61, %62 : vector<16x128xf32>
    %64 = arith.addf %58, %63 : vector<16x128xf32>
    %65 = vector.extract_strided_slice %0 {offsets = [0, 128], sizes = [16, 16], strides = [1, 1]} : vector<16x256xf32> to vector<16x16xf32>
    %66 = vector.extract_strided_slice %17 {offsets = [0, 64], sizes = [16, 8], strides = [1, 1]} : vector<16x128xf32> to vector<16x8xf32>
    %cst_32 = arith.constant dense<0.000000e+00> : vector<16x128xf32>
    %67 = tpu.matmul %65, %5, %cst_32 {dimension_numbers = #tpu.dot_dimension_numbers<[1], [0], [0], [1], [0, 0, 1, 1], [], []>} : vector<16x16xf32>, vector<16x128xf32>, vector<16x128xf32> -> vector<16x128xf32>
    %cst_33 = arith.constant dense<0.000000e+00> : vector<16x128xf32>
    %68 = tpu.matmul %66, %6, %cst_33 {dimension_numbers = #tpu.dot_dimension_numbers<[1], [0], [0], [1], [0, 0, 1, 1], [], []>} : vector<16x8xf32>, vector<8x128xf32>, vector<16x128xf32> -> vector<16x128xf32>
    %69 = arith.mulf %67, %68 : vector<16x128xf32>
    %70 = arith.addf %64, %69 : vector<16x128xf32>
    %71 = vector.extract_strided_slice %0 {offsets = [0, 144], sizes = [16, 16], strides = [1, 1]} : vector<16x256xf32> to vector<16x16xf32>
    %72 = vector.extract_strided_slice %17 {offsets = [0, 72], sizes = [16, 8], strides = [1, 1]} : vector<16x128xf32> to vector<16x8xf32>
    %cst_34 = arith.constant dense<0.000000e+00> : vector<16x128xf32>
    %73 = tpu.matmul %71, %5, %cst_34 {dimension_numbers = #tpu.dot_dimension_numbers<[1], [0], [0], [1], [0, 0, 1, 1], [], []>} : vector<16x16xf32>, vector<16x128xf32>, vector<16x128xf32> -> vector<16x128xf32>
    %cst_35 = arith.constant dense<0.000000e+00> : vector<16x128xf32>
    %74 = tpu.matmul %72, %6, %cst_35 {dimension_numbers = #tpu.dot_dimension_numbers<[1], [0], [0], [1], [0, 0, 1, 1], [], []>} : vector<16x8xf32>, vector<8x128xf32>, vector<16x128xf32> -> vector<16x128xf32>
    %75 = arith.mulf %73, %74 : vector<16x128xf32>
    %76 = arith.addf %70, %75 : vector<16x128xf32>
    %77 = vector.extract_strided_slice %0 {offsets = [0, 160], sizes = [16, 16], strides = [1, 1]} : vector<16x256xf32> to vector<16x16xf32>
    %78 = vector.extract_strided_slice %17 {offsets = [0, 80], sizes = [16, 8], strides = [1, 1]} : vector<16x128xf32> to vector<16x8xf32>
    %cst_36 = arith.constant dense<0.000000e+00> : vector<16x128xf32>
    %79 = tpu.matmul %77, %5, %cst_36 {dimension_numbers = #tpu.dot_dimension_numbers<[1], [0], [0], [1], [0, 0, 1, 1], [], []>} : vector<16x16xf32>, vector<16x128xf32>, vector<16x128xf32> -> vector<16x128xf32>
    %cst_37 = arith.constant dense<0.000000e+00> : vector<16x128xf32>
    %80 = tpu.matmul %78, %6, %cst_37 {dimension_numbers = #tpu.dot_dimension_numbers<[1], [0], [0], [1], [0, 0, 1, 1], [], []>} : vector<16x8xf32>, vector<8x128xf32>, vector<16x128xf32> -> vector<16x128xf32>
    %81 = arith.mulf %79, %80 : vector<16x128xf32>
    %82 = arith.addf %76, %81 : vector<16x128xf32>
    %83 = vector.extract_strided_slice %0 {offsets = [0, 176], sizes = [16, 16], strides = [1, 1]} : vector<16x256xf32> to vector<16x16xf32>
    %84 = vector.extract_strided_slice %17 {offsets = [0, 88], sizes = [16, 8], strides = [1, 1]} : vector<16x128xf32> to vector<16x8xf32>
    %cst_38 = arith.constant dense<0.000000e+00> : vector<16x128xf32>
    %85 = tpu.matmul %83, %5, %cst_38 {dimension_numbers = #tpu.dot_dimension_numbers<[1], [0], [0], [1], [0, 0, 1, 1], [], []>} : vector<16x16xf32>, vector<16x128xf32>, vector<16x128xf32> -> vector<16x128xf32>
    %cst_39 = arith.constant dense<0.000000e+00> : vector<16x128xf32>
    %86 = tpu.matmul %84, %6, %cst_39 {dimension_numbers = #tpu.dot_dimension_numbers<[1], [0], [0], [1], [0, 0, 1, 1], [], []>} : vector<16x8xf32>, vector<8x128xf32>, vector<16x128xf32> -> vector<16x128xf32>
    %87 = arith.mulf %85, %86 : vector<16x128xf32>
    %88 = arith.addf %82, %87 : vector<16x128xf32>
    %89 = vector.extract_strided_slice %0 {offsets = [0, 192], sizes = [16, 16], strides = [1, 1]} : vector<16x256xf32> to vector<16x16xf32>
    %90 = vector.extract_strided_slice %17 {offsets = [0, 96], sizes = [16, 8], strides = [1, 1]} : vector<16x128xf32> to vector<16x8xf32>
    %cst_40 = arith.constant dense<0.000000e+00> : vector<16x128xf32>
    %91 = tpu.matmul %89, %5, %cst_40 {dimension_numbers = #tpu.dot_dimension_numbers<[1], [0], [0], [1], [0, 0, 1, 1], [], []>} : vector<16x16xf32>, vector<16x128xf32>, vector<16x128xf32> -> vector<16x128xf32>
    %cst_41 = arith.constant dense<0.000000e+00> : vector<16x128xf32>
    %92 = tpu.matmul %90, %6, %cst_41 {dimension_numbers = #tpu.dot_dimension_numbers<[1], [0], [0], [1], [0, 0, 1, 1], [], []>} : vector<16x8xf32>, vector<8x128xf32>, vector<16x128xf32> -> vector<16x128xf32>
    %93 = arith.mulf %91, %92 : vector<16x128xf32>
    %94 = arith.addf %88, %93 : vector<16x128xf32>
    %95 = vector.extract_strided_slice %0 {offsets = [0, 208], sizes = [16, 16], strides = [1, 1]} : vector<16x256xf32> to vector<16x16xf32>
    %96 = vector.extract_strided_slice %17 {offsets = [0, 104], sizes = [16, 8], strides = [1, 1]} : vector<16x128xf32> to vector<16x8xf32>
    %cst_42 = arith.constant dense<0.000000e+00> : vector<16x128xf32>
    %97 = tpu.matmul %95, %5, %cst_42 {dimension_numbers = #tpu.dot_dimension_numbers<[1], [0], [0], [1], [0, 0, 1, 1], [], []>} : vector<16x16xf32>, vector<16x128xf32>, vector<16x128xf32> -> vector<16x128xf32>
    %cst_43 = arith.constant dense<0.000000e+00> : vector<16x128xf32>
    %98 = tpu.matmul %96, %6, %cst_43 {dimension_numbers = #tpu.dot_dimension_numbers<[1], [0], [0], [1], [0, 0, 1, 1], [], []>} : vector<16x8xf32>, vector<8x128xf32>, vector<16x128xf32> -> vector<16x128xf32>
    %99 = arith.mulf %97, %98 : vector<16x128xf32>
    %100 = arith.addf %94, %99 : vector<16x128xf32>
    %101 = vector.extract_strided_slice %0 {offsets = [0, 224], sizes = [16, 16], strides = [1, 1]} : vector<16x256xf32> to vector<16x16xf32>
    %102 = vector.extract_strided_slice %17 {offsets = [0, 112], sizes = [16, 8], strides = [1, 1]} : vector<16x128xf32> to vector<16x8xf32>
    %cst_44 = arith.constant dense<0.000000e+00> : vector<16x128xf32>
    %103 = tpu.matmul %101, %5, %cst_44 {dimension_numbers = #tpu.dot_dimension_numbers<[1], [0], [0], [1], [0, 0, 1, 1], [], []>} : vector<16x16xf32>, vector<16x128xf32>, vector<16x128xf32> -> vector<16x128xf32>
    %cst_45 = arith.constant dense<0.000000e+00> : vector<16x128xf32>
    %104 = tpu.matmul %102, %6, %cst_45 {dimension_numbers = #tpu.dot_dimension_numbers<[1], [0], [0], [1], [0, 0, 1, 1], [], []>} : vector<16x8xf32>, vector<8x128xf32>, vector<16x128xf32> -> vector<16x128xf32>
    %105 = arith.mulf %103, %104 : vector<16x128xf32>
    %106 = arith.addf %100, %105 : vector<16x128xf32>
    %107 = vector.extract_strided_slice %0 {offsets = [0, 240], sizes = [16, 16], strides = [1, 1]} : vector<16x256xf32> to vector<16x16xf32>
    %108 = vector.extract_strided_slice %17 {offsets = [0, 120], sizes = [16, 8], strides = [1, 1]} : vector<16x128xf32> to vector<16x8xf32>
    %cst_46 = arith.constant dense<0.000000e+00> : vector<16x128xf32>
    %109 = tpu.matmul %107, %5, %cst_46 {dimension_numbers = #tpu.dot_dimension_numbers<[1], [0], [0], [1], [0, 0, 1, 1], [], []>} : vector<16x16xf32>, vector<16x128xf32>, vector<16x128xf32> -> vector<16x128xf32>
    %cst_47 = arith.constant dense<0.000000e+00> : vector<16x128xf32>
    %110 = tpu.matmul %108, %6, %cst_47 {dimension_numbers = #tpu.dot_dimension_numbers<[1], [0], [0], [1], [0, 0, 1, 1], [], []>} : vector<16x8xf32>, vector<8x128xf32>, vector<16x128xf32> -> vector<16x128xf32>
    %111 = arith.mulf %109, %110 : vector<16x128xf32>
    %112 = arith.addf %106, %111 : vector<16x128xf32>
    %c0_48 = arith.constant 0 : index
    %c0_49 = arith.constant 0 : index
    %113 = vector.load %arg8[%c0_48, %c0_49] : memref<128x16xf32, #tpu.memory_space<vmem>>, vector<128x16xf32>
    %114 = arith.truncf %112 : vector<16x128xf32> to vector<16x128xbf16>
    %115 = arith.truncf %113 : vector<128x16xf32> to vector<128x16xbf16>
    %cst_50 = arith.constant dense<0.000000e+00> : vector<16x16xf32>
    %116 = tpu.matmul %114, %115, %cst_50 {dimension_numbers = #tpu.dot_dimension_numbers<[1], [0], [0], [1], [0, 0, 1, 1], [], []>} : vector<16x128xbf16>, vector<128x16xbf16>, vector<16x16xf32> -> vector<16x16xf32>
    %c0_51 = arith.constant 0 : index
    %c0_52 = arith.constant 0 : index
    %117 = vector.load %arg9[%c0_51, %c0_52] : memref<16x64xf32, #tpu.memory_space<vmem>>, vector<16x64xf32>
    %118 = arith.truncf %116 : vector<16x16xf32> to vector<16x16xbf16>
    %119 = arith.truncf %117 : vector<16x64xf32> to vector<16x64xbf16>
    %cst_53 = arith.constant dense<0.000000e+00> : vector<16x64xf32>
    %120 = tpu.matmul %118, %119, %cst_53 {dimension_numbers = #tpu.dot_dimension_numbers<[1], [0], [0], [1], [0, 0, 1, 1], [], []>} : vector<16x16xbf16>, vector<16x64xbf16>, vector<16x64xf32> -> vector<16x64xf32>
    %cst_54 = arith.constant 5.000000e-01 : f32
    %121 = vector.broadcast %cst_54 : f32 to vector<16x64xf32>
    %122 = arith.mulf %121, %120 : vector<16x64xf32>
    %123 = math.tanh %122 : vector<16x64xf32>
    %cst_55 = arith.constant 1.000000e+00 : f32
    %124 = vector.broadcast %cst_55 : f32 to vector<16x64xf32>
    %125 = arith.addf %123, %124 : vector<16x64xf32>
    %cst_56 = arith.constant 5.000000e-01 : f32
    %126 = vector.broadcast %cst_56 : f32 to vector<16x64xf32>
    %127 = arith.mulf %126, %125 : vector<16x64xf32>
    %128 = arith.mulf %120, %127 : vector<16x64xf32>
    %cst_57 = arith.constant 1.66666663 : f32
    %129 = vector.broadcast %cst_57 : f32 to vector<16x64xf32>
    %130 = arith.mulf %128, %129 : vector<16x64xf32>
    %131 = vector.extract_strided_slice %130 {offsets = [0, 0], sizes = [16, 32], strides = [1, 1]} : vector<16x64xf32> to vector<16x32xf32>
    %c0_58 = arith.constant 0 : index
    %c0_59 = arith.constant 0 : index
    %132 = vector.load %arg10[%c0_58, %c0_59] : memref<16x32xf32, #tpu.memory_space<vmem>>, vector<16x32xf32>
    tpu.vector_store %arg10[%c0_58, %c0_59], %131 {strides = array<i32>} : memref<16x32xf32, #tpu.memory_space<vmem>>, vector<16x32xf32>,
    %133 = vector.extract_strided_slice %130 {offsets = [0, 32], sizes = [16, 32], strides = [1, 1]} : vector<16x64xf32> to vector<16x32xf32>
    %c0_60 = arith.constant 0 : index
    %c0_61 = arith.constant 0 : index
    %134 = vector.load %arg11[%c0_60, %c0_61] : memref<16x32xf32, #tpu.memory_space<vmem>>, vector<16x32xf32>
    tpu.vector_store %arg11[%c0_60, %c0_61], %133 {strides = array<i32>} : memref<16x32xf32, #tpu.memory_space<vmem>>, vector<16x32xf32>,
    return
  }
  func.func @transform_0(%arg0: i32) -> (i32, i32) {
    %c0_i32 = arith.constant 0 : i32
    %c0_i32_0 = arith.constant 0 : i32
    return %arg0, %c0_i32 : i32, i32
  }
  func.func @transform_1(%arg0: i32) -> (i32, i32) {
    %c0_i32 = arith.constant 0 : i32
    %c0_i32_0 = arith.constant 0 : i32
    return %arg0, %c0_i32 : i32, i32
  }
  func.func @transform_2(%arg0: i32) -> (i32, i32) {
    %c0_i32 = arith.constant 0 : i32
    %c0_i32_0 = arith.constant 0 : i32
    return %arg0, %c0_i32 : i32, i32
  }
  func.func @transform_3(%arg0: i32) -> (i32, i32) {
    %c0_i32 = arith.constant 0 : i32
    %c0_i32_0 = arith.constant 0 : i32
    %c0_i32_1 = arith.constant 0 : i32
    return %c0_i32, %c0_i32_0 : i32, i32
  }
  func.func @transform_4(%arg0: i32) -> (i32, i32) {
    %c0_i32 = arith.constant 0 : i32
    %c0_i32_0 = arith.constant 0 : i32
    %c0_i32_1 = arith.constant 0 : i32
    return %c0_i32, %c0_i32_0 : i32, i32
  }
  func.func @transform_5(%arg0: i32) -> (i32, i32) {
    %c0_i32 = arith.constant 0 : i32
    %c0_i32_0 = arith.constant 0 : i32
    %c0_i32_1 = arith.constant 0 : i32
    return %c0_i32, %c0_i32_0 : i32, i32
  }
  func.func @transform_6(%arg0: i32) -> (i32, i32) {
    %c0_i32 = arith.constant 0 : i32
    %c0_i32_0 = arith.constant 0 : i32
    %c0_i32_1 = arith.constant 0 : i32
    return %c0_i32, %c0_i32_0 : i32, i32
  }
  func.func @transform_7(%arg0: i32) -> (i32, i32) {
    %c0_i32 = arith.constant 0 : i32
    %c0_i32_0 = arith.constant 0 : i32
    %c0_i32_1 = arith.constant 0 : i32
    return %c0_i32, %c0_i32_0 : i32, i32
  }
  func.func @transform_8(%arg0: i32) -> (i32, i32) {
    %c0_i32 = arith.constant 0 : i32
    %c0_i32_0 = arith.constant 0 : i32
    %c0_i32_1 = arith.constant 0 : i32
    return %c0_i32, %c0_i32_0 : i32, i32
  }
  func.func @transform_9(%arg0: i32) -> (i32, i32) {
    %c0_i32 = arith.constant 0 : i32
    %c0_i32_0 = arith.constant 0 : i32
    return %arg0, %c0_i32 : i32, i32
  }
  func.func @transform_10(%arg0: i32) -> (i32, i32) {
    %c0_i32 = arith.constant 0 : i32
    %c0_i32_0 = arith.constant 0 : i32
    return %arg0, %c0_i32 : i32, i32
  }
}

module attributes {stable_mosaic.version = 11 : i64} {
  func.func @kernel(%arg0: i32, %arg1: memref<8x32xf32, #tpu.memory_space<vmem>>, %arg2: memref<8x16xf32, #tpu.memory_space<vmem>>, %arg3: memref<32x16xf32, #tpu.memory_space<vmem>>, %arg4: memref<16x16xf32, #tpu.memory_space<vmem>>, %arg5: memref<16x16xf32, #tpu.memory_space<vmem>>, %arg6: memref<8x16xf32, #tpu.memory_space<vmem>>) attributes {dimension_semantics = [#tpu.dimension_semantics<parallel>], iteration_bounds = array<i64: 1>, scalar_prefetch = 0 : i64, scratch_operands = 0 : i64, tpu.core_type = #tpu.core_type<tc>, window_params = [{transform_indices = @transform_0, window_bounds = array<i64: 8, 32>}, {transform_indices = @transform_1, window_bounds = array<i64: 8, 16>}, {pipeline_mode = #tpu.pipeline_mode<synchronous>, transform_indices = @transform_2, window_bounds = array<i64: 32, 16>}, {pipeline_mode = #tpu.pipeline_mode<synchronous>, transform_indices = @transform_3, window_bounds = array<i64: 16, 16>}, {pipeline_mode = #tpu.pipeline_mode<synchronous>, transform_indices = @transform_4, window_bounds = array<i64: 16, 16>}, {transform_indices = @transform_5, window_bounds = array<i64: 8, 16>}]} {
    %c0 = arith.constant 0 : index
    %c0_0 = arith.constant 0 : index
    %0 = vector.load %arg1[%c0, %c0_0] : memref<8x32xf32, #tpu.memory_space<vmem>>, vector<8x32xf32>
    %c0_1 = arith.constant 0 : index
    %c0_2 = arith.constant 0 : index
    %1 = vector.load %arg3[%c0_1, %c0_2] : memref<32x16xf32, #tpu.memory_space<vmem>>, vector<32x16xf32>
    %2 = arith.truncf %0 : vector<8x32xf32> to vector<8x32xbf16>
    %3 = arith.truncf %1 : vector<32x16xf32> to vector<32x16xbf16>
    %cst = arith.constant dense<0.000000e+00> : vector<8x16xf32>
    %4 = tpu.matmul %2, %3, %cst {dimension_numbers = #tpu.dot_dimension_numbers<[1], [0], [0], [1], [0, 0, 1, 1], [], []>} : vector<8x32xbf16>, vector<32x16xbf16>, vector<8x16xf32> -> vector<8x16xf32>
    %cst_3 = arith.constant 5.000000e-01 : f32
    %5 = vector.broadcast %cst_3 : f32 to vector<8x16xf32>
    %6 = arith.mulf %5, %4 : vector<8x16xf32>
    %7 = math.tanh %6 : vector<8x16xf32>
    %cst_4 = arith.constant 1.000000e+00 : f32
    %8 = vector.broadcast %cst_4 : f32 to vector<8x16xf32>
    %9 = arith.addf %7, %8 : vector<8x16xf32>
    %cst_5 = arith.constant 5.000000e-01 : f32
    %10 = vector.broadcast %cst_5 : f32 to vector<8x16xf32>
    %11 = arith.mulf %10, %9 : vector<8x16xf32>
    %12 = arith.mulf %4, %11 : vector<8x16xf32>
    %cst_6 = arith.constant 1.66666663 : f32
    %13 = vector.broadcast %cst_6 : f32 to vector<8x16xf32>
    %14 = arith.mulf %12, %13 : vector<8x16xf32>
    %c0_7 = arith.constant 0 : index
    %c0_8 = arith.constant 0 : index
    %15 = vector.load %arg4[%c0_7, %c0_8] : memref<16x16xf32, #tpu.memory_space<vmem>>, vector<16x16xf32>
    %16 = arith.truncf %14 : vector<8x16xf32> to vector<8x16xbf16>
    %17 = arith.truncf %15 : vector<16x16xf32> to vector<16x16xbf16>
    %cst_9 = arith.constant dense<0.000000e+00> : vector<8x16xf32>
    %18 = tpu.matmul %16, %17, %cst_9 {dimension_numbers = #tpu.dot_dimension_numbers<[1], [0], [0], [1], [0, 0, 1, 1], [], []>} : vector<8x16xbf16>, vector<16x16xbf16>, vector<8x16xf32> -> vector<8x16xf32>
    %cst_10 = arith.constant 5.000000e-01 : f32
    %19 = vector.broadcast %cst_10 : f32 to vector<8x16xf32>
    %20 = arith.mulf %19, %18 : vector<8x16xf32>
    %21 = math.tanh %20 : vector<8x16xf32>
    %cst_11 = arith.constant 1.000000e+00 : f32
    %22 = vector.broadcast %cst_11 : f32 to vector<8x16xf32>
    %23 = arith.addf %21, %22 : vector<8x16xf32>
    %cst_12 = arith.constant 5.000000e-01 : f32
    %24 = vector.broadcast %cst_12 : f32 to vector<8x16xf32>
    %25 = arith.mulf %24, %23 : vector<8x16xf32>
    %26 = arith.mulf %18, %25 : vector<8x16xf32>
    %cst_13 = arith.constant 1.66666663 : f32
    %27 = vector.broadcast %cst_13 : f32 to vector<8x16xf32>
    %28 = arith.mulf %26, %27 : vector<8x16xf32>
    %c0_14 = arith.constant 0 : index
    %c0_15 = arith.constant 0 : index
    %29 = vector.load %arg5[%c0_14, %c0_15] : memref<16x16xf32, #tpu.memory_space<vmem>>, vector<16x16xf32>
    %30 = arith.truncf %28 : vector<8x16xf32> to vector<8x16xbf16>
    %31 = arith.truncf %29 : vector<16x16xf32> to vector<16x16xbf16>
    %cst_16 = arith.constant dense<0.000000e+00> : vector<8x16xf32>
    %32 = tpu.matmul %30, %31, %cst_16 {dimension_numbers = #tpu.dot_dimension_numbers<[1], [0], [0], [1], [0, 0, 1, 1], [], []>} : vector<8x16xbf16>, vector<16x16xbf16>, vector<8x16xf32> -> vector<8x16xf32>
    %cst_17 = arith.constant 5.000000e-01 : f32
    %33 = vector.broadcast %cst_17 : f32 to vector<8x16xf32>
    %34 = arith.mulf %33, %32 : vector<8x16xf32>
    %35 = math.tanh %34 : vector<8x16xf32>
    %cst_18 = arith.constant 1.000000e+00 : f32
    %36 = vector.broadcast %cst_18 : f32 to vector<8x16xf32>
    %37 = arith.addf %35, %36 : vector<8x16xf32>
    %cst_19 = arith.constant 5.000000e-01 : f32
    %38 = vector.broadcast %cst_19 : f32 to vector<8x16xf32>
    %39 = arith.mulf %38, %37 : vector<8x16xf32>
    %40 = arith.mulf %32, %39 : vector<8x16xf32>
    %cst_20 = arith.constant 1.66666663 : f32
    %41 = vector.broadcast %cst_20 : f32 to vector<8x16xf32>
    %42 = arith.mulf %40, %41 : vector<8x16xf32>
    %43 = arith.addf %14, %42 : vector<8x16xf32>
    %cst_21 = arith.constant 0.707106769 : f32
    %44 = vector.broadcast %cst_21 : f32 to vector<8x16xf32>
    %45 = arith.mulf %43, %44 : vector<8x16xf32>
    %c0_22 = arith.constant 0 : index
    %c0_23 = arith.constant 0 : index
    %46 = vector.load %arg2[%c0_22, %c0_23] : memref<8x16xf32, #tpu.memory_space<vmem>>, vector<8x16xf32>
    %47 = arith.addf %46, %45 : vector<8x16xf32>
    %cst_24 = arith.constant 0.707106769 : f32
    %48 = vector.broadcast %cst_24 : f32 to vector<8x16xf32>
    %49 = arith.mulf %47, %48 : vector<8x16xf32>
    %c0_25 = arith.constant 0 : index
    %c0_26 = arith.constant 0 : index
    %50 = vector.load %arg6[%c0_25, %c0_26] : memref<8x16xf32, #tpu.memory_space<vmem>>, vector<8x16xf32>
    tpu.vector_store %arg6[%c0_25, %c0_26], %49 {strides = array<i32>} : memref<8x16xf32, #tpu.memory_space<vmem>>, vector<8x16xf32>,
    return
  }
  func.func @transform_0(%arg0: i32) -> (i32, i32) {
    %c0_i32 = arith.constant 0 : i32
    %c0_i32_0 = arith.constant 0 : i32
    return %arg0, %c0_i32 : i32, i32
  }
  func.func @transform_1(%arg0: i32) -> (i32, i32) {
    %c0_i32 = arith.constant 0 : i32
    %c0_i32_0 = arith.constant 0 : i32
    return %arg0, %c0_i32 : i32, i32
  }
  func.func @transform_2(%arg0: i32) -> (i32, i32) {
    %c0_i32 = arith.constant 0 : i32
    %c0_i32_0 = arith.constant 0 : i32
    %c0_i32_1 = arith.constant 0 : i32
    return %c0_i32, %c0_i32_0 : i32, i32
  }
  func.func @transform_3(%arg0: i32) -> (i32, i32) {
    %c0_i32 = arith.constant 0 : i32
    %c0_i32_0 = arith.constant 0 : i32
    %c0_i32_1 = arith.constant 0 : i32
    return %c0_i32, %c0_i32_0 : i32, i32
  }
  func.func @transform_4(%arg0: i32) -> (i32, i32) {
    %c0_i32 = arith.constant 0 : i32
    %c0_i32_0 = arith.constant 0 : i32
    %c0_i32_1 = arith.constant 0 : i32
    return %c0_i32, %c0_i32_0 : i32, i32
  }
  func.func @transform_5(%arg0: i32) -> (i32, i32) {
    %c0_i32 = arith.constant 0 : i32
    %c0_i32_0 = arith.constant 0 : i32
    return %arg0, %c0_i32 : i32, i32
  }
}

module attributes {stable_mosaic.version = 11 : i64} {
  func.func @kernel(%arg0: i32, %arg1: memref<16x32xf32, #tpu.memory_space<vmem>>, %arg2: memref<16x32xf32, #tpu.memory_space<vmem>>, %arg3: memref<32x32xf32, #tpu.memory_space<vmem>>, %arg4: memref<32x32xf32, #tpu.memory_space<vmem>>, %arg5: memref<32x32xf32, #tpu.memory_space<vmem>>, %arg6: memref<32x32xf32, #tpu.memory_space<vmem>>, %arg7: memref<16x32xf32, #tpu.memory_space<vmem>>) attributes {dimension_semantics = [#tpu.dimension_semantics<parallel>], iteration_bounds = array<i64: 1>, scalar_prefetch = 0 : i64, scratch_operands = 0 : i64, tpu.core_type = #tpu.core_type<tc>, window_params = [{transform_indices = @transform_0, window_bounds = array<i64: 16, 32>}, {transform_indices = @transform_1, window_bounds = array<i64: 16, 32>}, {pipeline_mode = #tpu.pipeline_mode<synchronous>, transform_indices = @transform_2, window_bounds = array<i64: 32, 32>}, {pipeline_mode = #tpu.pipeline_mode<synchronous>, transform_indices = @transform_3, window_bounds = array<i64: 32, 32>}, {pipeline_mode = #tpu.pipeline_mode<synchronous>, transform_indices = @transform_4, window_bounds = array<i64: 32, 32>}, {pipeline_mode = #tpu.pipeline_mode<synchronous>, transform_indices = @transform_5, window_bounds = array<i64: 32, 32>}, {transform_indices = @transform_6, window_bounds = array<i64: 16, 32>}]} {
    %c0 = arith.constant 0 : index
    %c0_0 = arith.constant 0 : index
    %0 = vector.load %arg2[%c0, %c0_0] : memref<16x32xf32, #tpu.memory_space<vmem>>, vector<16x32xf32>
    %c0_1 = arith.constant 0 : index
    %c0_2 = arith.constant 0 : index
    %1 = vector.load %arg1[%c0_1, %c0_2] : memref<16x32xf32, #tpu.memory_space<vmem>>, vector<16x32xf32>
    %c0_3 = arith.constant 0 : index
    %c0_4 = arith.constant 0 : index
    %2 = vector.load %arg3[%c0_3, %c0_4] : memref<32x32xf32, #tpu.memory_space<vmem>>, vector<32x32xf32>
    %3 = arith.truncf %1 : vector<16x32xf32> to vector<16x32xbf16>
    %4 = arith.truncf %2 : vector<32x32xf32> to vector<32x32xbf16>
    %cst = arith.constant dense<0.000000e+00> : vector<16x32xf32>
    %5 = tpu.matmul %3, %4, %cst {dimension_numbers = #tpu.dot_dimension_numbers<[1], [0], [0], [1], [0, 0, 1, 1], [], []>} : vector<16x32xbf16>, vector<32x32xbf16>, vector<16x32xf32> -> vector<16x32xf32>
    %c0_5 = arith.constant 0 : index
    %c0_6 = arith.constant 0 : index
    %6 = vector.load %arg4[%c0_5, %c0_6] : memref<32x32xf32, #tpu.memory_space<vmem>>, vector<32x32xf32>
    %7 = arith.truncf %0 : vector<16x32xf32> to vector<16x32xbf16>
    %8 = arith.truncf %6 : vector<32x32xf32> to vector<32x32xbf16>
    %cst_7 = arith.constant dense<0.000000e+00> : vector<16x32xf32>
    %9 = tpu.matmul %7, %8, %cst_7 {dimension_numbers = #tpu.dot_dimension_numbers<[1], [0], [0], [1], [0, 0, 1, 1], [], []>} : vector<16x32xbf16>, vector<32x32xbf16>, vector<16x32xf32> -> vector<16x32xf32>
    %10 = arith.addf %5, %9 : vector<16x32xf32>
    %cst_8 = arith.constant 5.000000e-01 : f32
    %11 = vector.broadcast %cst_8 : f32 to vector<16x32xf32>
    %12 = arith.mulf %11, %10 : vector<16x32xf32>
    %13 = math.tanh %12 : vector<16x32xf32>
    %cst_9 = arith.constant 1.000000e+00 : f32
    %14 = vector.broadcast %cst_9 : f32 to vector<16x32xf32>
    %15 = arith.addf %13, %14 : vector<16x32xf32>
    %cst_10 = arith.constant 5.000000e-01 : f32
    %16 = vector.broadcast %cst_10 : f32 to vector<16x32xf32>
    %17 = arith.mulf %16, %15 : vector<16x32xf32>
    %18 = arith.mulf %10, %17 : vector<16x32xf32>
    %cst_11 = arith.constant 1.66666663 : f32
    %19 = vector.broadcast %cst_11 : f32 to vector<16x32xf32>
    %20 = arith.mulf %18, %19 : vector<16x32xf32>
    %c0_12 = arith.constant 0 : index
    %c0_13 = arith.constant 0 : index
    %21 = vector.load %arg5[%c0_12, %c0_13] : memref<32x32xf32, #tpu.memory_space<vmem>>, vector<32x32xf32>
    %22 = arith.truncf %20 : vector<16x32xf32> to vector<16x32xbf16>
    %23 = arith.truncf %21 : vector<32x32xf32> to vector<32x32xbf16>
    %cst_14 = arith.constant dense<0.000000e+00> : vector<16x32xf32>
    %24 = tpu.matmul %22, %23, %cst_14 {dimension_numbers = #tpu.dot_dimension_numbers<[1], [0], [0], [1], [0, 0, 1, 1], [], []>} : vector<16x32xbf16>, vector<32x32xbf16>, vector<16x32xf32> -> vector<16x32xf32>
    %cst_15 = arith.constant 5.000000e-01 : f32
    %25 = vector.broadcast %cst_15 : f32 to vector<16x32xf32>
    %26 = arith.mulf %25, %24 : vector<16x32xf32>
    %27 = math.tanh %26 : vector<16x32xf32>
    %cst_16 = arith.constant 1.000000e+00 : f32
    %28 = vector.broadcast %cst_16 : f32 to vector<16x32xf32>
    %29 = arith.addf %27, %28 : vector<16x32xf32>
    %cst_17 = arith.constant 5.000000e-01 : f32
    %30 = vector.broadcast %cst_17 : f32 to vector<16x32xf32>
    %31 = arith.mulf %30, %29 : vector<16x32xf32>
    %32 = arith.mulf %24, %31 : vector<16x32xf32>
    %cst_18 = arith.constant 1.66666663 : f32
    %33 = vector.broadcast %cst_18 : f32 to vector<16x32xf32>
    %34 = arith.mulf %32, %33 : vector<16x32xf32>
    %c0_19 = arith.constant 0 : index
    %c0_20 = arith.constant 0 : index
    %35 = vector.load %arg6[%c0_19, %c0_20] : memref<32x32xf32, #tpu.memory_space<vmem>>, vector<32x32xf32>
    %36 = arith.truncf %34 : vector<16x32xf32> to vector<16x32xbf16>
    %37 = arith.truncf %35 : vector<32x32xf32> to vector<32x32xbf16>
    %cst_21 = arith.constant dense<0.000000e+00> : vector<16x32xf32>
    %38 = tpu.matmul %36, %37, %cst_21 {dimension_numbers = #tpu.dot_dimension_numbers<[1], [0], [0], [1], [0, 0, 1, 1], [], []>} : vector<16x32xbf16>, vector<32x32xbf16>, vector<16x32xf32> -> vector<16x32xf32>
    %cst_22 = arith.constant 5.000000e-01 : f32
    %39 = vector.broadcast %cst_22 : f32 to vector<16x32xf32>
    %40 = arith.mulf %39, %38 : vector<16x32xf32>
    %41 = math.tanh %40 : vector<16x32xf32>
    %cst_23 = arith.constant 1.000000e+00 : f32
    %42 = vector.broadcast %cst_23 : f32 to vector<16x32xf32>
    %43 = arith.addf %41, %42 : vector<16x32xf32>
    %cst_24 = arith.constant 5.000000e-01 : f32
    %44 = vector.broadcast %cst_24 : f32 to vector<16x32xf32>
    %45 = arith.mulf %44, %43 : vector<16x32xf32>
    %46 = arith.mulf %38, %45 : vector<16x32xf32>
    %cst_25 = arith.constant 1.66666663 : f32
    %47 = vector.broadcast %cst_25 : f32 to vector<16x32xf32>
    %48 = arith.mulf %46, %47 : vector<16x32xf32>
    %49 = arith.addf %20, %48 : vector<16x32xf32>
    %cst_26 = arith.constant 0.707106769 : f32
    %50 = vector.broadcast %cst_26 : f32 to vector<16x32xf32>
    %51 = arith.mulf %49, %50 : vector<16x32xf32>
    %52 = arith.addf %0, %51 : vector<16x32xf32>
    %cst_27 = arith.constant 0.707106769 : f32
    %53 = vector.broadcast %cst_27 : f32 to vector<16x32xf32>
    %54 = arith.mulf %52, %53 : vector<16x32xf32>
    %c0_28 = arith.constant 0 : index
    %c0_29 = arith.constant 0 : index
    %55 = vector.load %arg7[%c0_28, %c0_29] : memref<16x32xf32, #tpu.memory_space<vmem>>, vector<16x32xf32>
    tpu.vector_store %arg7[%c0_28, %c0_29], %54 {strides = array<i32>} : memref<16x32xf32, #tpu.memory_space<vmem>>, vector<16x32xf32>,
    return
  }
  func.func @transform_0(%arg0: i32) -> (i32, i32) {
    %c0_i32 = arith.constant 0 : i32
    %c0_i32_0 = arith.constant 0 : i32
    return %arg0, %c0_i32 : i32, i32
  }
  func.func @transform_1(%arg0: i32) -> (i32, i32) {
    %c0_i32 = arith.constant 0 : i32
    %c0_i32_0 = arith.constant 0 : i32
    return %arg0, %c0_i32 : i32, i32
  }
  func.func @transform_2(%arg0: i32) -> (i32, i32) {
    %c0_i32 = arith.constant 0 : i32
    %c0_i32_0 = arith.constant 0 : i32
    %c0_i32_1 = arith.constant 0 : i32
    return %c0_i32, %c0_i32_0 : i32, i32
  }
  func.func @transform_3(%arg0: i32) -> (i32, i32) {
    %c0_i32 = arith.constant 0 : i32
    %c0_i32_0 = arith.constant 0 : i32
    %c0_i32_1 = arith.constant 0 : i32
    return %c0_i32, %c0_i32_0 : i32, i32
  }
  func.func @transform_4(%arg0: i32) -> (i32, i32) {
    %c0_i32 = arith.constant 0 : i32
    %c0_i32_0 = arith.constant 0 : i32
    %c0_i32_1 = arith.constant 0 : i32
    return %c0_i32, %c0_i32_0 : i32, i32
  }
  func.func @transform_5(%arg0: i32) -> (i32, i32) {
    %c0_i32 = arith.constant 0 : i32
    %c0_i32_0 = arith.constant 0 : i32
    %c0_i32_1 = arith.constant 0 : i32
    return %c0_i32, %c0_i32_0 : i32, i32
  }
  func.func @transform_6(%arg0: i32) -> (i32, i32) {
    %c0_i32 = arith.constant 0 : i32
    %c0_i32_0 = arith.constant 0 : i32
    return %arg0, %c0_i32 : i32, i32
  }
}

</mosaic_0001>

<bundles_post_ra>
// kernel: interaction_block_pallas.11
= control target key start
LH: loop header
LB: loop body
LE: loop exit
PB: predicated region body
PF: predicated region fallthrough
CT: control target
= control target key end

     0   :  { %v253_v0 = vmov 0.0   ;;  %vm254_vm0 = vmmov 0   ;;  %vm93_vm1 = vcmask 130048   ;;  %vm30_vm2 = vcmask 261120   ;;  %s338_s2 = inlined_call_operand.vmem [shape: f32[32,32], index: 2, kind: input, shape index: {}]   ;;  %s339_s3 = inlined_call_operand.vmem [shape: f32[16,32], index: 3, kind: input, shape index: {}]   ;;  %s340_s1 = inlined_call_operand.vmem [shape: f32[16,16], index: 1, kind: input, shape index: {}]   ;;  %s341_s0 = inlined_call_operand.vmem [shape: f32[16,32], index: 0, kind: input, shape index: {}]   ;;  %s342_s4 = inlined_call_operand.vmem [shape: f32[32,8], index: 4, kind: input, shape index: {}]   ;;  %s343_s5 = inlined_call_operand.vmem [shape: f32[16,8], index: 5, kind: output, shape index: {}]  }
   0x1   :  { %221 = vmatprep.subr.bf16.mxu0 %v253_v0  ;;  %v25_v1 = vld [vmem:[%s338_s2 + $0x10] sm:$0xff]  ;;  %v26_v2 = vld [vmem:[%s338_s2 + $0x18] sm:$0xff]  ;;  %v23_v3 = vld [vmem:[%s338_s2] sm:$0xff]  ;;  %225 = vmatprep.mubr.msk.bf16.mxu0 %vm254_vm0, %v253_v0  ;;  %vm203_vm3 = vcmask 64512  }
   0x2   :  { %v29_v4 = vpack.c.bf16 %v26_v2, %v25_v1  ;;  %v24_v5 = vld [vmem:[%s338_s2 + $0x8] sm:$0xff]  ;;  %229 = vmatprep.subr.bf16.mxu1 %v253_v0  ;;  %231 = vmatprep.mubr.msk.bf16.mxu1 %vm254_vm0, %v253_v0  ;;  %v89_v6 = vld [vmem:[%s339_s3] sm:$0xff]  ;;  %v142_v16 = vld [vmem:[%s342_s4 + $0x10] sm:$0xff] }
   0x3   :  { %v90_v7 = vld [vmem:[%s339_s3 + $0x8] sm:$0xff]  ;;  %v87_v8 = vld [vmem:[%s340_s1] sm:$0xff]  ;;  %v28_v9 = vpack.c.bf16 %v24_v5, %v23_v3  ;;  %v143_v17 = vld [vmem:[%s342_s4 + $0x18] sm:$0xff] }
   0x4   :  { %222 = vmatpush3.bf16.msra.mxu0 %v29_v4  ;;  %v21_v10 = vld [vmem:[%s341_s0] sm:$0xff]  ;;  %v22_v11 = vld [vmem:[%s341_s0 + $0x8] sm:$0xff]  ;;  %v92_v12 = vpack.c.bf16 %v90_v7, %v89_v6  ;;  %v146_v18 = vpack.c.bf16 %v143_v17, %v142_v16 }
   0x5   :  { %v88_v13 = vld [vmem:[%s340_s1 + $0x8] sm:$0xff]  ;;  %223 = vmatprep.subr.bf16.mxu0 %v253_v0  ;;  %v27_v15 = vpack.c.bf16 %v22_v11, %v21_v10  ;;  %v140_v19 = vld [vmem:[%s342_s4] sm:$0xff] }
   0x6   :  { %v91_v14 = vpack.c.bf16 %v88_v13, %v87_v8  ;;  %230 = vmatpush3.bf16.msra.mxu1 %v92_v12  ;;  %v141_v20 = vld [vmem:[%s342_s4 + $0x8] sm:$0xff] }
   0x7   :  { %235 = vmatprep.subr.bf16.mxu1 %v253_v0  ;;  %v145_v21 = vpack.c.bf16 %v141_v20, %v140_v19 }
   0x8   :  { %224 = vmatpush3.bf16.msra.mxu0 %v28_v9 }
   0x9   :  { %232 = vmatmul.mubr.msk.bf16.vlgmr.msra.gmra.mxu1 %vm93_vm1, %v91_v14 }
   0xa   :  { %239 = vmatprep.mubr.msk.bf16.mxu1 %vm254_vm0, %v253_v0  ;;  %236 = vmatpush3.bf16.msra.mxu1 %v146_v18 }
   0xb   :  { %226 = vmatmul.mubr.msk.bf16.vlgmr.msra.gmra.mxu0 %vm30_vm2, %v27_v15  ;;  %237 = vmatprep.subr.bf16.mxu1 %v253_v0 }
   0xe   :  { %238 = vmatpush3.bf16.msra.mxu1 %v145_v21 }
  0xc9   :  { %v131_v22 = vpop.f32.mrf.mxu1 }
  0xcb   :  { %v68_v23 = vpop.f32.mrf.mxu0  ;;  %v233_v24 = vpop.f32.mrf.mxu1 }
  0xcc   :  { %v75_v25 = vmul.f32 0.5, %v68_v23 }
  0xcd   :  { %v227_v26 = vpop.f32.mrf.mxu0  ;;  %v134_v27 = vpop.f32.mrf.mxu1 }
  0xce   :  { %245 = vtanh.f32 %v75_v25 }
  0xcf   :  { %v71_v28 = vpop.f32.mrf.mxu0  ;;  %v234_v29 = vpop.f32.mrf.mxu1 }
  0xd0   :  { %v76_v30 = vmul.f32 0.5, %v71_v28 }
  0xd1   :  { %v228_v31 = vpop.f32.mrf.mxu0 }
  0xd2   :  { %247 = vtanh.f32 %v76_v30 }
  0xdb   :  { %v246_v32 = vpop.eup %245 }
  0xdc   :  { %v79_v33 = vadd.f32 1.0, %v246_v32 }
  0xde   :  { %v81_v34 = vmul.f32 0.5, %v79_v33 }
  0xdf   :  { %v248_v35 = vpop.eup %247 }
  0xe0   :  { %v83_v36 = vmul.f32 %v81_v34, %v68_v23  ;;  %v80_v37 = vadd.f32 1.0, %v248_v35 }
  0xe2   :  { %v82_v38 = vmul.f32 0.5, %v80_v37  ;;  %v85_v39 = vmul.f32 1.6666666, %v83_v36 }
  0xe4   :  { %v84_v40 = vmul.f32 %v82_v38, %v71_v28  ;;  %v138_v42 = vmul.f32 %v131_v22, %v85_v39 }
  0xe6   :  { %v86_v41 = vmul.f32 1.6666666, %v84_v40 }
  0xe8   :  { %v139_v43 = vmul.f32 %v134_v27, %v86_v41 }
  0xea   :  { %v144_v44 = vpack.c.bf16 %v139_v43, %v138_v42 }
  0xec   :  { %240 = vmatmul.mubr.msk.bf16.vlgmr.msra.gmra.mxu1 %vm30_vm2, %v144_v44 }
 0x1ac   :  { %v184_v45 = vpop.f32.mrf.mxu1 }
 0x1ad   :  { %v191_v46 = vmul.f32 0.5, %v184_v45 }
 0x1ae   :  { %v241_v47 = vpop.f32.mrf.mxu1 }
 0x1af   :  { %249 = vtanh.f32 %v191_v46 }
 0x1b0   :  { %v187_v48 = vpop.f32.mrf.mxu1 }
 0x1b1   :  { %v192_v49 = vmul.f32 0.5, %v187_v48 }
 0x1b2   :  { %v242_v50 = vpop.f32.mrf.mxu1 }
 0x1b3   :  { %251 = vtanh.f32 %v192_v49 }
 0x1bc   :  { %v250_v51 = vpop.eup %249 }
 0x1bd   :  { %v195_v52 = vadd.f32 1.0, %v250_v51 }
 0x1bf   :  { %v197_v53 = vmul.f32 0.5, %v195_v52 }
 0x1c0   :  { %v252_v54 = vpop.eup %251 }
 0x1c1   :  { %v199_v55 = vmul.f32 %v197_v53, %v184_v45  ;;  %v196_v56 = vadd.f32 1.0, %v252_v54 }
 0x1c3   :  { %v201_v57 = vmul.f32 1.6666666, %v199_v55  ;;  %v198_v58 = vmul.f32 0.5, %v196_v56 }
 0x1c5   :  { %204 = vst.msk [vmem:[%s343_s5] sm:$0xff] %vm203_vm3, %v201_v57  ;;  %v200_v59 = vmul.f32 %v198_v58, %v187_v48 }
 0x1c7   :  { %v202_v60 = vmul.f32 1.6666666, %v200_v59 }
 0x1c9   :  { %205 = vst.msk [vmem:[%s343_s5 + $0x8] sm:$0xff] %vm203_vm3, %v202_v60 }

// kernel: interaction_block_pallas.12
= control target key start
LH: loop header
LB: loop body
LE: loop exit
PB: predicated region body
PF: predicated region fallthrough
CT: control target
= control target key end

     0   :  { %vm46_vm0 = vcmask 64512   ;;  %s2162_s17 = smov 120   ;;  %s2164_s25 = smov 96   ;;  %vm381_vm1 = vcmask 130048   ;;  %v2173_v60 = vmov 0.0   ;;  %vm2174_vm2 = vmmov 0   ;;  %s2466_s1 = inlined_call_operand.vmem [shape: f32[16,16], index: 1, kind: input, shape index: {}]   ;;  %s2467_s2 = inlined_call_operand.vmem [shape: f32[16,16], index: 2, kind: input, shape index: {}]   ;;  %s2468_s3 = inlined_call_operand.vmem [shape: f32[8,64], index: 3, kind: input, shape index: {}]   ;;  %s2469_s4 = inlined_call_operand.vmem [shape: f32[8,64], index: 4, kind: input, shape index: {}]   ;;  %s2470_s0 = inlined_call_operand.vmem [shape: f32[16,128], index: 0, kind: input, shape index: {}]   ;;  %s2471_s5 = inlined_call_operand.vmem [shape: f32[16,128], index: 5, kind: input, shape index: {}]   ;;  %s2472_s6 = inlined_call_operand.vmem [shape: f32[8,128], index: 6, kind: input, shape index: {}]   ;;  %s2473_s7 = inlined_call_operand.vmem [shape: f32[128,16], index: 7, kind: input, shape index: {}]   ;;  %s2474_s8 = inlined_call_operand.vmem [shape: f32[16,64], index: 8, kind: input, shape index: {}]   ;;  %s2475_s9 = inlined_call_operand.vmem [shape: f32[16,32], index: 9, kind: output, shape index: {0}]   ;;  %s2476_s10 = inlined_call_operand.vmem [shape: f32[16,32], index: 10, kind: output, shape index: {1}]  }
   0x1   :  { %v37_v0 = vld [vmem:[%s2466_s1] sm:$0xff]  ;;  %v38_v1 = vld [vmem:[%s2466_s1 + $0x8] sm:$0xff]  ;;  %s2165_s28 = smov 80   ;;  %s2166_s12 = smov 64   ;;  %v1750_v57 = vld [vmem:[%s2473_s7 + $0x70] sm:$0xff]  ;;  %vm1862_vm3 = vcmask 261120  }
   0x2   :  { %211 = vrot.lane.b32.xlu0 %v37_v0, %s2162_s17  ;;  %213 = vrot.lane.b32.xlu1 %v38_v1, %s2162_s17  ;;  %v41_v2 = vld [vmem:[%s2468_s3] sm:$0xff]  ;;  %v40_v4 = vld [vmem:[%s2467_s2 + $0x8] sm:$0xff]  ;;  %s2168_s14 = smov 48   ;;  %s2169_s15 = smov 88  }
   0x3   :  { %v39_v3 = vld [vmem:[%s2467_s2] sm:$0xff]  ;;  %2003 = vmatprep.subr.mxu1 %v41_v2  ;;  %2005 = vmatprep.mubr.msk.f32.mxu1 %vm46_vm0, %v37_v0  ;;  %v2268_v7 = vld [vmem:[%s2470_s0 + $0x8] sm:$0xff]  ;;  %s2170_s16 = smov 32   ;;  %s2172_s18 = smov 72   ;;  %v1751_v58 = vld [vmem:[%s2473_s7 + $0x78] sm:$0xff] }
   0x4   :  { %v42_v5 = vld [vmem:[%s2469_s4] sm:$0xff]  ;;  %2004 = vmatpush3.msra.mxu1 %v41_v2  ;;  %2013 = vmatprep.subr.mxu0 %v41_v2  ;;  %s2163_s4 = smov 112   ;;  %v2285_v12 = vld [vmem:[%s2471_s5 + $0x8] sm:$0xff]  ;;  %v1760_v59 = vpack.c.bf16 %v1751_v58, %v1750_v57  ;;  %v1746_v0 = vld [vmem:[%s2473_s7 + $0x50] sm:$0xff] }
   0x5   :  { %2006 = vmatmul.mubr.msk.f32.vlgmr.msra.gmra.mxu1 %vm46_vm0, %v38_v1  ;;  %2008 = vmatprep.subr.mxu1 %v42_v5  ;;  %v2258_v6 = vld [vmem:[%s2470_s0] sm:$0xff]  ;;  %v1749_v62 = vld [vmem:[%s2473_s7 + $0x68] sm:$0xff]  ;;  %v1747_v1 = vld [vmem:[%s2473_s7 + $0x58] sm:$0xff] }
   0x6   :  { %294 = vrot.lane.b32.xlu0 %v39_v3, %s2162_s17  ;;  %296 = vrot.lane.b32.xlu1 %v40_v4, %s2162_s17  ;;  %v2293_v13 = vld [vmem:[%s2471_s5] sm:$0xff] }
   0x7   :  { %2009 = vmatpush3.msra.mxu1 %v42_v5  ;;  %2010 = vmatprep.mubr.msk.f32.mxu1 %vm46_vm0, %v39_v3  ;;  %v2309_v14 = vld [vmem:[%s2472_s6] sm:$0xff]  ;;  %s2167_s6 = smov 104  }
   0x8   :  { %2014 = vmatpush3.msra.mxu0 %v41_v2  ;;  %2018 = vmatprep.subr.mxu1 %v42_v5  ;;  %v1748_v61 = vld [vmem:[%s2473_s7 + $0x60] sm:$0xff]  ;;  %v1758_v2 = vpack.c.bf16 %v1747_v1, %v1746_v0 }
   0x9   :  { %2011 = vmatmul.mubr.msk.f32.vlgmr.msra.gmra.mxu1 %vm46_vm0, %v40_v4  ;;  %2047 = vmatprep.subr.mxu0 %v2285_v12  ;;  %v1759_v63 = vpack.c.bf16 %v1749_v62, %v1748_v61  ;;  %v1744_v3 = vld [vmem:[%s2473_s7 + $0x40] sm:$0xff]  ;;  %v1745_v4 = vld [vmem:[%s2473_s7 + $0x48] sm:$0xff] }
   0xa   :  { %2019 = vmatpush3.msra.mxu1 %v42_v5  ;;  %546 = vrot.lane.b32.xlu0 %v2258_v6, %s2163_s4  ;;  %v1757_v5 = vpack.c.bf16 %v1745_v4, %v1744_v3 }
   0xb   :  { %548 = vrot.lane.b32.xlu1 %v2268_v7, %s2163_s4  ;;  %2023 = vmatprep.subr.mxu1 %v2285_v12 }
   0xe   :  { %716 = vrot.lane.b32.xlu0 %v2258_v6, %s2164_s25 }
  0x12   :  { %718 = vrot.lane.b32.xlu0 %v2268_v7, %s2164_s25 }
  0x16   :  { %886 = vrot.lane.b32.xlu0 %v2258_v6, %s2165_s28 }
  0x1a   :  { %888 = vrot.lane.b32.xlu0 %v2268_v7, %s2165_s28 }
  0x1e   :  { %1056 = vrot.lane.b32.xlu0 %v2258_v6, %s2166_s12 }
  0x74   :  { %v212_v8 = vpop.permute.xlu0 %211  ;;  %v214_v9 = vpop.permute.xlu1 %213 }
  0x75   :  { %2015 = vmatprep.mubr.msk.f32.mxu0 %vm46_vm0, %v212_v8 }
  0x76   :  { %2016 = vmatmul.mubr.msk.f32.vlgmr.msra.gmra.mxu0 %vm46_vm0, %v214_v9  ;;  %v1740_v9 = vld [vmem:[%s2473_s7 + $0x20] sm:$0xff] }
  0x77   :  { %2048 = vmatpush3.msra.mxu0 %v2285_v12 }
  0x78   :  { %v295_v10 = vpop.permute.xlu0 %294  ;;  %v297_v11 = vpop.permute.xlu1 %296  ;;  %2049 = vmatprep.subr.mxu0 %v2293_v13 }
  0x79   :  { %2020 = vmatprep.mubr.msk.f32.mxu1 %vm46_vm0, %v295_v10  ;;  %2050 = vmatpush3.msra.mxu0 %v2293_v13  ;;  %v1741_v10 = vld [vmem:[%s2473_s7 + $0x28] sm:$0xff] }
  0x7a   :  { %2021 = vmatmul.mubr.msk.f32.vlgmr.msra.gmra.mxu1 %vm46_vm0, %v297_v11  ;;  %2059 = vmatprep.subr.mxu0 %v2285_v12  ;;  %v1755_v11 = vpack.c.bf16 %v1741_v10, %v1740_v9 }
  0x7b   :  { %2024 = vmatpush3.msra.mxu1 %v2285_v12  ;;  %2027 = vmatprep.mubr.msk.f32.mxu1 %vm381_vm1, %v2258_v6 }
  0x7c   :  { %2025 = vmatprep.subr.mxu1 %v2293_v13  ;;  %v547_v15 = vpop.permute.xlu0 %546 }
  0x7d   :  { %2026 = vmatpush3.msra.mxu1 %v2293_v13  ;;  %v549_v35 = vpop.permute.xlu1 %548 }
  0x7e   :  { %2028 = vmatmul.mubr.msk.f32.vlgmr.msra.gmra.mxu1 %vm381_vm1, %v2268_v7  ;;  %2030 = vmatprep.subr.mxu1 %v2309_v14 }
  0x7f   :  { %2031 = vmatpush3.msra.mxu1 %v2309_v14 }
  0x80   :  { %2035 = vmatprep.subr.mxu1 %v2285_v12  ;;  %v717_v16 = vpop.permute.xlu0 %716 }
  0x81   :  { %2051 = vmatprep.mubr.msk.f32.mxu0 %vm381_vm1, %v717_v16  ;;  %v1737_v16 = vld [vmem:[%s2473_s7 + $0x8] sm:$0xff] }
  0x84   :  { %v719_v17 = vpop.permute.xlu0 %718 }
  0x85   :  { %2052 = vmatmul.mubr.msk.f32.vlgmr.msra.gmra.mxu0 %vm381_vm1, %v719_v17 }
  0x86   :  { %2060 = vmatpush3.msra.mxu0 %v2285_v12 }
  0x87   :  { %2061 = vmatprep.subr.mxu0 %v2293_v13 }
  0x88   :  { %v887_v18 = vpop.permute.xlu0 %886  ;;  %2062 = vmatpush3.msra.mxu0 %v2293_v13 }
  0x89   :  { %2063 = vmatprep.mubr.msk.f32.mxu0 %vm381_vm1, %v887_v18  ;;  %2071 = vmatprep.subr.mxu0 %v2285_v12 }
  0x8c   :  { %v889_v19 = vpop.permute.xlu0 %888 }
  0x8d   :  { %2064 = vmatmul.mubr.msk.f32.vlgmr.msra.gmra.mxu0 %vm381_vm1, %v889_v19 }
  0x8e   :  { %2072 = vmatpush3.msra.mxu0 %v2285_v12 }
  0x8f   :  { %2073 = vmatprep.subr.mxu0 %v2293_v13 }
  0x90   :  { %2074 = vmatpush3.msra.mxu0 %v2293_v13  ;;  %v1057_v21 = vpop.permute.xlu0 %1056 }
  0x91   :  { %2083 = vmatprep.subr.mxu0 %v2285_v12  ;;  %2075 = vmatprep.mubr.msk.f32.mxu0 %vm381_vm1, %v1057_v21 }
  0xc5   :  { %v2007_v20 = vpop.f32.mrf.mxu1 }
  0xc7   :  { %v119_v22 = vpop.f32.mrf.mxu1 }
  0xc9   :  { %v2012_v23 = vpop.f32.mrf.mxu1 }
  0xca   :  { %v210_v27 = vmul.f32 %v2012_v23, %v2007_v20 }
  0xcb   :  { %v200_v24 = vpop.f32.mrf.mxu1 }
  0xcc   :  { %v209_v31 = vmul.f32 %v200_v24, %v119_v22 }
 0x136   :  { %v2017_v25 = vpop.f32.mrf.mxu0 }
 0x138   :  { %v285_v29 = vpop.f32.mrf.mxu0 }
 0x13a   :  { %v2022_v26 = vpop.f32.mrf.mxu1 }
 0x13b   :  { %v378_v28 = vmul.f32 %v2022_v26, %v2017_v25 }
 0x13c   :  { %v368_v30 = vpop.f32.mrf.mxu1 }
 0x13d   :  { %v380_v32 = vadd.f32 %v378_v28, %v210_v27  ;;  %v377_v33 = vmul.f32 %v368_v30, %v285_v29 }
 0x13e   :  { %v2029_v18 = vpop.f32.mrf.mxu1 }
 0x13f   :  { %v379_v34 = vadd.f32 %v377_v33, %v209_v31  ;;  %631 = vrot.lane.b32.xlu1 %v380_v32, %s2162_s17 }
 0x140   :  { %v454_v19 = vpop.f32.mrf.mxu1 }
 0x141   :  { %629 = vrot.lane.b32.xlu0 %v379_v34, %s2162_s17  ;;  %2032 = vmatprep.mubr.msk.f32.mxu1 %vm46_vm0, %v379_v34  ;;  %s2171_s17 = smov 16  }
 0x142   :  { %2033 = vmatmul.mubr.msk.f32.vlgmr.msra.gmra.mxu1 %vm46_vm0, %v380_v32 }
 0x143   :  { %801 = vrot.lane.b32.xlu1 %v380_v32, %s2163_s4  ;;  %2036 = vmatpush3.msra.mxu1 %v2285_v12 }
 0x144   :  { %2037 = vmatprep.subr.mxu1 %v2293_v13  ;;  %2039 = vmatprep.mubr.msk.f32.mxu1 %vm381_vm1, %v547_v15  ;;  %v1736_v15 = vld [vmem:[%s2473_s7] sm:$0xff] }
 0x145   :  { %1058 = vrot.lane.b32.xlu0 %v2268_v7, %s2166_s12  ;;  %2038 = vmatpush3.msra.mxu1 %v2293_v13  ;;  %v1753_v17 = vpack.c.bf16 %v1737_v16, %v1736_v15  ;;  %v2053_v23 = vpop.f32.mrf.mxu0 }
 0x146   :  { %2040 = vmatmul.mubr.msk.f32.vlgmr.msra.gmra.mxu1 %vm381_vm1, %v549_v35  ;;  %2042 = vmatprep.subr.mxu1 %v2309_v14 }
 0x147   :  { %971 = vrot.lane.b32.xlu1 %v380_v32, %s2167_s6  ;;  %2043 = vmatpush3.msra.mxu1 %v2309_v14  ;;  %v790_v26 = vpop.f32.mrf.mxu0 }
 0x148   :  { %2054 = vmatprep.subr.mxu1 %v2309_v14 }
 0x149   :  { %1226 = vrot.lane.b32.xlu0 %v2258_v6, %s2168_s14 }
 0x14b   :  { %1141 = vrot.lane.b32.xlu1 %v380_v32, %s2164_s25 }
 0x14d   :  { %1228 = vrot.lane.b32.xlu0 %v2268_v7, %s2168_s14  ;;  %v2065_v27 = vpop.f32.mrf.mxu0 }
 0x14f   :  { %1311 = vrot.lane.b32.xlu1 %v380_v32, %s2169_s15  ;;  %v960_v30 = vpop.f32.mrf.mxu0 }
 0x151   :  { %1396 = vrot.lane.b32.xlu0 %v2258_v6, %s2170_s16 }
 0x153   :  { %1481 = vrot.lane.b32.xlu1 %v380_v32, %s2165_s28 }
 0x155   :  { %1398 = vrot.lane.b32.xlu0 %v2268_v7, %s2170_s16 }
 0x157   :  { %799 = vrot.lane.b32.xlu1 %v379_v34, %s2163_s4 }
 0x159   :  { %1566 = vrot.lane.b32.xlu0 %v2258_v6, %s2171_s17  ;;  %v1742_v6 = vld [vmem:[%s2473_s7 + $0x30] sm:$0xff] }
 0x15b   :  { %969 = vrot.lane.b32.xlu1 %v379_v34, %s2167_s6 }
 0x15d   :  { %1568 = vrot.lane.b32.xlu0 %v2268_v7, %s2171_s17  ;;  %v1743_v7 = vld [vmem:[%s2473_s7 + $0x38] sm:$0xff] }
 0x15e   :  { %v1756_v8 = vpack.c.bf16 %v1743_v7, %v1742_v6 }
 0x15f   :  { %1139 = vrot.lane.b32.xlu1 %v379_v34, %s2164_s25 }
 0x163   :  { %1309 = vrot.lane.b32.xlu1 %v379_v34, %s2169_s15 }
 0x167   :  { %1479 = vrot.lane.b32.xlu1 %v379_v34, %s2165_s28 }
 0x16b   :  { %1649 = vrot.lane.b32.xlu1 %v379_v34, %s2172_s18 }
 0x16f   :  { %1651 = vrot.lane.b32.xlu1 %v380_v32, %s2172_s18 }
 0x1b1   :  { %v632_v36 = vpop.permute.xlu1 %631 }
 0x1b3   :  { %v630_v37 = vpop.permute.xlu0 %629 }
 0x1b4   :  { %2044 = vmatprep.mubr.msk.f32.mxu1 %vm46_vm0, %v630_v37 }
 0x1b5   :  { %v802_v38 = vpop.permute.xlu1 %801  ;;  %2045 = vmatmul.mubr.msk.f32.vlgmr.msra.gmra.mxu1 %vm46_vm0, %v632_v36 }
 0x1b6   :  { %2055 = vmatpush3.msra.mxu1 %v2309_v14 }
 0x1b7   :  { %v1059_v39 = vpop.permute.xlu0 %1058  ;;  %2066 = vmatprep.subr.mxu1 %v2309_v14 }
 0x1b8   :  { %2076 = vmatmul.mubr.msk.f32.vlgmr.msra.gmra.mxu0 %vm381_vm1, %v1059_v39 }
 0x1b9   :  { %v972_v40 = vpop.permute.xlu1 %971  ;;  %2084 = vmatpush3.msra.mxu0 %v2285_v12 }
 0x1ba   :  { %2085 = vmatprep.subr.mxu0 %v2293_v13 }
 0x1bb   :  { %v1227_v41 = vpop.permute.xlu0 %1226  ;;  %2086 = vmatpush3.msra.mxu0 %v2293_v13 }
 0x1bc   :  { %2087 = vmatprep.mubr.msk.f32.mxu0 %vm381_vm1, %v1227_v41  ;;  %2095 = vmatprep.subr.mxu0 %v2285_v12 }
 0x1bd   :  { %v1142_v42 = vpop.permute.xlu1 %1141 }
 0x1bf   :  { %v1229_v43 = vpop.permute.xlu0 %1228 }
 0x1c0   :  { %2088 = vmatmul.mubr.msk.f32.vlgmr.msra.gmra.mxu0 %vm381_vm1, %v1229_v43 }
 0x1c1   :  { %v1312_v44 = vpop.permute.xlu1 %1311  ;;  %2096 = vmatpush3.msra.mxu0 %v2285_v12 }
 0x1c2   :  { %2097 = vmatprep.subr.mxu0 %v2293_v13 }
 0x1c3   :  { %v1397_v45 = vpop.permute.xlu0 %1396  ;;  %2098 = vmatpush3.msra.mxu0 %v2293_v13 }
 0x1c4   :  { %2099 = vmatprep.mubr.msk.f32.mxu0 %vm381_vm1, %v1397_v45  ;;  %2107 = vmatprep.subr.mxu0 %v2285_v12 }
 0x1c5   :  { %v1482_v46 = vpop.permute.xlu1 %1481 }
 0x1c7   :  { %v1399_v47 = vpop.permute.xlu0 %1398 }
 0x1c8   :  { %2100 = vmatmul.mubr.msk.f32.vlgmr.msra.gmra.mxu0 %vm381_vm1, %v1399_v47 }
 0x1c9   :  { %v800_v48 = vpop.permute.xlu1 %799  ;;  %2108 = vmatpush3.msra.mxu0 %v2285_v12  ;;  %v1738_v12 = vld [vmem:[%s2473_s7 + $0x10] sm:$0xff] }
 0x1ca   :  { %2056 = vmatprep.mubr.msk.f32.mxu1 %vm46_vm0, %v800_v48  ;;  %2109 = vmatprep.subr.mxu0 %v2293_v13 }
 0x1cb   :  { %2057 = vmatmul.mubr.msk.f32.vlgmr.msra.gmra.mxu1 %vm46_vm0, %v802_v38  ;;  %v1567_v49 = vpop.permute.xlu0 %1566  ;;  %2110 = vmatpush3.msra.mxu0 %v2293_v13  ;;  %v1739_v13 = vld [vmem:[%s2473_s7 + $0x18] sm:$0xff] }
 0x1cc   :  { %2067 = vmatpush3.msra.mxu1 %v2309_v14  ;;  %2111 = vmatprep.mubr.msk.f32.mxu0 %vm381_vm1, %v1567_v49 }
 0x1cd   :  { %v970_v50 = vpop.permute.xlu1 %969  ;;  %2078 = vmatprep.subr.mxu1 %v2309_v14  ;;  %2119 = vmatprep.subr.bf16.mxu0 %v2173_v60 }
 0x1ce   :  { %2068 = vmatprep.mubr.msk.f32.mxu1 %vm46_vm0, %v970_v50 }
 0x1cf   :  { %2069 = vmatmul.mubr.msk.f32.vlgmr.msra.gmra.mxu1 %vm46_vm0, %v972_v40  ;;  %v1569_v51 = vpop.permute.xlu0 %1568 }
 0x1d0   :  { %2079 = vmatpush3.msra.mxu1 %v2309_v14  ;;  %2112 = vmatmul.mubr.msk.f32.vlgmr.msra.gmra.mxu0 %vm381_vm1, %v1569_v51 }
 0x1d1   :  { %v1140_v52 = vpop.permute.xlu1 %1139  ;;  %2090 = vmatprep.subr.mxu1 %v2309_v14  ;;  %2120 = vmatpush3.bf16.msra.mxu0 %v1760_v59 }
 0x1d2   :  { %2080 = vmatprep.mubr.msk.f32.mxu1 %vm46_vm0, %v1140_v52  ;;  %2121 = vmatprep.subr.bf16.mxu0 %v2173_v60 }
 0x1d3   :  { %2081 = vmatmul.mubr.msk.f32.vlgmr.msra.gmra.mxu1 %vm46_vm0, %v1142_v42  ;;  %2135 = vmatprep.mubr.msk.bf16.mxu0 %vm2174_vm2, %v2173_v60 }
 0x1d4   :  { %2091 = vmatpush3.msra.mxu1 %v2309_v14 }
 0x1d5   :  { %v1310_v53 = vpop.permute.xlu1 %1309  ;;  %2102 = vmatprep.subr.mxu1 %v2309_v14  ;;  %2122 = vmatpush3.bf16.msra.mxu0 %v1759_v63 }
 0x1d6   :  { %2092 = vmatprep.mubr.msk.f32.mxu1 %vm46_vm0, %v1310_v53  ;;  %2123 = vmatprep.subr.bf16.mxu0 %v2173_v60 }
 0x1d7   :  { %2093 = vmatmul.mubr.msk.f32.vlgmr.msra.gmra.mxu1 %vm46_vm0, %v1312_v44 }
 0x1d8   :  { %2103 = vmatpush3.msra.mxu1 %v2309_v14 }
 0x1d9   :  { %v1480_v54 = vpop.permute.xlu1 %1479  ;;  %2114 = vmatprep.subr.mxu1 %v2309_v14  ;;  %2124 = vmatpush3.bf16.msra.mxu0 %v1758_v2 }
 0x1da   :  { %2104 = vmatprep.mubr.msk.f32.mxu1 %vm46_vm0, %v1480_v54  ;;  %2125 = vmatprep.subr.bf16.mxu0 %v2173_v60 }
 0x1db   :  { %2105 = vmatmul.mubr.msk.f32.vlgmr.msra.gmra.mxu1 %vm46_vm0, %v1482_v46 }
 0x1dc   :  { %2115 = vmatpush3.msra.mxu1 %v2309_v14  ;;  %v1754_v14 = vpack.c.bf16 %v1739_v13, %v1738_v12 }
 0x1dd   :  { %v1650_v55 = vpop.permute.xlu1 %1649  ;;  %2139 = vmatprep.subr.bf16.mxu1 %v2173_v60  ;;  %2126 = vmatpush3.bf16.msra.mxu0 %v1757_v5 }
 0x1de   :  { %2116 = vmatprep.mubr.msk.f32.mxu1 %vm46_vm0, %v1650_v55  ;;  %2127 = vmatprep.subr.bf16.mxu0 %v2173_v60 }
 0x1e1   :  { %v1652_v56 = vpop.permute.xlu1 %1651  ;;  %2128 = vmatpush3.bf16.msra.mxu0 %v1756_v8 }
 0x1e2   :  { %2117 = vmatmul.mubr.msk.f32.vlgmr.msra.gmra.mxu1 %vm46_vm0, %v1652_v56  ;;  %2129 = vmatprep.subr.bf16.mxu0 %v2173_v60 }
 0x1e3   :  { %2141 = vmatprep.mubr.msk.bf16.mxu1 %vm2174_vm2, %v2173_v60 }
 0x1e5   :  { %2130 = vmatpush3.bf16.msra.mxu0 %v1755_v11 }
 0x1e6   :  { %2131 = vmatprep.subr.bf16.mxu0 %v2173_v60 }
 0x1e9   :  { %2132 = vmatpush3.bf16.msra.mxu0 %v1754_v14 }
 0x1ea   :  { %2133 = vmatprep.subr.bf16.mxu0 %v2173_v60 }
 0x1ed   :  { %2134 = vmatpush3.bf16.msra.mxu0 %v1753_v17  ;;  %v1802_v17 = vld [vmem:[%s2474_s8] sm:$0xff] }
 0x202   :  { %v2034_v20 = vpop.f32.mrf.mxu1 }
 0x203   :  { %v545_v43 = vmul.f32 %v2034_v20, %v2029_v18  ;;  %v1803_v18 = vld [vmem:[%s2474_s8 + $0x8] sm:$0xff] }
 0x204   :  { %v535_v21 = vpop.f32.mrf.mxu1 }
 0x205   :  { %v544_v44 = vmul.f32 %v535_v21, %v454_v19  ;;  %v1805_v19 = vpack.c.bf16 %v1803_v18, %v1802_v17 }
 0x206   :  { %v2041_v22 = vpop.f32.mrf.mxu1 }
 0x207   :  { %2140 = vmatpush3.bf16.msra.mxu1 %v1805_v19 }
 0x208   :  { %v620_v24 = vpop.f32.mrf.mxu1 }
 0x275   :  { %v2046_v25 = vpop.f32.mrf.mxu1 }
 0x276   :  { %v713_v39 = vmul.f32 %v2046_v25, %v2041_v22 }
 0x277   :  { %v703_v28 = vpop.f32.mrf.mxu1 }
 0x278   :  { %v2077_v32 = vpop.f32.mrf.mxu0  ;;  %v712_v40 = vmul.f32 %v703_v28, %v620_v24  ;;  %v715_v49 = vadd.f32 %v713_v39, %v545_v43 }
 0x27a   :  { %v1130_v35 = vpop.f32.mrf.mxu0  ;;  %v714_v50 = vadd.f32 %v712_v40, %v544_v44 }
 0x280   :  { %v2089_v37 = vpop.f32.mrf.mxu0 }
 0x282   :  { %v1300_v42 = vpop.f32.mrf.mxu0 }
 0x288   :  { %v2101_v48 = vpop.f32.mrf.mxu0 }
 0x28a   :  { %v1470_v58 = vpop.f32.mrf.mxu0 }
 0x28b   :  { %v2058_v29 = vpop.f32.mrf.mxu1 }
 0x28c   :  { %v883_v45 = vmul.f32 %v2058_v29, %v2053_v23 }
 0x28d   :  { %v873_v31 = vpop.f32.mrf.mxu1 }
 0x28e   :  { %v882_v46 = vmul.f32 %v873_v31, %v790_v26  ;;  %v885_v54 = vadd.f32 %v883_v45, %v715_v49 }
 0x28f   :  { %v2070_v33 = vpop.f32.mrf.mxu1 }
 0x290   :  { %v1053_v51 = vmul.f32 %v2070_v33, %v2065_v27  ;;  %v884_v55 = vadd.f32 %v882_v46, %v714_v50  ;;  %v2113_v0 = vpop.f32.mrf.mxu0 }
 0x291   :  { %v1043_v34 = vpop.f32.mrf.mxu1 }
 0x292   :  { %v1052_v52 = vmul.f32 %v1043_v34, %v960_v30  ;;  %v1055_v60 = vadd.f32 %v1053_v51, %v885_v54  ;;  %v1640_v9 = vpop.f32.mrf.mxu0 }
 0x293   :  { %v2082_v36 = vpop.f32.mrf.mxu1 }
 0x294   :  { %v1223_v56 = vmul.f32 %v2082_v36, %v2077_v32  ;;  %v1054_v61 = vadd.f32 %v1052_v52, %v884_v55 }
 0x295   :  { %v1213_v38 = vpop.f32.mrf.mxu1 }
 0x296   :  { %v1222_v57 = vmul.f32 %v1213_v38, %v1130_v35  ;;  %v1225_v1 = vadd.f32 %v1223_v56, %v1055_v60 }
 0x297   :  { %v2094_v41 = vpop.f32.mrf.mxu1 }
 0x298   :  { %v1393_v62 = vmul.f32 %v2094_v41, %v2089_v37  ;;  %v1224_v2 = vadd.f32 %v1222_v57, %v1054_v61 }
 0x299   :  { %v1383_v47 = vpop.f32.mrf.mxu1 }
 0x29a   :  { %v1392_v63 = vmul.f32 %v1383_v47, %v1300_v42  ;;  %v1395_v6 = vadd.f32 %v1393_v62, %v1225_v1 }
 0x29b   :  { %v2106_v53 = vpop.f32.mrf.mxu1 }
 0x29c   :  { %v1563_v3 = vmul.f32 %v2106_v53, %v2101_v48  ;;  %v1394_v7 = vadd.f32 %v1392_v63, %v1224_v2 }
 0x29d   :  { %v1553_v59 = vpop.f32.mrf.mxu1 }
 0x29e   :  { %v1562_v4 = vmul.f32 %v1553_v59, %v1470_v58  ;;  %v1565_v11 = vadd.f32 %v1563_v3, %v1395_v6 }
 0x2a0   :  { %v1564_v12 = vadd.f32 %v1562_v4, %v1394_v7 }
 0x2a2   :  { %v2118_v5 = vpop.f32.mrf.mxu1 }
 0x2a3   :  { %v1733_v8 = vmul.f32 %v2118_v5, %v2113_v0 }
 0x2a4   :  { %v1723_v10 = vpop.f32.mrf.mxu1 }
 0x2a5   :  { %v1732_v13 = vmul.f32 %v1723_v10, %v1640_v9  ;;  %v1735_v14 = vadd.f32 %v1733_v8, %v1565_v11 }
 0x2a7   :  { %v1734_v15 = vadd.f32 %v1732_v13, %v1564_v12 }
 0x2a9   :  { %v1752_v16 = vpack.c.bf16 %v1735_v14, %v1734_v15 }
 0x2ab   :  { %2136 = vmatmul.mubr.bf16.vlgmr.msra.gmra.mxu0 %v1752_v16 }
 0x36b   :  { %v1795_v20 = vpop.f32.mrf.mxu0 }
 0x36d   :  { %v2137_v21 = vpop.f32.mrf.mxu0 }
 0x36f   :  { %v1798_v22 = vpop.f32.mrf.mxu0 }
 0x370   :  { %v1804_v23 = vpack.c.bf16 %v1798_v22, %v1795_v20 }
 0x371   :  { %v2138_v24 = vpop.f32.mrf.mxu0 }
 0x372   :  { %2142 = vmatmul.mubr.msk.bf16.vlgmr.msra.gmra.mxu1 %vm381_vm1, %v1804_v23 }
 0x432   :  { %v1843_v25 = vpop.f32.mrf.mxu1 }
 0x433   :  { %v1850_v26 = vmul.f32 0.5, %v1843_v25 }
 0x434   :  { %v2143_v27 = vpop.f32.mrf.mxu1 }
 0x435   :  { %2158 = vtanh.f32 %v1850_v26 }
 0x436   :  { %v1846_v28 = vpop.f32.mrf.mxu1 }
 0x437   :  { %v1851_v29 = vmul.f32 0.5, %v1846_v28 }
 0x438   :  { %v2144_v30 = vpop.f32.mrf.mxu1 }
 0x439   :  { %2160 = vtanh.f32 %v1851_v29 }
 0x442   :  { %v2159_v31 = vpop.eup %2158 }
 0x443   :  { %v1854_v32 = vadd.f32 1.0, %v2159_v31 }
 0x445   :  { %v1856_v33 = vmul.f32 0.5, %v1854_v32 }
 0x446   :  { %v2161_v34 = vpop.eup %2160 }
 0x447   :  { %v1858_v35 = vmul.f32 %v1856_v33, %v1843_v25  ;;  %v1855_v36 = vadd.f32 1.0, %v2161_v34 }
 0x449   :  { %v1860_v37 = vmul.f32 1.6666666, %v1858_v35  ;;  %v1857_v38 = vmul.f32 0.5, %v1855_v36 }
 0x44b   :  { %v1859_v39 = vmul.f32 %v1857_v38, %v1846_v28  ;;  %1867 = vrot.lane.b32.xlu0 %v1860_v37, %s2164_s25  ;;  %1863 = vst.msk [vmem:[%s2475_s9] sm:$0xff] %vm1862_vm3, %v1860_v37 }
 0x44d   :  { %v1861_v40 = vmul.f32 1.6666666, %v1859_v39 }
 0x44f   :  { %1869 = vrot.lane.b32.xlu1 %v1861_v40, %s2164_s25  ;;  %1864 = vst.msk [vmem:[%s2475_s9 + $0x8] sm:$0xff] %vm1862_vm3, %v1861_v40 }
 0x4bd   :  { %v1868_v41 = vpop.permute.xlu0 %1867 }
 0x4be   :  { %1873 = vst.msk [vmem:[%s2476_s10] sm:$0xff] %vm1862_vm3, %v1868_v41 }
 0x4c1   :  { %v1870_v42 = vpop.permute.xlu1 %1869 }
 0x4c2   :  { %1874 = vst.msk [vmem:[%s2476_s10 + $0x8] sm:$0xff] %vm1862_vm3, %v1870_v42 }

// kernel: interaction_block_pallas.9
= control target key start
LH: loop header
LB: loop body
LE: loop exit
PB: predicated region body
PF: predicated region fallthrough
CT: control target
= control target key end

     0   :  { %vm23_vm0 = vcmask 130048   ;;  %vm84_vm1 = vcmask 64512   ;;  %s156_s2 = inlined_call_operand.vmem [shape: f32[16,8], index: 2, kind: input, shape index: {}]   ;;  %s157_s1 = inlined_call_operand.vmem [shape: f32[24,16], index: 1, kind: input, shape index: {}]   ;;  %s158_s0 = inlined_call_operand.vmem [shape: f32[24,8], index: 0, kind: input, shape index: {}]   ;;  %s159_s3 = inlined_call_operand.vmem [shape: f32[24,8], index: 3, kind: output, shape index: {}]  }
   0x1   :  { %v18_v0 = vld [vmem:[%s156_s2] sm:$0xff]  ;;  %v19_v1 = vld [vmem:[%s156_s2 + $0x8] sm:$0xff]  ;;  %v17_v5 = vld [vmem:[%s157_s1 + $0x10] sm:$0xff] }
   0x2   :  { %v15_v2 = vld [vmem:[%s157_s1] sm:$0xff]  ;;  %v22_v3 = vpack.c.bf16 %v19_v1, %v18_v0  ;;  %v16_v4 = vld [vmem:[%s157_s1 + $0x8] sm:$0xff]  ;;  %v21_v7 = vpack.c.bf16 %v17_v5, %v17_v5  ;;  %v80_v8 = vld [vmem:[%s158_s0 + $0x10] sm:$0xff] }
   0x3   :  { %v20_v6 = vpack.c.bf16 %v16_v4, %v15_v2  ;;  %v78_v10 = vld [vmem:[%s158_s0] sm:$0xff]  ;;  %v79_v15 = vld [vmem:[%s158_s0 + $0x8] sm:$0xff] }
   0x4   :  { %97 = vmatprep.subr.bf16.mxu0 %v22_v3 }
   0x5   :  { %98 = vmatpush3.bf16.msra.mxu0 %v22_v3  ;;  %99 = vmatprep.mubr.msk.bf16.mxu0 %vm23_vm0, %v20_v6 }
   0x8   :  { %100 = vmatmul.mubr.msk.bf16.vlgmr.msra.gmra.mxu0 %vm23_vm0, %v21_v7 }
  0xc8   :  { %v101_v9 = vpop.f32.mrf.mxu0 }
  0xc9   :  { %v83_v11 = vmul.f32 %v101_v9, %v80_v8 }
  0xca   :  { %v64_v12 = vpop.f32.mrf.mxu0 }
  0xcb   :  { %87 = vst.msk [vmem:[%s159_s3 + $0x10] sm:$0xff] %vm84_vm1, %v83_v11  ;;  %v81_v13 = vmul.f32 %v78_v10, %v64_v12 }
  0xcc   :  { %v102_v14 = vpop.f32.mrf.mxu0 }
  0xcd   :  { %85 = vst.msk [vmem:[%s159_s3] sm:$0xff] %vm84_vm1, %v81_v13 }
  0xce   :  { %v67_v16 = vpop.f32.mrf.mxu0 }
  0xcf   :  { %v82_v17 = vmul.f32 %v79_v15, %v67_v16 }
  0xd1   :  { %86 = vst.msk [vmem:[%s159_s3 + $0x8] sm:$0xff] %vm84_vm1, %v82_v17 }

// kernel: interaction_block_pallas.13
= control target key start
LH: loop header
LB: loop body
LE: loop exit
PB: predicated region body
PF: predicated region fallthrough
CT: control target
= control target key end

     0   :  { %v552_v0 = vmov 0.0   ;;  %vm553_vm0 = vmmov 0   ;;  %vm53_vm1 = vcmask 261120   ;;  %vm404_vm2 = vcmask 130048   ;;  %s794_s6 = inlined_call_operand.vmem [shape: f32[32,32], index: 6, kind: input, shape index: {}]   ;;  %s795_s0 = inlined_call_operand.vmem [shape: f32[16,32], index: 0, kind: input, shape index: {}]   ;;  %s796_s8 = inlined_call_operand.vmem [shape: f32[32,32], index: 8, kind: input, shape index: {}]   ;;  %s797_s1 = inlined_call_operand.vmem [shape: f32[16,32], index: 1, kind: input, shape index: {}]   ;;  %s798_s2 = inlined_call_operand.vmem [shape: f32[16,32], index: 2, kind: input, shape index: {}]   ;;  %s799_s3 = inlined_call_operand.vmem [shape: f32[16,32], index: 3, kind: input, shape index: {}]   ;;  %s800_s4 = inlined_call_operand.vmem [shape: f32[16,32], index: 4, kind: input, shape index: {}]   ;;  %s801_s9 = inlined_call_operand.vmem [shape: f32[32,32], index: 9, kind: input, shape index: {}]   ;;  %s802_s10 = inlined_call_operand.vmem [shape: f32[32,32], index: 10, kind: input, shape index: {}]   ;;  %s803_s11 = inlined_call_operand.vmem [shape: f32[32,32], index: 11, kind: input, shape index: {}]   ;;  %s804_s7 = inlined_call_operand.vmem [shape: f32[16,32], index: 7, kind: input, shape index: {}]   ;;  %s805_s5 = inlined_call_operand.vmem [shape: f32[16,16], index: 5, kind: input, shape index: {}]   ;;  %s806_s12 = inlined_call_operand.vmem [shape: f32[16,32], index: 12, kind: output, shape index: {0}]   ;;  %s807_s13 = inlined_call_operand.vmem [shape: f32[16,32], index: 13, kind: output, shape index: {1}]  }
   0x1   :  { %484 = vmatprep.subr.bf16.mxu0 %v552_v0  ;;  %v48_v1 = vld [vmem:[%s794_s6 + $0x10] sm:$0xff]  ;;  %v49_v2 = vld [vmem:[%s794_s6 + $0x18] sm:$0xff]  ;;  %v46_v3 = vld [vmem:[%s794_s6] sm:$0xff]  ;;  %488 = vmatprep.mubr.msk.bf16.mxu0 %vm553_vm0, %v552_v0 }
   0x2   :  { %v52_v4 = vpack.c.bf16 %v49_v2, %v48_v1  ;;  %v47_v5 = vld [vmem:[%s794_s6 + $0x8] sm:$0xff]  ;;  %492 = vmatprep.subr.bf16.mxu1 %v552_v0  ;;  %496 = vmatprep.mubr.msk.bf16.mxu1 %vm553_vm0, %v552_v0  ;;  %v645_v7 = vld [vmem:[%s795_s0] sm:$0xff]  ;;  %v134_v10 = vld [vmem:[%s796_s8 + $0x10] sm:$0xff] }
   0x3   :  { %v51_v6 = vpack.c.bf16 %v47_v5, %v46_v3  ;;  %v650_v8 = vld [vmem:[%s795_s0 + $0x8] sm:$0xff]  ;;  %v135_v11 = vld [vmem:[%s796_s8 + $0x18] sm:$0xff]  ;;  %v132_v13 = vld [vmem:[%s796_s8] sm:$0xff] }
   0x4   :  { %485 = vmatpush3.bf16.msra.mxu0 %v52_v4  ;;  %v50_v9 = vpack.c.bf16 %v650_v8, %v645_v7  ;;  %v138_v12 = vpack.c.bf16 %v135_v11, %v134_v10  ;;  %v133_v14 = vld [vmem:[%s796_s8 + $0x8] sm:$0xff]  ;;  %v110_v22 = vld [vmem:[%s797_s1] sm:$0xff]  ;;  %v197_v55 = vld [vmem:[%s801_s9 + $0x10] sm:$0xff] }
   0x5   :  { %486 = vmatprep.subr.bf16.mxu0 %v552_v0  ;;  %v137_v15 = vpack.c.bf16 %v133_v14, %v132_v13  ;;  %v112_v23 = vld [vmem:[%s798_s2] sm:$0xff]  ;;  %v111_v29 = vld [vmem:[%s797_s1 + $0x8] sm:$0xff]  ;;  %v198_v56 = vld [vmem:[%s801_s9 + $0x18] sm:$0xff] }
   0x6   :  { %493 = vmatpush3.bf16.msra.mxu1 %v138_v12  ;;  %v114_v25 = vadd.f32 %v112_v23, %v110_v22  ;;  %v118_v27 = vld [vmem:[%s799_s3] sm:$0xff]  ;;  %v113_v30 = vld [vmem:[%s798_s2 + $0x8] sm:$0xff]  ;;  %v201_v57 = vpack.c.bf16 %v198_v56, %v197_v55 }
   0x7   :  { %494 = vmatprep.subr.bf16.mxu1 %v552_v0  ;;  %v120_v28 = vld [vmem:[%s800_s4] sm:$0xff]  ;;  %v119_v34 = vld [vmem:[%s799_s3 + $0x8] sm:$0xff]  ;;  %v115_v39 = vadd.f32 %v113_v30, %v111_v29 }
   0x8   :  { %487 = vmatpush3.bf16.msra.mxu0 %v51_v6  ;;  %v116_v33 = vmul.f32 0.70710677, %v114_v25  ;;  %v121_v35 = vld [vmem:[%s800_s4 + $0x8] sm:$0xff]  ;;  %v122_v37 = vadd.f32 %v120_v28, %v118_v27  ;;  %v195_v58 = vld [vmem:[%s801_s9] sm:$0xff] }
   0x9   :  { %500 = vmatprep.subr.bf16.mxu0 %v552_v0  ;;  %v123_v42 = vadd.f32 %v121_v35, %v119_v34  ;;  %v117_v46 = vmul.f32 0.70710677, %v115_v39  ;;  %v196_v59 = vld [vmem:[%s801_s9 + $0x8] sm:$0xff] }
   0xa   :  { %495 = vmatpush3.bf16.msra.mxu1 %v137_v15  ;;  %v124_v43 = vmul.f32 0.70710677, %v122_v37  ;;  %v200_v60 = vpack.c.bf16 %v196_v59, %v195_v58  ;;  %v399_v55 = vld [vmem:[%s805_s5 + $0x8] sm:$0xff] }
   0xb   :  { %489 = vmatmul.mubr.msk.bf16.vlgmr.msra.gmra.mxu0 %vm53_vm1, %v50_v9  ;;  %508 = vmatprep.subr.bf16.mxu1 %v552_v0  ;;  %v125_v48 = vmul.f32 0.70710677, %v123_v42 }
   0xc   :  { %504 = vmatprep.mubr.msk.bf16.mxu0 %vm553_vm0, %v552_v0  ;;  %501 = vmatpush3.bf16.msra.mxu0 %v201_v57 }
   0xd   :  { %502 = vmatprep.subr.bf16.mxu0 %v552_v0 }
  0x10   :  { %503 = vmatpush3.bf16.msra.mxu0 %v200_v60 }
  0x11   :  { %516 = vmatprep.subr.bf16.mxu0 %v552_v0 }
  0xcb   :  { %v91_v16 = vpop.f32.mrf.mxu0 }
  0xcc   :  { %v98_v17 = vmul.f32 0.5, %v91_v16 }
  0xcd   :  { %v490_v18 = vpop.f32.mrf.mxu0 }
  0xce   :  { %532 = vtanh.f32 %v98_v17  ;;  %v268_v17 = vld [vmem:[%s802_s10 + $0x10] sm:$0xff]  ;;  %v269_v18 = vld [vmem:[%s802_s10 + $0x18] sm:$0xff] }
  0xcf   :  { %v94_v19 = vpop.f32.mrf.mxu0 }
  0xd0   :  { %v99_v20 = vmul.f32 0.5, %v94_v19 }
  0xd1   :  { %v491_v21 = vpop.f32.mrf.mxu0 }
  0xd2   :  { %534 = vtanh.f32 %v99_v20  ;;  %v266_v20 = vld [vmem:[%s802_s10] sm:$0xff]  ;;  %v267_v21 = vld [vmem:[%s802_s10 + $0x8] sm:$0xff] }
  0xd3   :  { %v271_v22 = vpack.c.bf16 %v267_v21, %v266_v20 }
  0xdb   :  { %v533_v24 = vpop.eup %532 }
  0xdc   :  { %v102_v26 = vadd.f32 1.0, %v533_v24 }
  0xde   :  { %v104_v31 = vmul.f32 0.5, %v102_v26 }
  0xdf   :  { %v535_v32 = vpop.eup %534 }
  0xe0   :  { %v106_v36 = vmul.f32 %v104_v31, %v91_v16  ;;  %v103_v38 = vadd.f32 1.0, %v535_v32 }
  0xe2   :  { %v108_v40 = vmul.f32 1.6666666, %v106_v36  ;;  %v105_v41 = vmul.f32 0.5, %v103_v38 }
  0xe4   :  { %v126_v44 = vadd.f32 %v116_v33, %v108_v40  ;;  %v107_v45 = vmul.f32 %v105_v41, %v94_v19  ;;  %v272_v19 = vpack.c.bf16 %v269_v18, %v268_v17 }
  0xe6   :  { %v109_v47 = vmul.f32 1.6666666, %v107_v45  ;;  %v128_v49 = vadd.f32 %v126_v44, %v124_v43 }
  0xe8   :  { %v127_v50 = vadd.f32 %v117_v46, %v109_v47  ;;  %v697_v52 = vmul.f32 0.57735026, %v128_v49  ;;  %v329_v49 = vld [vmem:[%s803_s11] sm:$0xff] }
  0xea   :  { %v129_v51 = vadd.f32 %v127_v50, %v125_v48  ;;  %v331_v48 = vld [vmem:[%s803_s11 + $0x10] sm:$0xff]  ;;  %v330_v50 = vld [vmem:[%s803_s11 + $0x8] sm:$0xff] }
  0xec   :  { %v699_v53 = vmul.f32 0.57735026, %v129_v51  ;;  %v334_v51 = vpack.c.bf16 %v330_v50, %v329_v49 }
  0xee   :  { %v136_v54 = vpack.c.bf16 %v699_v53, %v697_v52 }
  0xf0   :  { %497 = vmatmul.mubr.msk.bf16.vlgmr.msra.gmra.mxu1 %vm53_vm1, %v136_v54 }
  0xf1   :  { %512 = vmatprep.mubr.msk.bf16.mxu1 %vm553_vm0, %v552_v0  ;;  %509 = vmatpush3.bf16.msra.mxu1 %v272_v19 }
  0xf2   :  { %510 = vmatprep.subr.bf16.mxu1 %v552_v0 }
  0xf5   :  { %511 = vmatpush3.bf16.msra.mxu1 %v271_v22 }
  0xf6   :  { %524 = vmatprep.subr.bf16.mxu1 %v552_v0 }
 0x1b0   :  { %v176_v61 = vpop.f32.mrf.mxu1 }
 0x1b1   :  { %v183_v62 = vmul.f32 0.5, %v176_v61 }
 0x1b2   :  { %v498_v63 = vpop.f32.mrf.mxu1 }
 0x1b3   :  { %536 = vtanh.f32 %v183_v62 }
 0x1b4   :  { %v179_v1 = vpop.f32.mrf.mxu1 }
 0x1b5   :  { %v184_v2 = vmul.f32 0.5, %v179_v1 }
 0x1b6   :  { %v499_v3 = vpop.f32.mrf.mxu1 }
 0x1b7   :  { %538 = vtanh.f32 %v184_v2 }
 0x1c0   :  { %v537_v4 = vpop.eup %536 }
 0x1c1   :  { %v187_v5 = vadd.f32 1.0, %v537_v4 }
 0x1c3   :  { %v189_v6 = vmul.f32 0.5, %v187_v5 }
 0x1c4   :  { %v539_v9 = vpop.eup %538 }
 0x1c5   :  { %v188_v10 = vadd.f32 1.0, %v539_v9  ;;  %v191_v11 = vmul.f32 %v189_v6, %v176_v61 }
 0x1c7   :  { %v190_v12 = vmul.f32 0.5, %v188_v10  ;;  %v193_v14 = vmul.f32 1.6666666, %v191_v11 }
 0x1c9   :  { %v192_v13 = vmul.f32 %v190_v12, %v179_v1 }
 0x1cb   :  { %v194_v15 = vmul.f32 1.6666666, %v192_v13 }
 0x1cd   :  { %v199_v16 = vpack.c.bf16 %v194_v15, %v193_v14 }
 0x1cf   :  { %505 = vmatmul.mubr.msk.bf16.vlgmr.msra.gmra.mxu0 %vm53_vm1, %v199_v16 }
 0x1d0   :  { %520 = vmatprep.mubr.msk.bf16.mxu0 %vm553_vm0, %v552_v0 }
 0x28f   :  { %v239_v23 = vpop.f32.mrf.mxu0 }
 0x290   :  { %v246_v24 = vmul.f32 0.5, %v239_v23 }
 0x291   :  { %v506_v25 = vpop.f32.mrf.mxu0 }
 0x292   :  { %540 = vtanh.f32 %v246_v24 }
 0x293   :  { %v242_v26 = vpop.f32.mrf.mxu0 }
 0x294   :  { %v247_v27 = vmul.f32 0.5, %v242_v26 }
 0x295   :  { %v507_v28 = vpop.f32.mrf.mxu0 }
 0x296   :  { %542 = vtanh.f32 %v247_v27 }
 0x29f   :  { %v541_v29 = vpop.eup %540 }
 0x2a0   :  { %v250_v30 = vadd.f32 1.0, %v541_v29 }
 0x2a2   :  { %v252_v31 = vmul.f32 0.5, %v250_v30 }
 0x2a3   :  { %v543_v32 = vpop.eup %542 }
 0x2a4   :  { %v254_v33 = vmul.f32 %v252_v31, %v239_v23  ;;  %v251_v34 = vadd.f32 1.0, %v543_v32 }
 0x2a6   :  { %v256_v35 = vmul.f32 1.6666666, %v254_v33  ;;  %v253_v36 = vmul.f32 0.5, %v251_v34 }
 0x2a8   :  { %v258_v37 = vadd.f32 %v256_v35, %v697_v52  ;;  %v255_v38 = vmul.f32 %v253_v36, %v242_v26  ;;  %v400_v52 = vld [vmem:[%s804_s7] sm:$0xff] }
 0x2aa   :  { %v260_v39 = vmul.f32 0.70710677, %v258_v37  ;;  %v257_v40 = vmul.f32 1.6666666, %v255_v38 }
 0x2ac   :  { %v259_v41 = vadd.f32 %v257_v40, %v699_v53  ;;  %v262_v42 = vadd.f32 %v260_v39, %v645_v7  ;;  %v332_v7 = vld [vmem:[%s803_s11 + $0x18] sm:$0xff]  ;;  %v401_v53 = vld [vmem:[%s804_s7 + $0x8] sm:$0xff] }
 0x2ad   :  { %v403_v54 = vpack.c.bf16 %v401_v53, %v400_v52 }
 0x2ae   :  { %v261_v43 = vmul.f32 0.70710677, %v259_v41  ;;  %v741_v45 = vmul.f32 0.70710677, %v262_v42 }
 0x2b0   :  { %v263_v44 = vadd.f32 %v261_v43, %v650_v8  ;;  %v335_v8 = vpack.c.bf16 %v332_v7, %v331_v48 }
 0x2b2   :  { %v743_v46 = vmul.f32 0.70710677, %v263_v44  ;;  %517 = vmatpush3.bf16.msra.mxu0 %v335_v8 }
 0x2b3   :  { %518 = vmatprep.subr.bf16.mxu0 %v552_v0 }
 0x2b4   :  { %v270_v47 = vpack.c.bf16 %v743_v46, %v741_v45 }
 0x2b6   :  { %513 = vmatmul.mubr.msk.bf16.vlgmr.msra.gmra.mxu1 %vm53_vm1, %v270_v47  ;;  %519 = vmatpush3.bf16.msra.mxu0 %v334_v51 }
 0x2b7   :  { %526 = vmatprep.mubr.msk.bf16.mxu1 %vm553_vm0, %v552_v0  ;;  %v398_v0 = vld [vmem:[%s805_s5] sm:$0xff]  ;;  %525 = vmatpush3.bf16.msra.mxu1 %v403_v54 }
 0x2b8   :  { %v402_v56 = vpack.c.bf16 %v399_v55, %v398_v0 }
 0x2be   :  { %527 = vmatmul.mubr.msk.bf16.vlgmr.msra.gmra.mxu1 %vm404_vm2, %v402_v56 }
 0x376   :  { %v310_v57 = vpop.f32.mrf.mxu1 }
 0x377   :  { %v317_v58 = vmul.f32 0.5, %v310_v57 }
 0x378   :  { %v514_v59 = vpop.f32.mrf.mxu1 }
 0x379   :  { %544 = vtanh.f32 %v317_v58 }
 0x37a   :  { %v313_v60 = vpop.f32.mrf.mxu1 }
 0x37b   :  { %v318_v61 = vmul.f32 0.5, %v313_v60 }
 0x37c   :  { %v515_v62 = vpop.f32.mrf.mxu1 }
 0x37d   :  { %546 = vtanh.f32 %v318_v61 }
 0x37e   :  { %v442_v13 = vpop.f32.mrf.mxu1 }
 0x380   :  { %v528_v14 = vpop.f32.mrf.mxu1 }
 0x382   :  { %v445_v15 = vpop.f32.mrf.mxu1 }
 0x384   :  { %v529_v16 = vpop.f32.mrf.mxu1 }
 0x386   :  { %v545_v63 = vpop.eup %544 }
 0x387   :  { %v321_v1 = vadd.f32 1.0, %v545_v63 }
 0x389   :  { %v323_v2 = vmul.f32 0.5, %v321_v1 }
 0x38a   :  { %v547_v3 = vpop.eup %546 }
 0x38b   :  { %v322_v4 = vadd.f32 1.0, %v547_v3  ;;  %v325_v5 = vmul.f32 %v323_v2, %v310_v57 }
 0x38d   :  { %v324_v6 = vmul.f32 0.5, %v322_v4  ;;  %v327_v10 = vmul.f32 1.6666666, %v325_v5 }
 0x38f   :  { %v326_v9 = vmul.f32 %v324_v6, %v313_v60 }
 0x391   :  { %v328_v11 = vmul.f32 1.6666666, %v326_v9 }
 0x393   :  { %v333_v12 = vpack.c.bf16 %v328_v11, %v327_v10 }
 0x395   :  { %521 = vmatmul.mubr.msk.bf16.vlgmr.msra.gmra.mxu0 %vm53_vm1, %v333_v12 }
 0x455   :  { %v373_v17 = vpop.f32.mrf.mxu0 }
 0x456   :  { %v380_v18 = vmul.f32 0.5, %v373_v17 }
 0x457   :  { %v522_v19 = vpop.f32.mrf.mxu0 }
 0x458   :  { %548 = vtanh.f32 %v380_v18 }
 0x459   :  { %v376_v20 = vpop.f32.mrf.mxu0 }
 0x45a   :  { %v381_v21 = vmul.f32 0.5, %v376_v20 }
 0x45b   :  { %v523_v22 = vpop.f32.mrf.mxu0 }
 0x45c   :  { %550 = vtanh.f32 %v381_v21 }
 0x465   :  { %v549_v23 = vpop.eup %548 }
 0x466   :  { %v384_v24 = vadd.f32 1.0, %v549_v23 }
 0x468   :  { %v386_v25 = vmul.f32 0.5, %v384_v24 }
 0x469   :  { %v551_v26 = vpop.eup %550 }
 0x46a   :  { %v388_v27 = vmul.f32 %v386_v25, %v373_v17  ;;  %v385_v28 = vadd.f32 1.0, %v551_v26 }
 0x46c   :  { %v390_v29 = vmul.f32 1.6666666, %v388_v27  ;;  %v387_v30 = vmul.f32 0.5, %v385_v28 }
 0x46e   :  { %v389_v31 = vmul.f32 %v387_v30, %v376_v20  ;;  %v392_v32 = vadd.f32 %v390_v29, %v741_v45 }
 0x470   :  { %v391_v33 = vmul.f32 1.6666666, %v389_v31  ;;  %v394_v34 = vmul.f32 0.70710677, %v392_v32 }
 0x472   :  { %396 = vst.msk [vmem:[%s806_s12] sm:$0xff] %vm53_vm1, %v394_v34  ;;  %v449_v35 = vmul.f32 %v442_v13, %v394_v34  ;;  %v393_v36 = vadd.f32 %v391_v33, %v743_v46 }
 0x474   :  { %451 = vst.msk [vmem:[%s807_s13] sm:$0xff] %vm53_vm1, %v449_v35  ;;  %v395_v37 = vmul.f32 0.70710677, %v393_v36 }
 0x476   :  { %397 = vst.msk [vmem:[%s806_s12 + $0x8] sm:$0xff] %vm53_vm1, %v395_v37  ;;  %v450_v38 = vmul.f32 %v445_v15, %v395_v37 }
 0x478   :  { %452 = vst.msk [vmem:[%s807_s13 + $0x8] sm:$0xff] %vm53_vm1, %v450_v38 }

// kernel: interaction_block_pallas.14
= control target key start
LH: loop header
LB: loop body
LE: loop exit
PB: predicated region body
PF: predicated region fallthrough
CT: control target
= control target key end

     0   :  { %v234_v0 = vmov 0.0   ;;  %vm235_vm0 = vmmov 0   ;;  %vm29_vm1 = vcmask 261120   ;;  %vm83_vm2 = vcmask 130048   ;;  %s305_s2 = inlined_call_operand.vmem [shape: f32[32,16], index: 2, kind: input, shape index: {}]   ;;  %s306_s0 = inlined_call_operand.vmem [shape: f32[8,32], index: 0, kind: input, shape index: {}]   ;;  %s307_s3 = inlined_call_operand.vmem [shape: f32[16,16], index: 3, kind: input, shape index: {}]   ;;  %s308_s4 = inlined_call_operand.vmem [shape: f32[16,16], index: 4, kind: input, shape index: {}]   ;;  %s309_s1 = inlined_call_operand.vmem [shape: f32[8,16], index: 1, kind: input, shape index: {}]   ;;  %s310_s5 = inlined_call_operand.vmem [shape: f32[8,16], index: 5, kind: output, shape index: {}]  }
   0x1   :  { %206 = vmatprep.subr.bf16.mxu0 %v234_v0  ;;  %v24_v1 = vld [vmem:[%s305_s2 + $0x10] sm:$0xff]  ;;  %v25_v2 = vld [vmem:[%s305_s2 + $0x18] sm:$0xff]  ;;  %v22_v3 = vld [vmem:[%s305_s2] sm:$0xff]  ;;  %210 = vmatprep.mubr.msk.bf16.mxu0 %vm235_vm0, %v234_v0 }
   0x2   :  { %v28_v4 = vpack.c.bf16 %v25_v2, %v24_v1  ;;  %v23_v5 = vld [vmem:[%s305_s2 + $0x8] sm:$0xff]  ;;  %214 = vmatprep.subr.bf16.mxu1 %v234_v0  ;;  %216 = vmatprep.mubr.msk.bf16.mxu1 %vm235_vm0, %v234_v0  ;;  %v21_v7 = vld [vmem:[%s306_s0] sm:$0xff] }
   0x3   :  { %v27_v6 = vpack.c.bf16 %v23_v5, %v22_v3  ;;  %v26_v8 = vpack.c.bf16 %v21_v7, %v21_v7  ;;  %v79_v9 = vld [vmem:[%s307_s3] sm:$0xff]  ;;  %v80_v10 = vld [vmem:[%s307_s3 + $0x8] sm:$0xff] }
   0x4   :  { %207 = vmatpush3.bf16.msra.mxu0 %v28_v4  ;;  %v82_v11 = vpack.c.bf16 %v80_v10, %v79_v9  ;;  %v133_v23 = vld [vmem:[%s308_s4] sm:$0xff]  ;;  %v134_v24 = vld [vmem:[%s308_s4 + $0x8] sm:$0xff] }
   0x5   :  { %208 = vmatprep.subr.bf16.mxu0 %v234_v0  ;;  %v136_v25 = vpack.c.bf16 %v134_v24, %v133_v23  ;;  %v188_v48 = vld [vmem:[%s309_s1] sm:$0xff] }
   0x6   :  { %215 = vmatpush3.bf16.msra.mxu1 %v82_v11 }
   0x7   :  { %220 = vmatprep.subr.bf16.mxu1 %v234_v0 }
   0x8   :  { %209 = vmatpush3.bf16.msra.mxu0 %v27_v6 }
   0xb   :  { %211 = vmatmul.mubr.msk.bf16.vlgmr.msra.gmra.mxu0 %vm29_vm1, %v26_v8 }
  0xcb   :  { %v67_v12 = vpop.f32.mrf.mxu0 }
  0xcc   :  { %v73_v13 = vmul.f32 0.5, %v67_v12 }
  0xcd   :  { %v212_v14 = vpop.f32.mrf.mxu0 }
  0xce   :  { %228 = vtanh.f32 %v73_v13 }
  0xcf   :  { %v70_v15 = vpop.f32.mrf.mxu0 }
  0xd1   :  { %v213_v16 = vpop.f32.mrf.mxu0 }
  0xdb   :  { %v229_v17 = vpop.eup %228 }
  0xdc   :  { %v75_v18 = vadd.f32 1.0, %v229_v17 }
  0xde   :  { %v76_v19 = vmul.f32 0.5, %v75_v18 }
  0xe0   :  { %v77_v20 = vmul.f32 %v76_v19, %v67_v12 }
  0xe2   :  { %v78_v21 = vmul.f32 1.6666666, %v77_v20 }
  0xe4   :  { %v81_v22 = vpack.c.bf16 %v78_v21, %v78_v21 }
  0xe6   :  { %217 = vmatmul.mubr.msk.bf16.vlgmr.msra.gmra.mxu1 %vm83_vm2, %v81_v22 }
  0xe7   :  { %222 = vmatprep.mubr.msk.bf16.mxu1 %vm235_vm0, %v234_v0  ;;  %221 = vmatpush3.bf16.msra.mxu1 %v136_v25 }
 0x1a6   :  { %v121_v26 = vpop.f32.mrf.mxu1 }
 0x1a7   :  { %v127_v27 = vmul.f32 0.5, %v121_v26 }
 0x1a8   :  { %v218_v28 = vpop.f32.mrf.mxu1 }
 0x1a9   :  { %230 = vtanh.f32 %v127_v27 }
 0x1aa   :  { %v124_v29 = vpop.f32.mrf.mxu1 }
 0x1ac   :  { %v219_v30 = vpop.f32.mrf.mxu1 }
 0x1b6   :  { %v231_v31 = vpop.eup %230 }
 0x1b7   :  { %v129_v32 = vadd.f32 1.0, %v231_v31 }
 0x1b9   :  { %v130_v33 = vmul.f32 0.5, %v129_v32 }
 0x1bb   :  { %v131_v34 = vmul.f32 %v130_v33, %v121_v26 }
 0x1bd   :  { %v132_v35 = vmul.f32 1.6666666, %v131_v34 }
 0x1bf   :  { %v135_v36 = vpack.c.bf16 %v132_v35, %v132_v35 }
 0x1c1   :  { %223 = vmatmul.mubr.msk.bf16.vlgmr.msra.gmra.mxu1 %vm83_vm2, %v135_v36 }
 0x281   :  { %v174_v37 = vpop.f32.mrf.mxu1 }
 0x282   :  { %v180_v38 = vmul.f32 0.5, %v174_v37 }
 0x283   :  { %v224_v39 = vpop.f32.mrf.mxu1 }
 0x284   :  { %232 = vtanh.f32 %v180_v38 }
 0x285   :  { %v177_v40 = vpop.f32.mrf.mxu1 }
 0x287   :  { %v225_v41 = vpop.f32.mrf.mxu1 }
 0x291   :  { %v233_v42 = vpop.eup %232 }
 0x292   :  { %v182_v43 = vadd.f32 1.0, %v233_v42 }
 0x294   :  { %v183_v44 = vmul.f32 0.5, %v182_v43 }
 0x296   :  { %v184_v45 = vmul.f32 %v183_v44, %v174_v37 }
 0x298   :  { %v185_v46 = vmul.f32 1.6666666, %v184_v45 }
 0x29a   :  { %v186_v47 = vadd.f32 %v185_v46, %v78_v21 }
 0x29c   :  { %v187_v49 = vmul.f32 0.70710677, %v186_v47 }
 0x29e   :  { %v189_v50 = vadd.f32 %v188_v48, %v187_v49 }
 0x2a0   :  { %v190_v51 = vmul.f32 0.70710677, %v189_v50 }
 0x2a2   :  { %191 = vst.msk [vmem:[%s310_s5] sm:$0xff] %vm83_vm2, %v190_v51 }

// kernel: interaction_block_pallas.10
= control target key start
LH: loop header
LB: loop body
LE: loop exit
PB: predicated region body
PF: predicated region fallthrough
CT: control target
= control target key end

     0   :  { %vm49_vm0 = vcmask 130048   ;;  %s3717_s17 = smov 112   ;;  %s3718_s18 = smov 120   ;;  %vm131_vm1 = vcmask 64512   ;;  %vm3733_vm2 = vmmov 0   ;;  %vm3223_vm3 = vcmask 261120   ;;  %s4181_s1 = inlined_call_operand.vmem [shape: f32[16,32], index: 1, kind: input, shape index: {}]   ;;  %s4182_s2 = inlined_call_operand.vmem [shape: f32[16,16], index: 2, kind: input, shape index: {}]   ;;  %s4183_s3 = inlined_call_operand.vmem [shape: f32[16,128], index: 3, kind: input, shape index: {}, may-alias: {3,5}]   ;;  %s4184_s4 = inlined_call_operand.vmem [shape: f32[8,128], index: 4, kind: input, shape index: {}, may-alias: {4,6}]   ;;  %s4185_s0 = inlined_call_operand.vmem [shape: f32[16,256], index: 0, kind: input, shape index: {}]   ;;  %s4186_s5 = inlined_call_operand.vmem [shape: f32[16,128], index: 5, kind: input, shape index: {}, may-alias: {3,5}]   ;;  %s4187_s6 = inlined_call_operand.vmem [shape: f32[8,128], index: 6, kind: input, shape index: {}, may-alias: {4,6}]   ;;  %s4188_s7 = inlined_call_operand.vmem [shape: f32[128,16], index: 7, kind: input, shape index: {}]   ;;  %s4189_s8 = inlined_call_operand.vmem [shape: f32[16,64], index: 8, kind: input, shape index: {}]   ;;  %s4190_s9 = inlined_call_operand.vmem [shape: f32[16,32], index: 9, kind: output, shape index: {0}]   ;;  %s4191_s10 = inlined_call_operand.vmem [shape: f32[16,32], index: 10, kind: output, shape index: {1}]  }
   0x1   :  { %v39_v0 = vld [vmem:[%s4181_s1] sm:$0xff]  ;;  %v40_v2 = vld [vmem:[%s4181_s1 + $0x8] sm:$0xff]  ;;  %v37_v8 = vld [vmem:[%s4185_s0 + $0x10] sm:$0xff]  ;;  %s3719_s29 = smov 96   ;;  %s3720_s30 = smov 80  }
   0x2   :  { %v41_v1 = vld [vmem:[%s4182_s2] sm:$0xff]  ;;  %215 = vrot.lane.b32.xlu0 %v39_v0, %s3717_s17  ;;  %v44_v3 = vld [vmem:[%s4183_s3 + $0x8] sm:$0xff]  ;;  %3458 = vmatprep.mubr.msk.f32.mxu0 %vm49_vm0, %v39_v0  ;;  %s3721_s11 = smov 64   ;;  %s3722_s12 = smov 48   ;;  %v3917_v31 = vld [vmem:[%s4185_s0 + $0x18] sm:$0xff] }
   0x3   :  { %298 = vrot.lane.b32.xlu1 %v41_v1, %s3718_s18  ;;  %v42_v4 = vld [vmem:[%s4182_s2 + $0x8] sm:$0xff]  ;;  %3454 = vmatprep.subr.mxu0 %v44_v3  ;;  %v43_v5 = vld [vmem:[%s4183_s3] sm:$0xff]  ;;  %s3723_s13 = smov 32   ;;  %s3724_s14 = smov 16  }
   0x4   :  { %v45_v6 = vld [vmem:[%s4184_s4] sm:$0xff]  ;;  %3455 = vmatpush3.msra.mxu0 %v44_v3  ;;  %3463 = vmatprep.mubr.msk.f32.mxu1 %vm131_vm1, %v41_v1  ;;  %v3845_v13 = vld [vmem:[%s4186_s5 + $0x8] sm:$0xff]  ;;  %s3727_s25 = smov 72   ;;  %s3728_s26 = smov 56  }
   0x5   :  { %3461 = vmatprep.subr.mxu1 %v45_v6  ;;  %3456 = vmatprep.subr.mxu0 %v43_v5  ;;  %v35_v7 = vld [vmem:[%s4185_s0] sm:$0xff]  ;;  %v3907_v30 = vld [vmem:[%s4185_s0 + $0x8] sm:$0xff]  ;;  %s3725_s0 = smov 104   ;;  %s3729_s27 = smov 40  }
   0x6   :  { %3462 = vmatpush3.msra.mxu1 %v45_v6  ;;  %217 = vrot.lane.b32.xlu0 %v40_v2, %s3717_s17  ;;  %v3853_v14 = vld [vmem:[%s4186_s5] sm:$0xff]  ;;  %s3731_s28 = smov 8  }
   0x7   :  { %300 = vrot.lane.b32.xlu1 %v42_v4, %s3718_s18  ;;  %3457 = vmatpush3.msra.mxu0 %v43_v5  ;;  %v3865_v15 = vld [vmem:[%s4187_s6] sm:$0xff] }
   0x8   :  { %3459 = vmatmul.mubr.msk.f32.vlgmr.msra.gmra.mxu0 %vm49_vm0, %v40_v2  ;;  %3464 = vmatmul.mubr.msk.f32.vlgmr.msra.gmra.mxu1 %vm131_vm1, %v42_v4 }
   0x9   :  { %3466 = vmatprep.subr.mxu0 %v44_v3  ;;  %3502 = vmatprep.subr.mxu1 %v3845_v13 }
   0xa   :  { %3467 = vmatpush3.msra.mxu0 %v44_v3  ;;  %549 = vrot.lane.b32.xlu0 %v35_v7, %s3717_s17 }
   0xb   :  { %3468 = vmatprep.subr.mxu0 %v43_v5  ;;  %551 = vrot.lane.b32.xlu1 %v37_v8, %s3717_s17 }
   0xc   :  { %3469 = vmatpush3.msra.mxu0 %v43_v5  ;;  %3503 = vmatpush3.msra.mxu1 %v3845_v13 }
   0xd   :  { %3473 = vmatprep.subr.mxu0 %v45_v6  ;;  %3504 = vmatprep.subr.mxu1 %v3853_v14 }
   0xe   :  { %719 = vrot.lane.b32.xlu0 %v35_v7, %s3719_s29  ;;  %3505 = vmatpush3.msra.mxu1 %v3853_v14 }
   0xf   :  { %3514 = vmatprep.subr.mxu1 %v3845_v13 }
  0x12   :  { %721 = vrot.lane.b32.xlu0 %v37_v8, %s3719_s29 }
  0x16   :  { %889 = vrot.lane.b32.xlu0 %v35_v7, %s3720_s30 }
  0x1a   :  { %891 = vrot.lane.b32.xlu0 %v37_v8, %s3720_s30 }
  0x1e   :  { %1059 = vrot.lane.b32.xlu0 %v35_v7, %s3721_s11 }
  0x22   :  { %1061 = vrot.lane.b32.xlu0 %v37_v8, %s3721_s11 }
  0x26   :  { %1229 = vrot.lane.b32.xlu0 %v35_v7, %s3722_s12 }
  0x2a   :  { %1231 = vrot.lane.b32.xlu0 %v37_v8, %s3722_s12 }
  0x2e   :  { %1399 = vrot.lane.b32.xlu0 %v35_v7, %s3723_s13 }
  0x32   :  { %1401 = vrot.lane.b32.xlu0 %v37_v8, %s3723_s13 }
  0x36   :  { %1569 = vrot.lane.b32.xlu0 %v35_v7, %s3724_s14 }
  0x3a   :  { %1571 = vrot.lane.b32.xlu0 %v37_v8, %s3724_s14 }
  0x74   :  { %v216_v9 = vpop.permute.xlu0 %215 }
  0x75   :  { %v299_v10 = vpop.permute.xlu1 %298  ;;  %3470 = vmatprep.mubr.msk.f32.mxu0 %vm49_vm0, %v216_v9 }
  0x78   :  { %v218_v11 = vpop.permute.xlu0 %217 }
  0x79   :  { %3471 = vmatmul.mubr.msk.f32.vlgmr.msra.gmra.mxu0 %vm49_vm0, %v218_v11  ;;  %v301_v12 = vpop.permute.xlu1 %300 }
  0x7a   :  { %3474 = vmatpush3.msra.mxu0 %v45_v6  ;;  %3475 = vmatprep.mubr.msk.f32.mxu0 %vm131_vm1, %v299_v10 }
  0x7b   :  { %3478 = vmatprep.subr.mxu0 %v3845_v13 }
  0x7c   :  { %v3871_v16 = vpop.permute.xlu0 %549 }
  0x7d   :  { %3476 = vmatmul.mubr.msk.f32.vlgmr.msra.gmra.mxu0 %vm131_vm1, %v301_v12  ;;  %v552_v45 = vpop.permute.xlu1 %551 }
  0x7e   :  { %3482 = vmatprep.mubr.msk.f32.mxu0 %vm49_vm0, %v35_v7  ;;  %3479 = vmatpush3.msra.mxu0 %v3845_v13 }
  0x7f   :  { %3480 = vmatprep.subr.mxu0 %v3853_v14 }
  0x80   :  { %3481 = vmatpush3.msra.mxu0 %v3853_v14  ;;  %v720_v17 = vpop.permute.xlu0 %719 }
  0x81   :  { %3483 = vmatmul.mubr.msk.f32.vlgmr.msra.gmra.mxu0 %vm49_vm0, %v37_v8  ;;  %3485 = vmatprep.subr.mxu0 %v3865_v15 }
  0x82   :  { %3486 = vmatpush3.msra.mxu0 %v3865_v15  ;;  %3506 = vmatprep.mubr.msk.f32.mxu1 %vm49_vm0, %v720_v17 }
  0x83   :  { %3490 = vmatprep.subr.mxu0 %v3845_v13 }
  0x84   :  { %v722_v18 = vpop.permute.xlu0 %721 }
  0x85   :  { %3507 = vmatmul.mubr.msk.f32.vlgmr.msra.gmra.mxu1 %vm49_vm0, %v722_v18 }
  0x86   :  { %3515 = vmatpush3.msra.mxu1 %v3845_v13 }
  0x87   :  { %3516 = vmatprep.subr.mxu1 %v3853_v14 }
  0x88   :  { %v890_v19 = vpop.permute.xlu0 %889  ;;  %3517 = vmatpush3.msra.mxu1 %v3853_v14 }
  0x89   :  { %3518 = vmatprep.mubr.msk.f32.mxu1 %vm49_vm0, %v890_v19  ;;  %3526 = vmatprep.subr.mxu1 %v3845_v13 }
  0x8c   :  { %v892_v20 = vpop.permute.xlu0 %891 }
  0x8d   :  { %3519 = vmatmul.mubr.msk.f32.vlgmr.msra.gmra.mxu1 %vm49_vm0, %v892_v20 }
  0x8e   :  { %3527 = vmatpush3.msra.mxu1 %v3845_v13 }
  0x8f   :  { %3528 = vmatprep.subr.mxu1 %v3853_v14 }
  0x90   :  { %v1060_v21 = vpop.permute.xlu0 %1059  ;;  %3529 = vmatpush3.msra.mxu1 %v3853_v14 }
  0x91   :  { %3530 = vmatprep.mubr.msk.f32.mxu1 %vm49_vm0, %v1060_v21  ;;  %3538 = vmatprep.subr.mxu1 %v3845_v13 }
  0x94   :  { %v1062_v22 = vpop.permute.xlu0 %1061 }
  0x95   :  { %3531 = vmatmul.mubr.msk.f32.vlgmr.msra.gmra.mxu1 %vm49_vm0, %v1062_v22 }
  0x96   :  { %3539 = vmatpush3.msra.mxu1 %v3845_v13 }
  0x97   :  { %3540 = vmatprep.subr.mxu1 %v3853_v14 }
  0x98   :  { %v1230_v23 = vpop.permute.xlu0 %1229  ;;  %3541 = vmatpush3.msra.mxu1 %v3853_v14 }
  0x99   :  { %3542 = vmatprep.mubr.msk.f32.mxu1 %vm49_vm0, %v1230_v23  ;;  %3550 = vmatprep.subr.mxu1 %v3845_v13 }
  0x9c   :  { %v1232_v24 = vpop.permute.xlu0 %1231 }
  0x9d   :  { %3543 = vmatmul.mubr.msk.f32.vlgmr.msra.gmra.mxu1 %vm49_vm0, %v1232_v24 }
  0x9e   :  { %3551 = vmatpush3.msra.mxu1 %v3845_v13 }
  0x9f   :  { %3552 = vmatprep.subr.mxu1 %v3853_v14 }
  0xa0   :  { %v1400_v25 = vpop.permute.xlu0 %1399  ;;  %3553 = vmatpush3.msra.mxu1 %v3853_v14 }
  0xa1   :  { %3554 = vmatprep.mubr.msk.f32.mxu1 %vm49_vm0, %v1400_v25  ;;  %3562 = vmatprep.subr.mxu1 %v3845_v13 }
  0xa4   :  { %v1402_v26 = vpop.permute.xlu0 %1401 }
  0xa5   :  { %3555 = vmatmul.mubr.msk.f32.vlgmr.msra.gmra.mxu1 %vm49_vm0, %v1402_v26 }
  0xa6   :  { %3563 = vmatpush3.msra.mxu1 %v3845_v13 }
  0xa7   :  { %3564 = vmatprep.subr.mxu1 %v3853_v14 }
  0xa8   :  { %v1570_v27 = vpop.permute.xlu0 %1569  ;;  %3565 = vmatpush3.msra.mxu1 %v3853_v14 }
  0xa9   :  { %3566 = vmatprep.mubr.msk.f32.mxu1 %vm49_vm0, %v1570_v27  ;;  %3574 = vmatprep.subr.mxu1 %v3845_v13  ;;  %v3111_v27 = vld [vmem:[%s4188_s7 + $0x70] sm:$0xff] }
  0xac   :  { %v1572_v28 = vpop.permute.xlu0 %1571 }
  0xad   :  { %3567 = vmatmul.mubr.msk.f32.vlgmr.msra.gmra.mxu1 %vm49_vm0, %v1572_v28  ;;  %v3112_v28 = vld [vmem:[%s4188_s7 + $0x78] sm:$0xff] }
  0xae   :  { %3575 = vmatpush3.msra.mxu1 %v3845_v13  ;;  %3578 = vmatprep.mubr.msk.f32.mxu1 %vm49_vm0, %v3907_v30 }
  0xaf   :  { %3576 = vmatprep.subr.mxu1 %v3853_v14 }
  0xb0   :  { %3577 = vmatpush3.msra.mxu1 %v3853_v14 }
  0xb1   :  { %3579 = vmatmul.mubr.msk.f32.vlgmr.msra.gmra.mxu1 %vm49_vm0, %v3917_v31  ;;  %3586 = vmatprep.subr.mxu1 %v3845_v13 }
  0xb2   :  { %3587 = vmatpush3.msra.mxu1 %v3845_v13 }
  0xb3   :  { %3588 = vmatprep.subr.mxu1 %v3853_v14 }
  0xb4   :  { %3589 = vmatpush3.msra.mxu1 %v3853_v14 }
  0xb5   :  { %3598 = vmatprep.subr.mxu1 %v3845_v13 }
  0xc8   :  { %v3460_v29 = vpop.f32.mrf.mxu0  ;;  %v3465_v33 = vpop.f32.mrf.mxu1 }
  0xc9   :  { %v214_v38 = vmul.f32 %v3465_v33, %v3460_v29  ;;  %v3121_v29 = vpack.c.bf16 %v3112_v28, %v3111_v27  ;;  %v3107_v33 = vld [vmem:[%s4188_s7 + $0x50] sm:$0xff] }
  0xca   :  { %v122_v32 = vpop.f32.mrf.mxu0  ;;  %v204_v36 = vpop.f32.mrf.mxu1 }
  0xcb   :  { %v213_v41 = vmul.f32 %v204_v36, %v122_v32  ;;  %v3105_v36 = vld [vmem:[%s4188_s7 + $0x40] sm:$0xff] }
 0x139   :  { %v3472_v34 = vpop.f32.mrf.mxu0 }
 0x13b   :  { %v289_v35 = vpop.f32.mrf.mxu0 }
 0x13d   :  { %v3477_v37 = vpop.f32.mrf.mxu0 }
 0x13e   :  { %v382_v39 = vmul.f32 %v3477_v37, %v3472_v34  ;;  %v3108_v34 = vld [vmem:[%s4188_s7 + $0x58] sm:$0xff]  ;;  %v3106_v37 = vld [vmem:[%s4188_s7 + $0x48] sm:$0xff] }
 0x13f   :  { %v372_v40 = vpop.f32.mrf.mxu0 }
 0x140   :  { %v3927_v42 = vadd.f32 %v382_v39, %v214_v38  ;;  %v381_v43 = vmul.f32 %v372_v40, %v289_v35  ;;  %v3119_v35 = vpack.c.bf16 %v3108_v34, %v3107_v33  ;;  %v3118_v38 = vpack.c.bf16 %v3106_v37, %v3105_v36  ;;  %v3103_v39 = vld [vmem:[%s4188_s7 + $0x30] sm:$0xff]  ;;  %v3104_v40 = vld [vmem:[%s4188_s7 + $0x38] sm:$0xff] }
 0x142   :  { %v383_v44 = vadd.f32 %v381_v43, %v213_v41  ;;  %634 = vrot.lane.b32.xlu1 %v3927_v42, %s3718_s18  ;;  %v3117_v41 = vpack.c.bf16 %v3104_v40, %v3103_v39  ;;  %v3102_v43 = vld [vmem:[%s4188_s7 + $0x28] sm:$0xff] }
 0x144   :  { %632 = vrot.lane.b32.xlu0 %v383_v44, %s3718_s18  ;;  %3487 = vmatprep.mubr.msk.f32.mxu0 %vm131_vm1, %v383_v44  ;;  %s3726_s18 = smov 88  }
 0x145   :  { %3488 = vmatmul.mubr.msk.f32.vlgmr.msra.gmra.mxu0 %vm131_vm1, %v3927_v42 }
 0x146   :  { %804 = vrot.lane.b32.xlu1 %v3927_v42, %s3717_s17  ;;  %3491 = vmatpush3.msra.mxu0 %v3845_v13 }
 0x147   :  { %3492 = vmatprep.subr.mxu0 %v3853_v14  ;;  %3494 = vmatprep.mubr.msk.f32.mxu0 %vm49_vm0, %v3871_v16 }
 0x148   :  { %1907 = vrot.lane.b32.xlu0 %v3907_v30, %s3717_s17  ;;  %3493 = vmatpush3.msra.mxu0 %v3853_v14 }
 0x149   :  { %3495 = vmatmul.mubr.msk.f32.vlgmr.msra.gmra.mxu0 %vm49_vm0, %v552_v45  ;;  %3497 = vmatprep.subr.mxu0 %v3865_v15  ;;  %v3099_v45 = vld [vmem:[%s4188_s7 + $0x10] sm:$0xff] }
 0x14a   :  { %974 = vrot.lane.b32.xlu1 %v3927_v42, %s3725_s0  ;;  %3498 = vmatpush3.msra.mxu0 %v3865_v15 }
 0x14b   :  { %3509 = vmatprep.subr.mxu0 %v3865_v15 }
 0x14c   :  { %1909 = vrot.lane.b32.xlu0 %v3917_v31, %s3717_s17 }
 0x14e   :  { %1144 = vrot.lane.b32.xlu1 %v3927_v42, %s3719_s29 }
 0x150   :  { %2077 = vrot.lane.b32.xlu0 %v3907_v30, %s3719_s29 }
 0x152   :  { %1314 = vrot.lane.b32.xlu1 %v3927_v42, %s3726_s18 }
 0x154   :  { %2079 = vrot.lane.b32.xlu0 %v3917_v31, %s3719_s29 }
 0x156   :  { %1484 = vrot.lane.b32.xlu1 %v3927_v42, %s3720_s30 }
 0x158   :  { %2247 = vrot.lane.b32.xlu0 %v3907_v30, %s3720_s30 }
 0x15a   :  { %1654 = vrot.lane.b32.xlu1 %v3927_v42, %s3727_s25 }
 0x15c   :  { %2249 = vrot.lane.b32.xlu0 %v3917_v31, %s3720_s30 }
 0x15e   :  { %1822 = vrot.lane.b32.xlu1 %v3927_v42, %s3721_s11 }
 0x160   :  { %1820 = vrot.lane.b32.xlu0 %v383_v44, %s3721_s11 }
 0x162   :  { %1992 = vrot.lane.b32.xlu1 %v3927_v42, %s3728_s26 }
 0x164   :  { %2417 = vrot.lane.b32.xlu0 %v3907_v30, %s3721_s11 }
 0x166   :  { %2162 = vrot.lane.b32.xlu1 %v3927_v42, %s3722_s12 }
 0x168   :  { %2419 = vrot.lane.b32.xlu0 %v3917_v31, %s3721_s11 }
 0x16a   :  { %2332 = vrot.lane.b32.xlu1 %v3927_v42, %s3729_s27 }
 0x16c   :  { %2587 = vrot.lane.b32.xlu0 %v3907_v30, %s3722_s12 }
 0x16e   :  { %802 = vrot.lane.b32.xlu1 %v383_v44, %s3717_s17  ;;  %s3730_s17 = smov 24  }
 0x170   :  { %2589 = vrot.lane.b32.xlu0 %v3917_v31, %s3722_s12 }
 0x172   :  { %972 = vrot.lane.b32.xlu1 %v383_v44, %s3725_s0 }
 0x174   :  { %2757 = vrot.lane.b32.xlu0 %v3907_v30, %s3723_s13 }
 0x176   :  { %1142 = vrot.lane.b32.xlu1 %v383_v44, %s3719_s29 }
 0x178   :  { %2759 = vrot.lane.b32.xlu0 %v3917_v31, %s3723_s13 }
 0x17a   :  { %1312 = vrot.lane.b32.xlu1 %v383_v44, %s3726_s18 }
 0x17c   :  { %2927 = vrot.lane.b32.xlu0 %v3907_v30, %s3724_s14  ;;  %v3732_v30 = vmov 0.0  }
 0x17e   :  { %1482 = vrot.lane.b32.xlu1 %v383_v44, %s3720_s30 }
 0x180   :  { %2929 = vrot.lane.b32.xlu0 %v3917_v31, %s3724_s14  ;;  %v3110_v31 = vld [vmem:[%s4188_s7 + $0x68] sm:$0xff] }
 0x182   :  { %1652 = vrot.lane.b32.xlu1 %v383_v44, %s3727_s25 }
 0x186   :  { %2502 = vrot.lane.b32.xlu1 %v3927_v42, %s3723_s13 }
 0x18a   :  { %2672 = vrot.lane.b32.xlu1 %v3927_v42, %s3730_s17 }
 0x18e   :  { %2842 = vrot.lane.b32.xlu1 %v3927_v42, %s3724_s14 }
 0x192   :  { %1990 = vrot.lane.b32.xlu1 %v383_v44, %s3728_s26 }
 0x196   :  { %2160 = vrot.lane.b32.xlu1 %v383_v44, %s3722_s12 }
 0x19a   :  { %2330 = vrot.lane.b32.xlu1 %v383_v44, %s3729_s27 }
 0x19e   :  { %2500 = vrot.lane.b32.xlu1 %v383_v44, %s3723_s13 }
 0x1a2   :  { %2670 = vrot.lane.b32.xlu1 %v383_v44, %s3730_s17 }
 0x1a6   :  { %2840 = vrot.lane.b32.xlu1 %v383_v44, %s3724_s14 }
 0x1aa   :  { %3010 = vrot.lane.b32.xlu1 %v383_v44, %s3731_s28 }
 0x1ae   :  { %3012 = vrot.lane.b32.xlu1 %v3927_v42, %s3731_s28  ;;  %v3101_v42 = vld [vmem:[%s4188_s7 + $0x20] sm:$0xff] }
 0x1af   :  { %v3116_v44 = vpack.c.bf16 %v3102_v43, %v3101_v42 }
 0x1b4   :  { %v635_v46 = vpop.permute.xlu1 %634 }
 0x1b6   :  { %v633_v47 = vpop.permute.xlu0 %632 }
 0x1b7   :  { %3499 = vmatprep.mubr.msk.f32.mxu0 %vm131_vm1, %v633_v47 }
 0x1b8   :  { %v805_v48 = vpop.permute.xlu1 %804  ;;  %3500 = vmatmul.mubr.msk.f32.vlgmr.msra.gmra.mxu0 %vm131_vm1, %v635_v46  ;;  %v3100_v46 = vld [vmem:[%s4188_s7 + $0x18] sm:$0xff] }
 0x1b9   :  { %3510 = vmatpush3.msra.mxu0 %v3865_v15  ;;  %v3115_v47 = vpack.c.bf16 %v3100_v46, %v3099_v45 }
 0x1ba   :  { %v1908_v49 = vpop.permute.xlu0 %1907  ;;  %3521 = vmatprep.subr.mxu0 %v3865_v15 }
 0x1bb   :  { %3590 = vmatprep.mubr.msk.f32.mxu1 %vm49_vm0, %v1908_v49  ;;  %v3098_v49 = vld [vmem:[%s4188_s7 + $0x8] sm:$0xff] }
 0x1bc   :  { %v975_v50 = vpop.permute.xlu1 %974 }
 0x1be   :  { %v1910_v51 = vpop.permute.xlu0 %1909 }
 0x1bf   :  { %3591 = vmatmul.mubr.msk.f32.vlgmr.msra.gmra.mxu1 %vm49_vm0, %v1910_v51  ;;  %v3484_v51 = vpop.f32.mrf.mxu0 }
 0x1c0   :  { %v1145_v52 = vpop.permute.xlu1 %1144  ;;  %3599 = vmatpush3.msra.mxu1 %v3845_v13 }
 0x1c1   :  { %3600 = vmatprep.subr.mxu1 %v3853_v14 }
 0x1c2   :  { %v2078_v53 = vpop.permute.xlu0 %2077  ;;  %3601 = vmatpush3.msra.mxu1 %v3853_v14 }
 0x1c3   :  { %3602 = vmatprep.mubr.msk.f32.mxu1 %vm49_vm0, %v2078_v53  ;;  %3610 = vmatprep.subr.mxu1 %v3845_v13  ;;  %v3508_v53 = vpop.f32.mrf.mxu1 }
 0x1c4   :  { %v1315_v54 = vpop.permute.xlu1 %1314 }
 0x1c6   :  { %v2080_v55 = vpop.permute.xlu0 %2079 }
 0x1c7   :  { %3603 = vmatmul.mubr.msk.f32.vlgmr.msra.gmra.mxu1 %vm49_vm0, %v2080_v55  ;;  %v793_v55 = vpop.f32.mrf.mxu1 }
 0x1c8   :  { %v4012_v56 = vpop.permute.xlu1 %1484  ;;  %3611 = vmatpush3.msra.mxu1 %v3845_v13 }
 0x1c9   :  { %3612 = vmatprep.subr.mxu1 %v3853_v14 }
 0x1ca   :  { %v2248_v57 = vpop.permute.xlu0 %2247  ;;  %3613 = vmatpush3.msra.mxu1 %v3853_v14 }
 0x1cb   :  { %3614 = vmatprep.mubr.msk.f32.mxu1 %vm49_vm0, %v2248_v57  ;;  %3622 = vmatprep.subr.mxu1 %v3845_v13  ;;  %v3520_v57 = vpop.f32.mrf.mxu1 }
 0x1cc   :  { %v4019_v58 = vpop.permute.xlu1 %1654 }
 0x1ce   :  { %v2250_v59 = vpop.permute.xlu0 %2249 }
 0x1cf   :  { %3615 = vmatmul.mubr.msk.f32.vlgmr.msra.gmra.mxu1 %vm49_vm0, %v2250_v59  ;;  %v963_v59 = vpop.f32.mrf.mxu1 }
 0x1d0   :  { %v4022_v60 = vpop.permute.xlu1 %1822  ;;  %3623 = vmatpush3.msra.mxu1 %v3845_v13 }
 0x1d1   :  { %3624 = vmatprep.subr.mxu1 %v3853_v14 }
 0x1d2   :  { %v1821_v61 = vpop.permute.xlu0 %1820  ;;  %3625 = vmatpush3.msra.mxu1 %v3853_v14 }
 0x1d3   :  { %3634 = vmatprep.subr.mxu1 %v3845_v13 }
 0x1d4   :  { %v4028_v62 = vpop.permute.xlu1 %1992 }
 0x1d6   :  { %v2418_v63 = vpop.permute.xlu0 %2417 }
 0x1d7   :  { %3626 = vmatprep.mubr.msk.f32.mxu1 %vm49_vm0, %v2418_v63 }
 0x1d8   :  { %v4031_v0 = vpop.permute.xlu1 %2162 }
 0x1da   :  { %v2420_v1 = vpop.permute.xlu0 %2419 }
 0x1db   :  { %3627 = vmatmul.mubr.msk.f32.vlgmr.msra.gmra.mxu1 %vm49_vm0, %v2420_v1 }
 0x1dc   :  { %v4034_v2 = vpop.permute.xlu1 %2332  ;;  %3635 = vmatpush3.msra.mxu1 %v3845_v13 }
 0x1dd   :  { %3636 = vmatprep.subr.mxu1 %v3853_v14 }
 0x1de   :  { %v2588_v3 = vpop.permute.xlu0 %2587  ;;  %3637 = vmatpush3.msra.mxu1 %v3853_v14 }
 0x1df   :  { %3638 = vmatprep.mubr.msk.f32.mxu1 %vm49_vm0, %v2588_v3  ;;  %3646 = vmatprep.subr.mxu1 %v3845_v13 }
 0x1e0   :  { %v803_v4 = vpop.permute.xlu1 %802 }
 0x1e1   :  { %3511 = vmatprep.mubr.msk.f32.mxu0 %vm131_vm1, %v803_v4 }
 0x1e2   :  { %3512 = vmatmul.mubr.msk.f32.vlgmr.msra.gmra.mxu0 %vm131_vm1, %v805_v48  ;;  %v2590_v5 = vpop.permute.xlu0 %2589  ;;  %v3097_v48 = vld [vmem:[%s4188_s7] sm:$0xff] }
 0x1e3   :  { %3522 = vmatpush3.msra.mxu0 %v3865_v15  ;;  %3639 = vmatmul.mubr.msk.f32.vlgmr.msra.gmra.mxu1 %vm49_vm0, %v2590_v5 }
 0x1e4   :  { %v973_v6 = vpop.permute.xlu1 %972  ;;  %3533 = vmatprep.subr.mxu0 %v3865_v15  ;;  %3647 = vmatpush3.msra.mxu1 %v3845_v13 }
 0x1e5   :  { %3523 = vmatprep.mubr.msk.f32.mxu0 %vm131_vm1, %v973_v6  ;;  %3648 = vmatprep.subr.mxu1 %v3853_v14 }
 0x1e6   :  { %3524 = vmatmul.mubr.msk.f32.vlgmr.msra.gmra.mxu0 %vm131_vm1, %v975_v50  ;;  %v2758_v7 = vpop.permute.xlu0 %2757  ;;  %3649 = vmatpush3.msra.mxu1 %v3853_v14  ;;  %v3114_v50 = vpack.c.bf16 %v3098_v49, %v3097_v48 }
 0x1e7   :  { %3534 = vmatpush3.msra.mxu0 %v3865_v15  ;;  %3650 = vmatprep.mubr.msk.f32.mxu1 %vm49_vm0, %v2758_v7 }
 0x1e8   :  { %v1143_v8 = vpop.permute.xlu1 %1142  ;;  %3545 = vmatprep.subr.mxu0 %v3865_v15  ;;  %3658 = vmatprep.subr.mxu1 %v3845_v13 }
 0x1e9   :  { %3535 = vmatprep.mubr.msk.f32.mxu0 %vm131_vm1, %v1143_v8 }
 0x1ea   :  { %3536 = vmatmul.mubr.msk.f32.vlgmr.msra.gmra.mxu0 %vm131_vm1, %v1145_v52  ;;  %v2760_v9 = vpop.permute.xlu0 %2759  ;;  %v457_v52 = vpop.f32.mrf.mxu0 }
 0x1eb   :  { %3546 = vmatpush3.msra.mxu0 %v3865_v15  ;;  %3651 = vmatmul.mubr.msk.f32.vlgmr.msra.gmra.mxu1 %vm49_vm0, %v2760_v9 }
 0x1ec   :  { %v1313_v10 = vpop.permute.xlu1 %1312  ;;  %3557 = vmatprep.subr.mxu0 %v3865_v15  ;;  %3659 = vmatpush3.msra.mxu1 %v3845_v13 }
 0x1ed   :  { %3547 = vmatprep.mubr.msk.f32.mxu0 %vm131_vm1, %v1313_v10  ;;  %3660 = vmatprep.subr.mxu1 %v3853_v14 }
 0x1ee   :  { %3548 = vmatmul.mubr.msk.f32.vlgmr.msra.gmra.mxu0 %vm131_vm1, %v1315_v54  ;;  %v2928_v11 = vpop.permute.xlu0 %2927  ;;  %3661 = vmatpush3.msra.mxu1 %v3853_v14 }
 0x1ef   :  { %3558 = vmatpush3.msra.mxu0 %v3865_v15  ;;  %3662 = vmatprep.mubr.msk.f32.mxu1 %vm49_vm0, %v2928_v11 }
 0x1f0   :  { %v1483_v12 = vpop.permute.xlu1 %1482  ;;  %3569 = vmatprep.subr.mxu0 %v3865_v15  ;;  %3670 = vmatprep.subr.bf16.mxu1 %v3732_v30 }
 0x1f1   :  { %3559 = vmatprep.mubr.msk.f32.mxu0 %vm131_vm1, %v1483_v12 }
 0x1f2   :  { %3560 = vmatmul.mubr.msk.f32.vlgmr.msra.gmra.mxu0 %vm131_vm1, %v4012_v56  ;;  %v2930_v13 = vpop.permute.xlu0 %2929 }
 0x1f3   :  { %3570 = vmatpush3.msra.mxu0 %v3865_v15  ;;  %3663 = vmatmul.mubr.msk.f32.vlgmr.msra.gmra.mxu1 %vm49_vm0, %v2930_v13 }
 0x1f4   :  { %v1653_v16 = vpop.permute.xlu1 %1652  ;;  %3581 = vmatprep.subr.mxu0 %v3865_v15  ;;  %3671 = vmatpush3.bf16.msra.mxu1 %v3121_v29 }
 0x1f5   :  { %3571 = vmatprep.mubr.msk.f32.mxu0 %vm131_vm1, %v1653_v16  ;;  %3672 = vmatprep.subr.bf16.mxu1 %v3732_v30 }
 0x1f6   :  { %3572 = vmatmul.mubr.msk.f32.vlgmr.msra.gmra.mxu0 %vm131_vm1, %v4019_v58  ;;  %3686 = vmatprep.mubr.msk.bf16.mxu1 %vm3733_vm2, %v3732_v30 }
 0x1f7   :  { %3583 = vmatprep.mubr.msk.f32.mxu0 %vm131_vm1, %v1821_v61  ;;  %3582 = vmatpush3.msra.mxu0 %v3865_v15  ;;  %v3532_v61 = vpop.f32.mrf.mxu1 }
 0x1f8   :  { %v2503_v14 = vpop.permute.xlu1 %2502  ;;  %3593 = vmatprep.subr.mxu0 %v3865_v15 }
 0x1f9   :  { %v1133_v63 = vpop.f32.mrf.mxu1 }
 0x1fa   :  { %3584 = vmatmul.mubr.msk.f32.vlgmr.msra.gmra.mxu0 %vm131_vm1, %v4022_v60 }
 0x1fb   :  { %3594 = vmatpush3.msra.mxu0 %v3865_v15  ;;  %v3544_v1 = vpop.f32.mrf.mxu1 }
 0x1fc   :  { %v2673_v17 = vpop.permute.xlu1 %2672  ;;  %3605 = vmatprep.subr.mxu0 %v3865_v15 }
 0x1fd   :  { %v1303_v4 = vpop.f32.mrf.mxu1 }
 0x1ff   :  { %v3556_v6 = vpop.f32.mrf.mxu1 }
 0x200   :  { %v2843_v18 = vpop.permute.xlu1 %2842 }
 0x201   :  { %v1473_v9 = vpop.f32.mrf.mxu1 }
 0x203   :  { %v3568_v11 = vpop.f32.mrf.mxu1 }
 0x204   :  { %v1991_v19 = vpop.permute.xlu1 %1990 }
 0x205   :  { %3595 = vmatprep.mubr.msk.f32.mxu0 %vm131_vm1, %v1991_v19  ;;  %v3489_v54 = vpop.f32.mrf.mxu0  ;;  %v1643_v16 = vpop.f32.mrf.mxu1 }
 0x206   :  { %3596 = vmatmul.mubr.msk.f32.vlgmr.msra.gmra.mxu0 %vm131_vm1, %v4028_v62 }
 0x207   :  { %3606 = vmatpush3.msra.mxu0 %v3865_v15  ;;  %v538_v56 = vpop.f32.mrf.mxu0 }
 0x208   :  { %v2161_v20 = vpop.permute.xlu1 %2160  ;;  %3617 = vmatprep.subr.mxu0 %v3865_v15 }
 0x209   :  { %3607 = vmatprep.mubr.msk.f32.mxu0 %vm131_vm1, %v2161_v20  ;;  %v3496_v58 = vpop.f32.mrf.mxu0 }
 0x20a   :  { %3608 = vmatmul.mubr.msk.f32.vlgmr.msra.gmra.mxu0 %vm131_vm1, %v4031_v0 }
 0x20b   :  { %3618 = vmatpush3.msra.mxu0 %v3865_v15  ;;  %v623_v60 = vpop.f32.mrf.mxu0 }
 0x20c   :  { %v2331_v21 = vpop.permute.xlu1 %2330  ;;  %3629 = vmatprep.subr.mxu0 %v3865_v15 }
 0x20d   :  { %3619 = vmatprep.mubr.msk.f32.mxu0 %vm131_vm1, %v2331_v21 }
 0x20e   :  { %3620 = vmatmul.mubr.msk.f32.vlgmr.msra.gmra.mxu0 %vm131_vm1, %v4034_v2 }
 0x20f   :  { %3630 = vmatpush3.msra.mxu0 %v3865_v15 }
 0x210   :  { %v2501_v22 = vpop.permute.xlu1 %2500  ;;  %3641 = vmatprep.subr.mxu0 %v3865_v15 }
 0x211   :  { %3631 = vmatprep.mubr.msk.f32.mxu0 %vm131_vm1, %v2501_v22 }
 0x212   :  { %3632 = vmatmul.mubr.msk.f32.vlgmr.msra.gmra.mxu0 %vm131_vm1, %v2503_v14 }
 0x213   :  { %3642 = vmatpush3.msra.mxu0 %v3865_v15 }
 0x214   :  { %v2671_v23 = vpop.permute.xlu1 %2670  ;;  %3653 = vmatprep.subr.mxu0 %v3865_v15 }
 0x215   :  { %3643 = vmatprep.mubr.msk.f32.mxu0 %vm131_vm1, %v2671_v23 }
 0x216   :  { %3644 = vmatmul.mubr.msk.f32.vlgmr.msra.gmra.mxu0 %vm131_vm1, %v2673_v17  ;;  %v3580_v17 = vpop.f32.mrf.mxu1 }
 0x217   :  { %3654 = vmatpush3.msra.mxu0 %v3865_v15 }
 0x218   :  { %v2841_v24 = vpop.permute.xlu1 %2840  ;;  %3665 = vmatprep.subr.mxu0 %v3865_v15  ;;  %v1811_v19 = vpop.f32.mrf.mxu1 }
 0x219   :  { %3655 = vmatprep.mubr.msk.f32.mxu0 %vm131_vm1, %v2841_v24 }
 0x21a   :  { %3656 = vmatmul.mubr.msk.f32.vlgmr.msra.gmra.mxu0 %vm131_vm1, %v2843_v18 }
 0x21b   :  { %3666 = vmatpush3.msra.mxu0 %v3865_v15  ;;  %v3109_v15 = vld [vmem:[%s4188_s7 + $0x60] sm:$0xff] }
 0x21c   :  { %v3011_v25 = vpop.permute.xlu1 %3010  ;;  %3690 = vmatprep.subr.bf16.mxu0 %v3732_v30  ;;  %v3120_v32 = vpack.c.bf16 %v3110_v31, %v3109_v15  ;;  %v548_v31 = vmul.f32 %v3489_v54, %v3484_v51 }
 0x21d   :  { %3667 = vmatprep.mubr.msk.f32.mxu0 %vm131_vm1, %v3011_v25 }
 0x21e   :  { %3673 = vmatpush3.bf16.msra.mxu1 %v3120_v32  ;;  %v547_v32 = vmul.f32 %v538_v56, %v457_v52 }
 0x21f   :  { %3674 = vmatprep.subr.bf16.mxu1 %v3732_v30 }
 0x220   :  { %v3013_v26 = vpop.permute.xlu1 %3012 }
 0x221   :  { %3668 = vmatmul.mubr.msk.f32.vlgmr.msra.gmra.mxu0 %vm131_vm1, %v3013_v26 }
 0x222   :  { %3675 = vmatpush3.bf16.msra.mxu1 %v3119_v35  ;;  %3692 = vmatprep.mubr.msk.bf16.mxu0 %vm3733_vm2, %v3732_v30 }
 0x223   :  { %3676 = vmatprep.subr.bf16.mxu1 %v3732_v30 }
 0x226   :  { %3677 = vmatpush3.bf16.msra.mxu1 %v3118_v38 }
 0x227   :  { %3678 = vmatprep.subr.bf16.mxu1 %v3732_v30 }
 0x22a   :  { %3679 = vmatpush3.bf16.msra.mxu1 %v3117_v41 }
 0x22b   :  { %3680 = vmatprep.subr.bf16.mxu1 %v3732_v30 }
 0x22e   :  { %3681 = vmatpush3.bf16.msra.mxu1 %v3116_v44 }
 0x22f   :  { %3682 = vmatprep.subr.bf16.mxu1 %v3732_v30 }
 0x232   :  { %3683 = vmatpush3.bf16.msra.mxu1 %v3115_v47 }
 0x233   :  { %3684 = vmatprep.subr.bf16.mxu1 %v3732_v30 }
 0x236   :  { %3685 = vmatpush3.bf16.msra.mxu1 %v3114_v50 }
 0x278   :  { %v3501_v62 = vpop.f32.mrf.mxu0 }
 0x279   :  { %v716_v28 = vmul.f32 %v3501_v62, %v3496_v58 }
 0x27a   :  { %v706_v0 = vpop.f32.mrf.mxu0 }
 0x27b   :  { %v715_v29 = vmul.f32 %v706_v0, %v623_v60  ;;  %v718_v36 = vadd.f32 %v716_v28, %v548_v31 }
 0x27d   :  { %v717_v37 = vadd.f32 %v715_v29, %v547_v32 }
 0x27f   :  { %v3592_v21 = vpop.f32.mrf.mxu1 }
 0x281   :  { %v1981_v23 = vpop.f32.mrf.mxu1 }
 0x287   :  { %v3604_v25 = vpop.f32.mrf.mxu1 }
 0x289   :  { %v2151_v27 = vpop.f32.mrf.mxu1 }
 0x28f   :  { %v3616_v15 = vpop.f32.mrf.mxu1 }
 0x291   :  { %v2321_v41 = vpop.f32.mrf.mxu1 }
 0x29b   :  { %v3628_v47 = vpop.f32.mrf.mxu1 }
 0x2a2   :  { %v3513_v2 = vpop.f32.mrf.mxu0 }
 0x2a3   :  { %v886_v33 = vmul.f32 %v3513_v2, %v3508_v53 }
 0x2a4   :  { %v876_v3 = vpop.f32.mrf.mxu0 }
 0x2a5   :  { %v885_v34 = vmul.f32 %v876_v3, %v793_v55  ;;  %v888_v42 = vadd.f32 %v886_v33, %v718_v36 }
 0x2a6   :  { %v3525_v5 = vpop.f32.mrf.mxu0 }
 0x2a7   :  { %v1056_v38 = vmul.f32 %v3525_v5, %v3520_v57  ;;  %v887_v43 = vadd.f32 %v885_v34, %v717_v37  ;;  %v2491_v57 = vpop.f32.mrf.mxu1 }
 0x2a8   :  { %v1046_v7 = vpop.f32.mrf.mxu0 }
 0x2a9   :  { %v1055_v39 = vmul.f32 %v1046_v7, %v963_v59  ;;  %v1058_v48 = vadd.f32 %v1056_v38, %v888_v42 }
 0x2aa   :  { %v3537_v8 = vpop.f32.mrf.mxu0 }
 0x2ab   :  { %v1226_v44 = vmul.f32 %v3537_v8, %v3532_v61  ;;  %v1057_v49 = vadd.f32 %v1055_v39, %v887_v43  ;;  %v3640_v61 = vpop.f32.mrf.mxu1 }
 0x2ac   :  { %v1216_v10 = vpop.f32.mrf.mxu0 }
 0x2ad   :  { %v1225_v45 = vmul.f32 %v1216_v10, %v1133_v63  ;;  %v1228_v53 = vadd.f32 %v1226_v44, %v1058_v48 }
 0x2ae   :  { %v3549_v12 = vpop.f32.mrf.mxu0 }
 0x2af   :  { %v1396_v50 = vmul.f32 %v3549_v12, %v3544_v1  ;;  %v1227_v54 = vadd.f32 %v1225_v45, %v1057_v49 }
 0x2b0   :  { %v1386_v13 = vpop.f32.mrf.mxu0 }
 0x2b1   :  { %v1395_v51 = vmul.f32 %v1386_v13, %v1303_v4  ;;  %v1398_v59 = vadd.f32 %v1396_v50, %v1228_v53  ;;  %v3163_v50 = vld [vmem:[%s4189_s8] sm:$0xff] }
 0x2b2   :  { %v3561_v14 = vpop.f32.mrf.mxu0 }
 0x2b3   :  { %v1566_v55 = vmul.f32 %v3561_v14, %v3556_v6  ;;  %v1397_v60 = vadd.f32 %v1395_v51, %v1227_v54  ;;  %v2661_v6 = vpop.f32.mrf.mxu1  ;;  %v3164_v51 = vld [vmem:[%s4189_s8 + $0x8] sm:$0xff] }
 0x2b4   :  { %v1556_v18 = vpop.f32.mrf.mxu0 }
 0x2b5   :  { %v1565_v56 = vmul.f32 %v1556_v18, %v1473_v9  ;;  %v1568_v63 = vadd.f32 %v1566_v55, %v1398_v59 }
 0x2b6   :  { %v3573_v20 = vpop.f32.mrf.mxu0 }
 0x2b7   :  { %v1736_v62 = vmul.f32 %v3573_v20, %v3568_v11  ;;  %v1567_v3 = vadd.f32 %v1565_v56, %v1397_v60  ;;  %v3652_v11 = vpop.f32.mrf.mxu1 }
 0x2b8   :  { %v1726_v22 = vpop.f32.mrf.mxu0 }
 0x2b9   :  { %v1735_v0 = vmul.f32 %v1726_v22, %v1643_v16  ;;  %v1738_v1 = vadd.f32 %v1736_v62, %v1568_v63  ;;  %v2831_v33 = vpop.f32.mrf.mxu1 }
 0x2ba   :  { %v3585_v24 = vpop.f32.mrf.mxu0 }
 0x2bb   :  { %v1904_v5 = vmul.f32 %v3585_v24, %v3580_v17  ;;  %v1737_v4 = vadd.f32 %v1735_v0, %v1567_v3  ;;  %v3664_v36 = vpop.f32.mrf.mxu1 }
 0x2bc   :  { %v1894_v26 = vpop.f32.mrf.mxu0 }
 0x2bd   :  { %v1903_v7 = vmul.f32 %v1894_v26, %v1811_v19  ;;  %v1906_v9 = vadd.f32 %v1904_v5, %v1738_v1  ;;  %v3001_v42 = vpop.f32.mrf.mxu1 }
 0x2bf   :  { %v1905_v14 = vadd.f32 %v1903_v7, %v1737_v4 }
 0x2c6   :  { %v3597_v30 = vpop.f32.mrf.mxu0 }
 0x2c7   :  { %v2074_v10 = vmul.f32 %v3597_v30, %v3592_v21 }
 0x2c8   :  { %v2064_v35 = vpop.f32.mrf.mxu0 }
 0x2c9   :  { %v2073_v12 = vmul.f32 %v2064_v35, %v1981_v23  ;;  %v2076_v16 = vadd.f32 %v2074_v10, %v1906_v9 }
 0x2ca   :  { %v3609_v40 = vpop.f32.mrf.mxu0 }
 0x2cb   :  { %v2244_v18 = vmul.f32 %v3609_v40, %v3604_v25  ;;  %v2075_v20 = vadd.f32 %v2073_v12, %v1905_v14 }
 0x2cc   :  { %v2234_v46 = vpop.f32.mrf.mxu0 }
 0x2cd   :  { %v2243_v28 = vmul.f32 %v2234_v46, %v2151_v27  ;;  %v2246_v17 = vadd.f32 %v2244_v18, %v2076_v16 }
 0x2ce   :  { %v3621_v52 = vpop.f32.mrf.mxu0 }
 0x2cf   :  { %v2414_v22 = vmul.f32 %v3621_v52, %v3616_v15  ;;  %v2245_v19 = vadd.f32 %v2243_v28, %v2075_v20  ;;  %v3166_v52 = vpack.c.bf16 %v3164_v51, %v3163_v50 }
 0x2d0   :  { %v2404_v58 = vpop.f32.mrf.mxu0 }
 0x2d1   :  { %v2413_v31 = vmul.f32 %v2404_v58, %v2321_v41  ;;  %v2416_v23 = vadd.f32 %v2414_v22, %v2246_v17  ;;  %3691 = vmatpush3.bf16.msra.mxu0 %v3166_v52 }
 0x2d2   :  { %v3633_v2 = vpop.f32.mrf.mxu0 }
 0x2d3   :  { %v2584_v24 = vmul.f32 %v3633_v2, %v3628_v47  ;;  %v2415_v30 = vadd.f32 %v2413_v31, %v2245_v19 }
 0x2d4   :  { %v2574_v8 = vpop.f32.mrf.mxu0 }
 0x2d5   :  { %v2583_v26 = vmul.f32 %v2574_v8, %v2491_v57  ;;  %v2586_v25 = vadd.f32 %v2584_v24, %v2416_v23 }
 0x2d6   :  { %v3645_v13 = vpop.f32.mrf.mxu0 }
 0x2d7   :  { %v2754_v34 = vmul.f32 %v3645_v13, %v3640_v61  ;;  %v2585_v27 = vadd.f32 %v2583_v26, %v2415_v30 }
 0x2d8   :  { %v2744_v29 = vpop.f32.mrf.mxu0 }
 0x2d9   :  { %v2753_v35 = vmul.f32 %v2744_v29, %v2661_v6  ;;  %v2756_v40 = vadd.f32 %v2754_v34, %v2586_v25 }
 0x2da   :  { %v3657_v32 = vpop.f32.mrf.mxu0 }
 0x2db   :  { %v2924_v37 = vmul.f32 %v3657_v32, %v3652_v11  ;;  %v2755_v15 = vadd.f32 %v2753_v35, %v2585_v27 }
 0x2dc   :  { %v2914_v21 = vpop.f32.mrf.mxu0 }
 0x2dd   :  { %v2923_v38 = vmul.f32 %v2914_v21, %v2831_v33  ;;  %v2926_v44 = vadd.f32 %v2924_v37, %v2756_v40 }
 0x2df   :  { %v2925_v45 = vadd.f32 %v2923_v38, %v2755_v15 }
 0x2e1   :  { %v3669_v39 = vpop.f32.mrf.mxu0 }
 0x2e2   :  { %v3094_v41 = vmul.f32 %v3669_v39, %v3664_v36 }
 0x2e3   :  { %v3084_v43 = vpop.f32.mrf.mxu0 }
 0x2e4   :  { %v3093_v46 = vmul.f32 %v3084_v43, %v3001_v42  ;;  %v3096_v47 = vadd.f32 %v3094_v41, %v2926_v44 }
 0x2e6   :  { %v3095_v48 = vadd.f32 %v3093_v46, %v2925_v45 }
 0x2e8   :  { %v3113_v49 = vpack.c.bf16 %v3096_v47, %v3095_v48 }
 0x2ea   :  { %3687 = vmatmul.mubr.bf16.vlgmr.msra.gmra.mxu1 %v3113_v49 }
 0x3aa   :  { %v3156_v53 = vpop.f32.mrf.mxu1 }
 0x3ac   :  { %v3688_v54 = vpop.f32.mrf.mxu1 }
 0x3ae   :  { %v3159_v55 = vpop.f32.mrf.mxu1 }
 0x3af   :  { %v3165_v56 = vpack.c.bf16 %v3159_v55, %v3156_v53 }
 0x3b0   :  { %v3689_v58 = vpop.f32.mrf.mxu1 }
 0x3b1   :  { %3693 = vmatmul.mubr.msk.bf16.vlgmr.msra.gmra.mxu0 %vm49_vm0, %v3165_v56 }
 0x471   :  { %v3204_v57 = vpop.f32.mrf.mxu0 }
 0x472   :  { %v3211_v59 = vmul.f32 0.5, %v3204_v57 }
 0x473   :  { %v3694_v60 = vpop.f32.mrf.mxu0 }
 0x474   :  { %3713 = vtanh.f32 %v3211_v59 }
 0x475   :  { %v3207_v62 = vpop.f32.mrf.mxu0 }
 0x476   :  { %v3212_v0 = vmul.f32 0.5, %v3207_v62 }
 0x477   :  { %v3695_v2 = vpop.f32.mrf.mxu0 }
 0x478   :  { %3715 = vtanh.f32 %v3212_v0 }
 0x481   :  { %v3714_v61 = vpop.eup %3713 }
 0x482   :  { %v3215_v63 = vadd.f32 1.0, %v3714_v61 }
 0x484   :  { %v3217_v3 = vmul.f32 0.5, %v3215_v63 }
 0x485   :  { %v3716_v5 = vpop.eup %3715 }
 0x486   :  { %v3219_v7 = vmul.f32 %v3217_v3, %v3204_v57  ;;  %v3216_v8 = vadd.f32 1.0, %v3716_v5 }
 0x488   :  { %v3221_v1 = vmul.f32 1.6666666, %v3219_v7  ;;  %v3218_v4 = vmul.f32 0.5, %v3216_v8 }
 0x48a   :  { %v3220_v10 = vmul.f32 %v3218_v4, %v3207_v62  ;;  %3228 = vrot.lane.b32.xlu0 %v3221_v1, %s3719_s29  ;;  %3224 = vst.msk [vmem:[%s4190_s9] sm:$0xff] %vm3223_vm3, %v3221_v1 }
 0x48c   :  { %v3222_v12 = vmul.f32 1.6666666, %v3220_v10 }
 0x48e   :  { %3230 = vrot.lane.b32.xlu1 %v3222_v12, %s3719_s29  ;;  %3225 = vst.msk [vmem:[%s4190_s9 + $0x8] sm:$0xff] %vm3223_vm3, %v3222_v12 }
 0x4fc   :  { %v3229_v13 = vpop.permute.xlu0 %3228 }
 0x4fd   :  { %3234 = vst.msk [vmem:[%s4191_s10] sm:$0xff] %vm3223_vm3, %v3229_v13 }
 0x500   :  { %v3231_v6 = vpop.permute.xlu1 %3230 }
 0x501   :  { %3235 = vst.msk [vmem:[%s4191_s10 + $0x8] sm:$0xff] %vm3223_vm3, %v3231_v6 }

// kernel: interaction_block_pallas.15
= control target key start
LH: loop header
LB: loop body
LE: loop exit
PB: predicated region body
PF: predicated region fallthrough
CT: control target
= control target key end

     0   :  { %v383_v3 = vmov 0.0   ;;  %vm384_vm0 = vmmov 0   ;;  %s516_s0 = inlined_call_operand.vmem [shape: f32[16,32], index: 0, kind: input, shape index: {}]   ;;  %s517_s1 = inlined_call_operand.vmem [shape: f32[16,32], index: 1, kind: input, shape index: {}]   ;;  %s518_s2 = inlined_call_operand.vmem [shape: f32[32,32], index: 2, kind: input, shape index: {}]   ;;  %s519_s3 = inlined_call_operand.vmem [shape: f32[32,32], index: 3, kind: input, shape index: {}]   ;;  %s520_s4 = inlined_call_operand.vmem [shape: f32[32,32], index: 4, kind: input, shape index: {}]   ;;  %s521_s5 = inlined_call_operand.vmem [shape: f32[32,32], index: 5, kind: input, shape index: {}]   ;;  %s522_s6 = inlined_call_operand.hbm [shape: f32[16,32], index: 6, kind: output, shape index: {}]  }
   0x1   :  { %v38_v0 = vld [vmem:[%s519_s3 + $0x10] sm:$0xff]  ;;  %v39_v1 = vld [vmem:[%s519_s3 + $0x18] sm:$0xff]  ;;  %312 = vmatprep.subr.bf16.mxu0 %v383_v3  ;;  %320 = vmatprep.subr.bf16.mxu1 %v383_v3  ;;  %v36_v6 = vld [vmem:[%s519_s3] sm:$0xff] }
   0x2   :  { %v31_v2 = vld [vmem:[%s518_s2 + $0x10] sm:$0xff]  ;;  %v42_v4 = vpack.c.bf16 %v39_v1, %v38_v0  ;;  %v32_v5 = vld [vmem:[%s518_s2 + $0x18] sm:$0xff]  ;;  %v37_v7 = vld [vmem:[%s519_s3 + $0x8] sm:$0xff]  ;;  %316 = vmatprep.mubr.msk.bf16.mxu0 %vm384_vm0, %v383_v3  ;;  %324 = vmatprep.mubr.msk.bf16.mxu1 %vm384_vm0, %v383_v3 }
   0x3   :  { %v35_v8 = vpack.c.bf16 %v32_v5, %v31_v2  ;;  %v29_v9 = vld [vmem:[%s518_s2] sm:$0xff]  ;;  %v30_v10 = vld [vmem:[%s518_s2 + $0x8] sm:$0xff]  ;;  %v41_v11 = vpack.c.bf16 %v37_v7, %v36_v6 }
   0x4   :  { %313 = vmatpush3.bf16.msra.mxu0 %v42_v4  ;;  %v456_v12 = vld [vmem:[%s517_s1] sm:$0xff]  ;;  %v461_v13 = vld [vmem:[%s517_s1 + $0x8] sm:$0xff]  ;;  %v34_v14 = vpack.c.bf16 %v30_v10, %v29_v9 }
   0x5   :  { %321 = vmatpush3.bf16.msra.mxu1 %v35_v8  ;;  %314 = vmatprep.subr.bf16.mxu0 %v383_v3  ;;  %v27_v15 = vld [vmem:[%s516_s0] sm:$0xff]  ;;  %v28_v16 = vld [vmem:[%s516_s0 + $0x8] sm:$0xff] }
   0x6   :  { %11 = vsyncpa [#allocation3], 0  ;;  %322 = vmatprep.subr.bf16.mxu1 %v383_v3  ;;  %v40_v17 = vpack.c.bf16 %v461_v13, %v456_v12  ;;  %vm43_vm1 = vcmask 261120   ;;  %v33_v18 = vpack.c.bf16 %v28_v16, %v27_v15  ;;  %v146_v19 = vld [vmem:[%s520_s4 + $0x10] sm:$0xff]  ;;  %v147_v20 = vld [vmem:[%s520_s4 + $0x18] sm:$0xff] }
   0x7   :  { %v150_v21 = vpack.c.bf16 %v147_v20, %v146_v19  ;;  %v144_v22 = vld [vmem:[%s520_s4] sm:$0xff]  ;;  %v145_v23 = vld [vmem:[%s520_s4 + $0x8] sm:$0xff]  ;;  %v209_v48 = vld [vmem:[%s521_s5 + $0x10] sm:$0xff] }
   0x8   :  { %315 = vmatpush3.bf16.msra.mxu0 %v41_v11  ;;  %v149_v24 = vpack.c.bf16 %v145_v23, %v144_v22  ;;  %v210_v49 = vld [vmem:[%s521_s5 + $0x18] sm:$0xff]  ;;  %v207_v51 = vld [vmem:[%s521_s5] sm:$0xff]  ;;  %v208_v52 = vld [vmem:[%s521_s5 + $0x8] sm:$0xff]  ;;  %s385_s5 = smov [#allocation2]  }
   0x9   :  { %323 = vmatpush3.bf16.msra.mxu1 %v34_v14  ;;  %328 = vmatprep.subr.bf16.mxu0 %v383_v3  ;;  %v213_v50 = vpack.c.bf16 %v210_v49, %v209_v48  ;;  %v212_v53 = vpack.c.bf16 %v208_v52, %v207_v51  ;;  %s285_s8 = sshll.u32 %s385_s5, 4  ;;  %s286_s8 = int_to_ptr.vmem [resolvable:$true] %s285_s8 }
   0xa   :  { %336 = vmatprep.subr.bf16.mxu1 %v383_v3  ;;  %s361_s9 = scalar_lea.vmem %s286_s8, 256  ;;  %p366_p1 = scmp.lt.s32.totalorder %s286_s8, %s286_s8 }
   0xb   :  { %317 = vmatmul.mubr.msk.bf16.vlgmr.msra.gmra.mxu0 %vm43_vm1, %v40_v17  ;;  %p362_p0 = scmp.ne.s32.totalorder %s286_s8, %s361_s9  ;;  %p367_p2 = scmp.lt.s32.totalorder %s361_s9, %s361_s9 }
   0xc   :  { %325 = vmatmul.mubr.msk.bf16.vlgmr.msra.gmra.mxu1 %vm43_vm1, %v33_v18  ;;  %332 = vmatprep.mubr.msk.bf16.mxu0 %vm384_vm0, %v383_v3 }
   0xd   :  { %340 = vmatprep.mubr.msk.bf16.mxu1 %vm384_vm0, %v383_v3  ;;  %329 = vmatpush3.bf16.msra.mxu0 %v150_v21  ;;  %p368_p3 = por %p367_p2, %p366_p1 }
   0xe   :  { %330 = vmatprep.subr.bf16.mxu0 %v383_v3  ;;  %337 = vmatpush3.bf16.msra.mxu1 %v213_v50 }
   0xf   :  { %338 = vmatprep.subr.bf16.mxu1 %v383_v3  ;;  %p369_p4 = pnand %p368_p3, %p362_p0 }
  0x11   :  { %331 = vmatpush3.bf16.msra.mxu0 %v149_v24 }
  0x12   :  { %339 = vmatpush3.bf16.msra.mxu1 %v212_v53 }
  0xcb   :  { %v81_v25 = vpop.f32.mrf.mxu0 }
  0xcc   :  { %v125_v26 = vpop.f32.mrf.mxu1 }
  0xcd   :  { %v126_v27 = vadd.f32 %v125_v26, %v81_v25  ;;  %v318_v28 = vpop.f32.mrf.mxu0 }
  0xce   :  { %v326_v29 = vpop.f32.mrf.mxu1 }
  0xcf   :  { %v132_v30 = vmul.f32 0.5, %v126_v27  ;;  %v84_v31 = vpop.f32.mrf.mxu0 }
  0xd0   :  { %v128_v32 = vpop.f32.mrf.mxu1 }
  0xd1   :  { %349 = vtanh.f32 %v132_v30  ;;  %v129_v33 = vadd.f32 %v128_v32, %v84_v31  ;;  %v319_v34 = vpop.f32.mrf.mxu0 }
  0xd2   :  { %v327_v35 = vpop.f32.mrf.mxu1 }
  0xd3   :  { %v133_v36 = vmul.f32 0.5, %v129_v33 }
  0xd5   :  { %351 = vtanh.f32 %v133_v36 }
  0xde   :  { %v350_v37 = vpop.eup %349 }
  0xdf   :  { %v136_v38 = vadd.f32 1.0, %v350_v37 }
  0xe1   :  { %v138_v39 = vmul.f32 0.5, %v136_v38 }
  0xe2   :  { %v352_v40 = vpop.eup %351 }
  0xe3   :  { %v137_v41 = vadd.f32 1.0, %v352_v40  ;;  %v140_v42 = vmul.f32 %v138_v39, %v126_v27 }
  0xe5   :  { %v139_v43 = vmul.f32 0.5, %v137_v41  ;;  %v142_v45 = vmul.f32 1.6666666, %v140_v42 }
  0xe7   :  { %v141_v44 = vmul.f32 %v139_v43, %v129_v33 }
  0xe9   :  { %v143_v46 = vmul.f32 1.6666666, %v141_v44 }
  0xeb   :  { %v148_v47 = vpack.c.bf16 %v143_v46, %v142_v45 }
  0xed   :  { %333 = vmatmul.mubr.msk.bf16.vlgmr.msra.gmra.mxu0 %vm43_vm1, %v148_v47 }
 0x1ad   :  { %v188_v54 = vpop.f32.mrf.mxu0 }
 0x1ae   :  { %v195_v55 = vmul.f32 0.5, %v188_v54 }
 0x1af   :  { %v334_v56 = vpop.f32.mrf.mxu0 }
 0x1b0   :  { %353 = vtanh.f32 %v195_v55 }
 0x1b1   :  { %v191_v57 = vpop.f32.mrf.mxu0 }
 0x1b2   :  { %v196_v58 = vmul.f32 0.5, %v191_v57 }
 0x1b3   :  { %v335_v59 = vpop.f32.mrf.mxu0 }
 0x1b4   :  { %355 = vtanh.f32 %v196_v58 }
 0x1bd   :  { %v354_v60 = vpop.eup %353 }
 0x1be   :  { %v199_v61 = vadd.f32 1.0, %v354_v60 }
 0x1c0   :  { %v201_v62 = vmul.f32 0.5, %v199_v61 }
 0x1c1   :  { %v356_v63 = vpop.eup %355 }
 0x1c2   :  { %v200_v0 = vadd.f32 1.0, %v356_v63  ;;  %v203_v1 = vmul.f32 %v201_v62, %v188_v54 }
 0x1c4   :  { %v202_v2 = vmul.f32 0.5, %v200_v0  ;;  %v205_v4 = vmul.f32 1.6666666, %v203_v1 }
 0x1c6   :  { %v204_v3 = vmul.f32 %v202_v2, %v191_v57 }
 0x1c8   :  { %v206_v5 = vmul.f32 1.6666666, %v204_v3 }
 0x1ca   :  { %v211_v6 = vpack.c.bf16 %v206_v5, %v205_v4 }
 0x1cc   :  { %341 = vmatmul.mubr.msk.bf16.vlgmr.msra.gmra.mxu1 %vm43_vm1, %v211_v6 }
 0x28c   :  { %v251_v7 = vpop.f32.mrf.mxu1 }
 0x28d   :  { %v258_v8 = vmul.f32 0.5, %v251_v7 }
 0x28e   :  { %v342_v9 = vpop.f32.mrf.mxu1 }
 0x28f   :  { %357 = vtanh.f32 %v258_v8 }
 0x290   :  { %v254_v10 = vpop.f32.mrf.mxu1 }
 0x291   :  { %v259_v11 = vmul.f32 0.5, %v254_v10 }
 0x292   :  { %v343_v14 = vpop.f32.mrf.mxu1 }
 0x293   :  { %359 = vtanh.f32 %v259_v11 }
 0x29c   :  { %v358_v15 = vpop.eup %357 }
 0x29d   :  { %v262_v16 = vadd.f32 1.0, %v358_v15 }
 0x29f   :  { %v264_v17 = vmul.f32 0.5, %v262_v16 }
 0x2a0   :  { %v360_v18 = vpop.eup %359 }
 0x2a1   :  { %v266_v19 = vmul.f32 %v264_v17, %v251_v7  ;;  %v263_v20 = vadd.f32 1.0, %v360_v18 }
 0x2a3   :  { %v268_v21 = vmul.f32 1.6666666, %v266_v19  ;;  %v265_v22 = vmul.f32 0.5, %v263_v20 }
 0x2a5   :  { %v270_v23 = vadd.f32 %v268_v21, %v142_v45  ;;  %v267_v24 = vmul.f32 %v265_v22, %v254_v10 }
 0x2a7   :  { %v272_v25 = vmul.f32 0.70710677, %v270_v23  ;;  %v269_v26 = vmul.f32 1.6666666, %v267_v24 }
 0x2a9   :  { %v274_v27 = vadd.f32 %v272_v25, %v456_v12  ;;  %v271_v28 = vadd.f32 %v269_v26, %v143_v46 }
 0x2ab   :  { %v276_v29 = vmul.f32 0.70710677, %v274_v27  ;;  %v273_v30 = vmul.f32 0.70710677, %v271_v28 }
 0x2ad   :  { %278 = vst.msk [vmem:[#allocation2] sm:$0xff] %vm43_vm1, %v276_v29  ;;  %v275_v31 = vadd.f32 %v273_v30, %v461_v13 }
 0x2af   :  { %v277_v32 = vmul.f32 0.70710677, %v275_v31 }
 0x2b1   :  { %279 = vst.msk [vmem:[#allocation2 + $0x8] sm:$0xff] %vm43_vm1, %v277_v32 }
 0x2b2   :  { %372 = shalt.err (!%p369_p4)
}
 0x2b3   :  { %s386_s10 = smov 128   ;;  %s387_s11 = smov 8  }
 0x2b4   :  { %291 = dma.vmem_to_hbm [thread:$0]  %s286_s8, 256, %s522_s6, [#allocation3], %s386_s10, %s386_s10, %s387_s11  }
 0x2b5   :  { %381 = dma.done.wait [#allocation3], 256  }
 0x2b6   :  { %382 = vsyncadd [#allocation3], 4294967040 }
 0x2b7   :  { %295 = vsyncpa [#allocation3], 1 }

</bundles_post_ra>
